<compile_context>
chip_gen: v7x
topology: tpu7x:2x2x1
jax: 0.10.0
libtpu: 0.0.40
codegen_flags: <defaults>
</compile_context>

<pallas_src>
import functools

import jax
import jax.numpy as jnp
from jax.experimental import pallas as pl
from jax.experimental.pallas import tpu as pltpu


LANE = 128  # TPU lane width; feature dims are padded to multiples of this.


# ---------------------------------------------------------------------------
# Fused Pallas kernel (one grid step = TM contiguous nodes = GPT whole graphs)
# ---------------------------------------------------------------------------
def fused_gnn_kernel(
    adj_ref,     # [TM, TM]     bf16  0/1 (edge-count) adjacency, tile-diagonal
    invdeg_ref,  # [TM, 1]      f32   1 / max(deg, 1)
    x_ref,       # [TM, Fp]     bf16  node features (zero-padded to 128 lanes)
    w1_ref,      # [2*Fp, 256]  bf16  [Wl1 ; Wr1] stacked on the K axis
    b1_ref,      # [1, 256]     f32
    w2_ref,      # [256, 256]   bf16  [Wl2 | Wr2] concatenated on the N axis
    b2_ref,      # [1, 128]     f32
    w3_ref,      # [128, 256]   bf16  [Wl3_pad128 | Wr3_pad128]
    b3_ref,      # [1, 128]     f32   (zero-padded 64 -> 128)
    wlin_ref,    # [128, Cp]    bf16  classifier weight (rows zero-padded)
    blin_ref,    # [1, Cp]      f32
    p_ref,       # [GPT, TM]    bf16  0/1 graph-membership one-hot
    invcnt_ref,  # [GPT, 1]     f32   1 / nodes-per-graph
    o_ref,       # [GPT, Cp]    f32   log-probabilities (padded lanes = junk)
    *,
    num_classes,
):
    f32 = jnp.float32
    bf16 = jnp.bfloat16

    adj = adj_ref[...]        # bf16 0/1
    inv_deg = invdeg_ref[...]  # f32 [TM, 1]
    x = x_ref[...]            # bf16 [TM, Fp]

    # ---- conv1 + ReLU: one fused dot on [mean_agg(x) || x] ------------------
    ax = jnp.dot(adj, x, preferred_element_type=f32) * inv_deg     # exact mean
    cat = jnp.concatenate([ax.astype(bf16), x], axis=1)            # [TM, 2*Fp]
    h = jnp.dot(cat, w1_ref[...], preferred_element_type=f32) + b1_ref[...]
    h = jnp.maximum(h, 0.0)                                        # [TM, 256] f32
    # dropout(p=0.3, training=False) -> identity

    # ---- conv2 + ReLU: reassociated A @ (h @ Wl); Wl|Wr fused in one dot ----
    hb = h.astype(bf16)
    z = jnp.dot(hb, w2_ref[...], preferred_element_type=f32)       # [TM, 256]
    hw, skip = z[:, :128], z[:, 128:]
    agg = jnp.dot(adj, hw.astype(bf16), preferred_element_type=f32) * inv_deg
    h = jnp.maximum(agg + skip + b2_ref[...], 0.0)                 # [TM, 128] f32

    # ---- conv3 + ReLU: output zero-padded to 128 lanes (stays lane-dense) ---
    hb = h.astype(bf16)
    z = jnp.dot(hb, w3_ref[...], preferred_element_type=f32)       # [TM, 256]
    hw, skip = z[:, :128], z[:, 128:]
    agg = jnp.dot(adj, hw.astype(bf16), preferred_element_type=f32) * inv_deg
    h = jnp.maximum(agg + skip + b3_ref[...], 0.0)                 # [TM, 128] f32

    # ---- global_mean_pool (one-hot sum on MXU, 1/count on VPU) --------------
    pooled = (
        jnp.dot(p_ref[...], h.astype(bf16), preferred_element_type=f32)
        * invcnt_ref[...]
    )                                                              # [GPT, 128]

    # ---- classifier + masked log_softmax ------------------------------------
    logits = (
        jnp.dot(pooled.astype(bf16), wlin_ref[...], preferred_element_type=f32)
        + blin_ref[...]
    )                                                              # [GPT, Cp]
    lane = jax.lax.broadcasted_iota(jnp.int32, logits.shape, 1)
    logits = jnp.where(lane < num_classes, logits, jnp.float32(-1e30))
    m = jnp.max(logits, axis=-1, keepdims=True)
    lse = jnp.log(jnp.sum(jnp.exp(logits - m), axis=-1, keepdims=True)) + m
    o_ref[...] = logits - lse


# ---------------------------------------------------------------------------
# Helpers
# ---------------------------------------------------------------------------
def _pad_axis(a, axis, target):
    pad = target - a.shape[axis]
    if pad <= 0:
        return a
    widths = [(0, 0)] * a.ndim
    widths[axis] = (0, pad)
    return jnp.pad(a, widths)


def _round_up(n, m):
    return ((n + m - 1) // m) * m


def adjacency_and_inv_degree(edge_index, num_nodes):
    """0/1 (edge-count) adjacency A[i,j] = #edges j->i, and 1/max(deg,1)."""
    src, dst = edge_index[0], edge_index[1]
    adj = jnp.zeros((num_nodes, num_nodes), jnp.float32).at[dst, src].add(1.0)
    deg = jnp.sum(adj, axis=1, keepdims=True)
    return adj, 1.0 / jnp.maximum(deg, 1.0)


def pool_onehot_and_inv_count(batch, num_graphs):
    onehot = (batch[None, :] == jnp.arange(num_graphs)[:, None]).astype(jnp.float32)
    counts = jnp.sum(onehot, axis=1, keepdims=True)
    return onehot, 1.0 / jnp.maximum(counts, 1.0)


# ---------------------------------------------------------------------------
# Wrapper
# ---------------------------------------------------------------------------
@functools.partial(jax.jit, static_argnames=("num_graphs", "tile_nodes"))
def gnn_forward(params, x, edge_index, batch, num_graphs, tile_nodes=256):
    bf16, f32 = jnp.bfloat16, jnp.float32
    N, Fin = x.shape
    assert N % tile_nodes == 0, "N must be a multiple of tile_nodes"
    num_tiles = N // tile_nodes
    assert num_graphs % num_tiles == 0, "graphs must split evenly across tiles"
    gpt = num_graphs // num_tiles  # graphs per tile
    assert gpt % 8 == 0, "graphs-per-tile must be a multiple of 8 (sublanes)"
    # NOTE: correctness of the tiled kernel requires the disjoint-union layout:
    # graphs contiguous, equal-sized, no edges crossing tile boundaries.

    TM = tile_nodes
    Fp = _round_up(max(Fin, LANE), LANE)

    # ---- graph structure (plain JAX glue) ------------------------------------
    adj, inv_deg = adjacency_and_inv_degree(edge_index, N)
    adj = adj.astype(bf16)                       # 0/1 counts -> exact in bf16
    p1h, inv_cnt = pool_onehot_and_inv_count(batch, num_graphs)
    p1h = p1h.astype(bf16)

    xp = _pad_axis(x.astype(f32), 1, Fp).astype(bf16)

    # ---- weight prep: pad + concatenate so every dense dot fills 256 lanes ---
    Wl1, Wr1, b1 = params["conv1"]
    Wl2, Wr2, b2 = params["conv2"]
    Wl3, Wr3, b3 = params["conv3"]
    Wlin, blin = params["lin"]
    C = Wlin.shape[1]
    Cp = _round_up(C, LANE)

    W1cat = jnp.concatenate(
        [_pad_axis(Wl1, 0, Fp), _pad_axis(Wr1, 0, Fp)], axis=0
    ).astype(bf16)                                                # [2*Fp, 256]
    W2cat = jnp.concatenate([Wl2, Wr2], axis=1).astype(bf16)      # [256, 256]
    W3cat = jnp.concatenate(
        [_pad_axis(Wl3, 1, LANE), _pad_axis(Wr3, 1, LANE)], axis=1
    ).astype(bf16)                                                # [128, 256]
    b3p = _pad_axis(b3, 1, LANE)                                  # [1, 128]
    Wlinp = _pad_axis(_pad_axis(Wlin, 0, LANE), 1, Cp).astype(bf16)  # [128, Cp]
    blinp = _pad_axis(blin, 1, Cp)                                # [1, Cp]

    # ---- cost / VMEM sizing ---------------------------------------------------
    def nbytes(shape, dt):
        n = 1
        for s in shape:
            n *= s
        return n * jnp.dtype(dt).itemsize

    streamed_blocks = (
        nbytes((TM, TM), bf16) + nbytes((TM, 1), f32) + nbytes((TM, Fp), bf16)
        + nbytes((gpt, TM), bf16) + nbytes((gpt, 1), f32) + nbytes((gpt, Cp), f32)
    )
    resident_blocks = (
        nbytes((2 * Fp, 256), bf16) + nbytes((1, 256), f32)
        + nbytes((256, 256), bf16) + nbytes((1, 128), f32)
        + nbytes((128, 256), bf16) + nbytes((1, 128), f32)
        + nbytes((128, Cp), bf16) + nbytes((1, Cp), f32)
    )
    vmem_limit = min(2 * (streamed_blocks + resident_blocks) + (16 << 20), 64 << 20)

    flops_per_tile = (
        2 * TM * TM * (Fp + 128 + 128)      # three aggregation dots
        + 2 * TM * (2 * Fp) * 256           # conv1 fused dense dot
        + 2 * TM * 256 * 256                # conv2 fused dense dot
        + 2 * TM * 128 * 256                # conv3 fused dense dot
        + 2 * gpt * TM * 128                # mean-pool one-hot dot
        + 2 * gpt * 128 * Cp                # classifier dot
    )
    cost = pl.CostEstimate(
        flops=flops_per_tile * num_tiles,
        transcendentals=num_graphs * Cp,
        bytes_accessed=num_tiles * streamed_blocks + resident_blocks,
    )

    # ---- BlockSpecs: diagonal A / P blocks, resident weights ------------------
    in_specs = [
        pl.BlockSpec((TM, TM), lambda i: (i, i)),        # adj (block-diagonal)
        pl.BlockSpec((TM, 1), lambda i: (i, 0)),         # inv_deg
        pl.BlockSpec((TM, Fp), lambda i: (i, 0)),        # x
        pl.BlockSpec((2 * Fp, 256), lambda i: (0, 0)),   # W1cat
        pl.BlockSpec((1, 256), lambda i: (0, 0)),        # b1
        pl.BlockSpec((256, 256), lambda i: (0, 0)),      # W2cat
        pl.BlockSpec((1, 128), lambda i: (0, 0)),        # b2
        pl.BlockSpec((128, 256), lambda i: (0, 0)),      # W3cat
        pl.BlockSpec((1, 128), lambda i: (0, 0)),        # b3p
        pl.BlockSpec((128, Cp), lambda i: (0, 0)),       # Wlinp
        pl.BlockSpec((1, Cp), lambda i: (0, 0)),         # blinp
        pl.BlockSpec((gpt, TM), lambda i: (i, i)),       # pool one-hot
        pl.BlockSpec((gpt, 1), lambda i: (i, 0)),        # inv_cnt
    ]
    out_spec = pl.BlockSpec((gpt, Cp), lambda i: (i, 0))

    kernel = functools.partial(fused_gnn_kernel, num_classes=C)
    out_padded = pl.pallas_call(
        kernel,
        out_shape=jax.ShapeDtypeStruct((num_graphs, Cp), jnp.float32),
        grid=(num_tiles,),
        in_specs=in_specs,
        out_specs=out_spec,
        compiler_params=pltpu.CompilerParams(
            dimension_semantics=("parallel",),
            vmem_limit_bytes=int(vmem_limit),
        ),
        cost_estimate=cost,
    )(
        adj, inv_deg, xp,
        W1cat, b1, W2cat, b2, W3cat, b3p, Wlinp, blinp,
        p1h, inv_cnt,
    )
    return out_padded[:, :C]


# ---------------------------------------------------------------------------
# Parameter init (deterministic, synthetic)
# ---------------------------------------------------------------------------
def _linear_params(key, fan_in, fan_out, with_bias=True):
    kw, kb = jax.random.split(key)
    lim = 1.0 / jnp.sqrt(fan_in)
    W = jax.random.uniform(kw, (fan_in, fan_out), jnp.float32, -lim, lim)
    if with_bias:
        b = jax.random.uniform(kb, (1, fan_out), jnp.float32, -lim, lim)
    else:
        b = jnp.zeros((1, fan_out), jnp.float32)
    return W, b


def init_gnn_params(key, input_dim, output_dim):
    ks = jax.random.split(key, 7)
    params = {}
    dims = [(input_dim, 256), (256, 128), (128, 64)]
    for i, (fi, fo) in enumerate(dims, start=1):
        Wl, bl = _linear_params(ks[2 * (i - 1)], fi, fo, with_bias=True)
        Wr, _ = _linear_params(ks[2 * (i - 1) + 1], fi, fo, with_bias=False)
        params[f"conv{i}"] = (Wl, Wr, bl)
    params["lin"] = _linear_params(ks[6], 64, output_dim, with_bias=True)
    return params


# ---------------------------------------------------------------------------
# References (plain JAX) for silent sanity checks
# ---------------------------------------------------------------------------
def gnn_reference_bf16(params, x, edge_index, batch, num_graphs):
    """Mirrors the kernel's math (bf16 MXU operands, f32 accumulation, exact
    VPU mean scaling, reassociated conv2/conv3) -> tight tolerance."""
    bf, f32 = jnp.bfloat16, jnp.float32
    N = x.shape[0]
    adj, inv_deg = adjacency_and_inv_degree(edge_index, N)
    adj = adj.astype(bf)
    p1h, inv_cnt = pool_onehot_and_inv_count(batch, num_graphs)
    p1h = p1h.astype(bf)
    Wl1, Wr1, b1 = params["conv1"]
    Wl2, Wr2, b2 = params["conv2"]
    Wl3, Wr3, b3 = params["conv3"]
    Wlin, blin = params["lin"]

    xb = x.astype(bf)
    ax = jnp.dot(adj, xb, preferred_element_type=f32) * inv_deg
    h = jnp.maximum(
        jnp.dot(ax.astype(bf), Wl1.astype(bf), preferred_element_type=f32)
        + jnp.dot(xb, Wr1.astype(bf), preferred_element_type=f32)
        + b1,
        0.0,
    )
    for Wl, Wr, b in ((Wl2, Wr2, b2), (Wl3, Wr3, b3)):
        hb = h.astype(bf)
        hw = jnp.dot(hb, Wl.astype(bf), preferred_element_type=f32)
        agg = jnp.dot(adj, hw.astype(bf), preferred_element_type=f32) * inv_deg
        h = jnp.maximum(
            agg + jnp.dot(hb, Wr.astype(bf), preferred_element_type=f32) + b, 0.0
        )
    pooled = jnp.dot(p1h, h.astype(bf), preferred_element_type=f32) * inv_cnt
    logits = (
        jnp.dot(pooled.astype(bf), Wlin.astype(bf), preferred_element_type=f32) + blin
    )
    return jax.nn.log_softmax(logits, axis=1)


def gnn_reference_f32(params, x, edge_index, batch, num_graphs):
    """Pure f32, natural (A@h)@Wl order -> PyTorch-equivalent math; loose check."""
    N = x.shape[0]
    adj, inv_deg = adjacency_and_inv_degree(edge_index, N)
    A = adj * inv_deg
    p1h, inv_cnt = pool_onehot_and_inv_count(batch, num_graphs)
    P = p1h * inv_cnt
    h = x.astype(jnp.float32)
    for name in ("conv1", "conv2", "conv3"):
        Wl, Wr, b = params[name]
        h = jnp.maximum((A @ h) @ Wl + h @ Wr + b, 0.0)
    W, b = params["lin"]
    logits = (P @ h) @ W + b
    return jax.nn.log_softmax(logits, axis=1)


if __name__ == "__main__":
    key = jax.random.PRNGKey(0)
    k_param, k_x, k_src, k_dst = jax.random.split(key, 4)

    # Batched synthetic graph data (PyG disjoint-union layout): 64 graphs of
    # 16 nodes each -> N = 1024 node rows, 8 input features, 4 classes.
    nodes_per_graph, num_graphs = 16, 64
    N = nodes_per_graph * num_graphs
    input_dim, output_dim = 8, 4
    edges_per_graph = 48

    x = jax.random.normal(k_x, (N, input_dim), jnp.float32)

    # Edges strictly within each graph -> block-diagonal adjacency, so node
    # tiles of 256 rows (16 whole graphs) are self-contained.
    offs = (jnp.arange(num_graphs, dtype=jnp.int32) * nodes_per_graph)[:, None]
    src = jax.random.randint(k_src, (num_graphs, edges_per_graph), 0, nodes_per_graph) + offs
    dst = jax.random.randint(k_dst, (num_graphs, edges_per_graph), 0, nodes_per_graph) + offs
    edge_index = jnp.stack([src.reshape(-1), dst.reshape(-1)]).astype(jnp.int32)

    batch = jnp.repeat(jnp.arange(num_graphs, dtype=jnp.int32), nodes_per_graph)

    params = init_gnn_params(k_param, input_dim, output_dim)

    out = gnn_forward(params, x, edge_index, batch,
                      num_graphs=num_graphs, tile_nodes=256)
    out = jax.block_until_ready(out)
    assert out.shape == (num_graphs, output_dim)

    ref_bf16 = gnn_reference_bf16(params, x, edge_index, batch, num_graphs)
    ref_f32 = gnn_reference_f32(params, x, edge_index, batch, num_graphs)
    # Tight: kernel vs identical bf16/f32-accum math in plain JAX.
    assert jnp.allclose(out, ref_bf16, atol=1e-2, rtol=1e-2)
    # Loose: bf16 kernel vs full-f32 PyTorch-equivalent math.
    assert jnp.allclose(out, ref_f32, atol=1e-1, rtol=1e-1)

    print("KERNEL_OK")
</pallas_src>

<mosaic_0001>
module attributes {stable_mosaic.version = 11 : i64} {
  func.func private @main(%arg0: i32) attributes {dimension_semantics = [#tpu.dimension_semantics<core_parallel>], iteration_bounds = array<i64: 2>, tpu.core_type = #tpu.core_type<sc_scalar_subcore>, window_params = []} {
    return
  }
}

module attributes {stable_mosaic.version = 11 : i64} {
  func.func private @main(%arg0: i32) attributes {dimension_semantics = [#tpu.dimension_semantics<core_parallel>], iteration_bounds = array<i64: 2>, tpu.core_type = #tpu.core_type<sc_scalar_subcore>, window_params = []} {
    return
  }
}

module attributes {stable_mosaic.version = 11 : i64} {
  func.func @fused_gnn_kernel(%arg0: i32, %arg1: memref<256x256xbf16, #tpu.memory_space<vmem>>, %arg2: memref<256x1xf32, #tpu.memory_space<vmem>>, %arg3: memref<256x128xbf16, #tpu.memory_space<vmem>>, %arg4: memref<256x256xbf16, #tpu.memory_space<vmem>>, %arg5: memref<1x256xf32, #tpu.memory_space<vmem>>, %arg6: memref<256x256xbf16, #tpu.memory_space<vmem>>, %arg7: memref<1x128xf32, #tpu.memory_space<vmem>>, %arg8: memref<128x256xbf16, #tpu.memory_space<vmem>>, %arg9: memref<1x128xf32, #tpu.memory_space<vmem>>, %arg10: memref<128x128xbf16, #tpu.memory_space<vmem>>, %arg11: memref<1x128xf32, #tpu.memory_space<vmem>>, %arg12: memref<16x256xbf16, #tpu.memory_space<vmem>>, %arg13: memref<16x1xf32, #tpu.memory_space<vmem>>, %arg14: memref<16x128xf32, #tpu.memory_space<vmem>>) attributes {dimension_semantics = [#tpu.dimension_semantics<parallel>], iteration_bounds = array<i64: 4>, scalar_prefetch = 0 : i64, scratch_operands = 0 : i64, tpu.core_type = #tpu.core_type<tc>, window_params = [{transform_indices = @transform_0, window_bounds = array<i64: 256, 256>}, {transform_indices = @transform_1, window_bounds = array<i64: 256, 1>}, {transform_indices = @transform_2, window_bounds = array<i64: 256, 128>}, {pipeline_mode = #tpu.pipeline_mode<synchronous>, transform_indices = @transform_3, window_bounds = array<i64: 256, 256>}, {pipeline_mode = #tpu.pipeline_mode<synchronous>, transform_indices = @transform_4, window_bounds = array<i64: 1, 256>}, {pipeline_mode = #tpu.pipeline_mode<synchronous>, transform_indices = @transform_5, window_bounds = array<i64: 256, 256>}, {pipeline_mode = #tpu.pipeline_mode<synchronous>, transform_indices = @transform_6, window_bounds = array<i64: 1, 128>}, {pipeline_mode = #tpu.pipeline_mode<synchronous>, transform_indices = @transform_7, window_bounds = array<i64: 128, 256>}, {pipeline_mode = #tpu.pipeline_mode<synchronous>, transform_indices = @transform_8, window_bounds = array<i64: 1, 128>}, {pipeline_mode = #tpu.pipeline_mode<synchronous>, transform_indices = @transform_9, window_bounds = array<i64: 128, 128>}, {pipeline_mode = #tpu.pipeline_mode<synchronous>, transform_indices = @transform_10, window_bounds = array<i64: 1, 128>}, {transform_indices = @transform_11, window_bounds = array<i64: 16, 256>}, {transform_indices = @transform_12, window_bounds = array<i64: 16, 1>}, {transform_indices = @transform_13, window_bounds = array<i64: 16, 128>}]} {
    %c0 = arith.constant 0 : index
    %c0_0 = arith.constant 0 : index
    %0 = vector.load %arg1[%c0, %c0_0] : memref<256x256xbf16, #tpu.memory_space<vmem>>, vector<256x256xbf16>
    %c0_1 = arith.constant 0 : index
    %c0_2 = arith.constant 0 : index
    %1 = vector.load %arg2[%c0_1, %c0_2] : memref<256x1xf32, #tpu.memory_space<vmem>>, vector<256x1xf32>
    %c0_3 = arith.constant 0 : index
    %c0_4 = arith.constant 0 : index
    %2 = vector.load %arg3[%c0_3, %c0_4] : memref<256x128xbf16, #tpu.memory_space<vmem>>, vector<256x128xbf16>
    %cst = arith.constant dense<0.000000e+00> : vector<256x128xf32>
    %3 = tpu.matmul %0, %2, %cst {dimension_numbers = #tpu.dot_dimension_numbers<[1], [0], [0], [1], [0, 0, 1, 1], [], []>} : vector<256x256xbf16>, vector<256x128xbf16>, vector<256x128xf32> -> vector<256x128xf32>
    %4 = vector.broadcast %1 : vector<256x1xf32> to vector<256x128xf32>
    %5 = arith.mulf %3, %4 : vector<256x128xf32>
    %6 = arith.truncf %5 : vector<256x128xf32> to vector<256x128xbf16>
    %7 = tpu.concatenate %6, %2 in 1 : vector<256x128xbf16>, vector<256x128xbf16> -> vector<256x256xbf16>
    %c0_5 = arith.constant 0 : index
    %c0_6 = arith.constant 0 : index
    %8 = vector.load %arg4[%c0_5, %c0_6] : memref<256x256xbf16, #tpu.memory_space<vmem>>, vector<256x256xbf16>
    %cst_7 = arith.constant dense<0.000000e+00> : vector<256x256xf32>
    %9 = tpu.matmul %7, %8, %cst_7 {dimension_numbers = #tpu.dot_dimension_numbers<[1], [0], [0], [1], [0, 0, 1, 1], [], []>} : vector<256x256xbf16>, vector<256x256xbf16>, vector<256x256xf32> -> vector<256x256xf32>
    %c0_8 = arith.constant 0 : index
    %c0_9 = arith.constant 0 : index
    %10 = vector.load %arg5[%c0_8, %c0_9] : memref<1x256xf32, #tpu.memory_space<vmem>>, vector<1x256xf32>
    %11 = vector.broadcast %10 : vector<1x256xf32> to vector<256x256xf32>
    %12 = arith.addf %9, %11 : vector<256x256xf32>
    %cst_10 = arith.constant 0.000000e+00 : f32
    %13 = vector.broadcast %cst_10 : f32 to vector<256x256xf32>
    %14 = arith.maximumf %12, %13 : vector<256x256xf32>
    %15 = arith.truncf %14 : vector<256x256xf32> to vector<256x256xbf16>
    %c0_11 = arith.constant 0 : index
    %c0_12 = arith.constant 0 : index
    %16 = vector.load %arg6[%c0_11, %c0_12] : memref<256x256xbf16, #tpu.memory_space<vmem>>, vector<256x256xbf16>
    %cst_13 = arith.constant dense<0.000000e+00> : vector<256x256xf32>
    %17 = tpu.matmul %15, %16, %cst_13 {dimension_numbers = #tpu.dot_dimension_numbers<[1], [0], [0], [1], [0, 0, 1, 1], [], []>} : vector<256x256xbf16>, vector<256x256xbf16>, vector<256x256xf32> -> vector<256x256xf32>
    %18 = vector.extract_strided_slice %17 {offsets = [0, 0], sizes = [256, 128], strides = [1, 1]} : vector<256x256xf32> to vector<256x128xf32>
    %19 = vector.extract_strided_slice %17 {offsets = [0, 128], sizes = [256, 128], strides = [1, 1]} : vector<256x256xf32> to vector<256x128xf32>
    %20 = arith.truncf %18 : vector<256x128xf32> to vector<256x128xbf16>
    %cst_14 = arith.constant dense<0.000000e+00> : vector<256x128xf32>
    %21 = tpu.matmul %0, %20, %cst_14 {dimension_numbers = #tpu.dot_dimension_numbers<[1], [0], [0], [1], [0, 0, 1, 1], [], []>} : vector<256x256xbf16>, vector<256x128xbf16>, vector<256x128xf32> -> vector<256x128xf32>
    %22 = vector.broadcast %1 : vector<256x1xf32> to vector<256x128xf32>
    %23 = arith.mulf %21, %22 : vector<256x128xf32>
    %24 = arith.addf %23, %19 : vector<256x128xf32>
    %c0_15 = arith.constant 0 : index
    %c0_16 = arith.constant 0 : index
    %25 = vector.load %arg7[%c0_15, %c0_16] : memref<1x128xf32, #tpu.memory_space<vmem>>, vector<1x128xf32>
    %26 = vector.broadcast %25 : vector<1x128xf32> to vector<256x128xf32>
    %27 = arith.addf %24, %26 : vector<256x128xf32>
    %cst_17 = arith.constant 0.000000e+00 : f32
    %28 = vector.broadcast %cst_17 : f32 to vector<256x128xf32>
    %29 = arith.maximumf %27, %28 : vector<256x128xf32>
    %30 = arith.truncf %29 : vector<256x128xf32> to vector<256x128xbf16>
    %c0_18 = arith.constant 0 : index
    %c0_19 = arith.constant 0 : index
    %31 = vector.load %arg8[%c0_18, %c0_19] : memref<128x256xbf16, #tpu.memory_space<vmem>>, vector<128x256xbf16>
    %cst_20 = arith.constant dense<0.000000e+00> : vector<256x256xf32>
    %32 = tpu.matmul %30, %31, %cst_20 {dimension_numbers = #tpu.dot_dimension_numbers<[1], [0], [0], [1], [0, 0, 1, 1], [], []>} : vector<256x128xbf16>, vector<128x256xbf16>, vector<256x256xf32> -> vector<256x256xf32>
    %33 = vector.extract_strided_slice %32 {offsets = [0, 0], sizes = [256, 128], strides = [1, 1]} : vector<256x256xf32> to vector<256x128xf32>
    %34 = vector.extract_strided_slice %32 {offsets = [0, 128], sizes = [256, 128], strides = [1, 1]} : vector<256x256xf32> to vector<256x128xf32>
    %35 = arith.truncf %33 : vector<256x128xf32> to vector<256x128xbf16>
    %cst_21 = arith.constant dense<0.000000e+00> : vector<256x128xf32>
    %36 = tpu.matmul %0, %35, %cst_21 {dimension_numbers = #tpu.dot_dimension_numbers<[1], [0], [0], [1], [0, 0, 1, 1], [], []>} : vector<256x256xbf16>, vector<256x128xbf16>, vector<256x128xf32> -> vector<256x128xf32>
    %37 = vector.broadcast %1 : vector<256x1xf32> to vector<256x128xf32>
    %38 = arith.mulf %36, %37 : vector<256x128xf32>
    %39 = arith.addf %38, %34 : vector<256x128xf32>
    %c0_22 = arith.constant 0 : index
    %c0_23 = arith.constant 0 : index
    %40 = vector.load %arg9[%c0_22, %c0_23] : memref<1x128xf32, #tpu.memory_space<vmem>>, vector<1x128xf32>
    %41 = vector.broadcast %40 : vector<1x128xf32> to vector<256x128xf32>
    %42 = arith.addf %39, %41 : vector<256x128xf32>
    %cst_24 = arith.constant 0.000000e+00 : f32
    %43 = vector.broadcast %cst_24 : f32 to vector<256x128xf32>
    %44 = arith.maximumf %42, %43 : vector<256x128xf32>
    %c0_25 = arith.constant 0 : index
    %c0_26 = arith.constant 0 : index
    %45 = vector.load %arg12[%c0_25, %c0_26] : memref<16x256xbf16, #tpu.memory_space<vmem>>, vector<16x256xbf16>
    %46 = arith.truncf %44 : vector<256x128xf32> to vector<256x128xbf16>
    %cst_27 = arith.constant dense<0.000000e+00> : vector<16x128xf32>
    %47 = tpu.matmul %45, %46, %cst_27 {dimension_numbers = #tpu.dot_dimension_numbers<[1], [0], [0], [1], [0, 0, 1, 1], [], []>} : vector<16x256xbf16>, vector<256x128xbf16>, vector<16x128xf32> -> vector<16x128xf32>
    %c0_28 = arith.constant 0 : index
    %c0_29 = arith.constant 0 : index
    %48 = vector.load %arg13[%c0_28, %c0_29] : memref<16x1xf32, #tpu.memory_space<vmem>>, vector<16x1xf32>
    %49 = vector.broadcast %48 : vector<16x1xf32> to vector<16x128xf32>
    %50 = arith.mulf %47, %49 : vector<16x128xf32>
    %51 = arith.truncf %50 : vector<16x128xf32> to vector<16x128xbf16>
    %c0_30 = arith.constant 0 : index
    %c0_31 = arith.constant 0 : index
    %52 = vector.load %arg10[%c0_30, %c0_31] : memref<128x128xbf16, #tpu.memory_space<vmem>>, vector<128x128xbf16>
    %cst_32 = arith.constant dense<0.000000e+00> : vector<16x128xf32>
    %53 = tpu.matmul %51, %52, %cst_32 {dimension_numbers = #tpu.dot_dimension_numbers<[1], [0], [0], [1], [0, 0, 1, 1], [], []>} : vector<16x128xbf16>, vector<128x128xbf16>, vector<16x128xf32> -> vector<16x128xf32>
    %c0_33 = arith.constant 0 : index
    %c0_34 = arith.constant 0 : index
    %54 = vector.load %arg11[%c0_33, %c0_34] : memref<1x128xf32, #tpu.memory_space<vmem>>, vector<1x128xf32>
    %55 = vector.broadcast %54 : vector<1x128xf32> to vector<16x128xf32>
    %56 = arith.addf %53, %55 : vector<16x128xf32>
    %57 = tpu.iota {dimensions = array<i32: 1>} : vector<16x128xi32>
    %c4_i32 = arith.constant 4 : i32
    %58 = vector.broadcast %c4_i32 : i32 to vector<16x128xi32>
    %59 = arith.cmpi slt, %57, %58 : vector<16x128xi32>
    %cst_35 = arith.constant -1.000000e+30 : f32
    %60 = vector.broadcast %cst_35 : f32 to vector<16x128xf32>
    %61 = arith.select %59, %56, %60 : vector<16x128xi1>, vector<16x128xf32>
    %cst_36 = arith.constant dense<0xFF800000> : vector<16xf32>
    %62 = vector.multi_reduction <maximumf>, %61, %cst_36 [1] : vector<16x128xf32> to vector<16xf32>
    %63 = vector.shape_cast %62 : vector<16xf32> to vector<16x1xf32>
    %64 = vector.broadcast %63 : vector<16x1xf32> to vector<16x128xf32>
    %65 = arith.subf %61, %64 : vector<16x128xf32>
    %66 = math.exp %65 : vector<16x128xf32>
    %cst_37 = arith.constant dense<0.000000e+00> : vector<16xf32>
    %67 = vector.multi_reduction <add>, %66, %cst_37 [1] : vector<16x128xf32> to vector<16xf32>
    %68 = vector.shape_cast %67 : vector<16xf32> to vector<16x1xf32>
    %69 = math.log %68 : vector<16x1xf32>
    %70 = arith.addf %69, %63 : vector<16x1xf32>
    %71 = vector.broadcast %70 : vector<16x1xf32> to vector<16x128xf32>
    %72 = arith.subf %61, %71 : vector<16x128xf32>
    %c0_38 = arith.constant 0 : index
    %c0_39 = arith.constant 0 : index
    %73 = vector.load %arg14[%c0_38, %c0_39] : memref<16x128xf32, #tpu.memory_space<vmem>>, vector<16x128xf32>
    tpu.vector_store %arg14[%c0_38, %c0_39], %72 {strides = array<i32>} : memref<16x128xf32, #tpu.memory_space<vmem>>, vector<16x128xf32>,
    return
  }
  func.func @transform_0(%arg0: i32) -> (i32, i32) {
    %c0_i32 = arith.constant 0 : i32
    return %arg0, %arg0 : i32, i32
  }
  func.func @transform_1(%arg0: i32) -> (i32, i32) {
    %c0_i32 = arith.constant 0 : i32
    %c0_i32_0 = arith.constant 0 : i32
    return %arg0, %c0_i32 : i32, i32
  }
  func.func @transform_2(%arg0: i32) -> (i32, i32) {
    %c0_i32 = arith.constant 0 : i32
    %c0_i32_0 = arith.constant 0 : i32
    return %arg0, %c0_i32 : i32, i32
  }
  func.func @transform_3(%arg0: i32) -> (i32, i32) {
    %c0_i32 = arith.constant 0 : i32
    %c0_i32_0 = arith.constant 0 : i32
    %c0_i32_1 = arith.constant 0 : i32
    return %c0_i32, %c0_i32_0 : i32, i32
  }
  func.func @transform_4(%arg0: i32) -> (i32, i32) {
    %c0_i32 = arith.constant 0 : i32
    %c0_i32_0 = arith.constant 0 : i32
    %c0_i32_1 = arith.constant 0 : i32
    return %c0_i32, %c0_i32_0 : i32, i32
  }
  func.func @transform_5(%arg0: i32) -> (i32, i32) {
    %c0_i32 = arith.constant 0 : i32
    %c0_i32_0 = arith.constant 0 : i32
    %c0_i32_1 = arith.constant 0 : i32
    return %c0_i32, %c0_i32_0 : i32, i32
  }
  func.func @transform_6(%arg0: i32) -> (i32, i32) {
    %c0_i32 = arith.constant 0 : i32
    %c0_i32_0 = arith.constant 0 : i32
    %c0_i32_1 = arith.constant 0 : i32
    return %c0_i32, %c0_i32_0 : i32, i32
  }
  func.func @transform_7(%arg0: i32) -> (i32, i32) {
    %c0_i32 = arith.constant 0 : i32
    %c0_i32_0 = arith.constant 0 : i32
    %c0_i32_1 = arith.constant 0 : i32
    return %c0_i32, %c0_i32_0 : i32, i32
  }
  func.func @transform_8(%arg0: i32) -> (i32, i32) {
    %c0_i32 = arith.constant 0 : i32
    %c0_i32_0 = arith.constant 0 : i32
    %c0_i32_1 = arith.constant 0 : i32
    return %c0_i32, %c0_i32_0 : i32, i32
  }
  func.func @transform_9(%arg0: i32) -> (i32, i32) {
    %c0_i32 = arith.constant 0 : i32
    %c0_i32_0 = arith.constant 0 : i32
    %c0_i32_1 = arith.constant 0 : i32
    return %c0_i32, %c0_i32_0 : i32, i32
  }
  func.func @transform_10(%arg0: i32) -> (i32, i32) {
    %c0_i32 = arith.constant 0 : i32
    %c0_i32_0 = arith.constant 0 : i32
    %c0_i32_1 = arith.constant 0 : i32
    return %c0_i32, %c0_i32_0 : i32, i32
  }
  func.func @transform_11(%arg0: i32) -> (i32, i32) {
    %c0_i32 = arith.constant 0 : i32
    return %arg0, %arg0 : i32, i32
  }
  func.func @transform_12(%arg0: i32) -> (i32, i32) {
    %c0_i32 = arith.constant 0 : i32
    %c0_i32_0 = arith.constant 0 : i32
    return %arg0, %c0_i32 : i32, i32
  }
  func.func @transform_13(%arg0: i32) -> (i32, i32) {
    %c0_i32 = arith.constant 0 : i32
    %c0_i32_0 = arith.constant 0 : i32
    return %arg0, %c0_i32 : i32, i32
  }
}

</mosaic_0001>

<bundles_post_ra>
// kernel: gnn_forward.1
= control target key start
LH: loop header
LB: loop body
LE: loop exit
PB: predicated region body
PF: predicated region fallthrough
CT: control target
= control target key end

     0   :  { %s4542_s25 = smov 0   ;;  %s4544_s26 = smov 0   ;;  %s5805_s0 = inlined_call_operand.vmem [shape: bf16[1024,1024], index: 0, kind: input, shape index: {}]   ;;  %s5806_s1 = inlined_call_operand.vmem [shape: f32[1024,1], index: 1, kind: input, shape index: {}]   ;;  %s5807_s2 = inlined_call_operand.vmem [shape: bf16[1024,128], index: 2, kind: input, shape index: {}]   ;;  %s5808_s3 = inlined_call_operand.vmem [shape: bf16[256,256], index: 3, kind: input, shape index: {}]   ;;  %s5809_s4 = inlined_call_operand.vmem [shape: f32[1,256], index: 4, kind: input, shape index: {}]   ;;  %s5810_s5 = inlined_call_operand.vmem [shape: bf16[256,256], index: 5, kind: input, shape index: {}]   ;;  %s5811_s6 = inlined_call_operand.vmem [shape: f32[1,128], index: 6, kind: input, shape index: {}]   ;;  %s5812_s7 = inlined_call_operand.vmem [shape: bf16[128,256], index: 7, kind: input, shape index: {}]   ;;  %s5813_s8 = inlined_call_operand.vmem [shape: f32[1,128], index: 8, kind: input, shape index: {}]   ;;  %s5814_s9 = inlined_call_operand.vmem [shape: bf16[128,128], index: 9, kind: input, shape index: {}]   ;;  %s5815_s10 = inlined_call_operand.vmem [shape: f32[1,128], index: 10, kind: input, shape index: {}]   ;;  %s5816_s11 = inlined_call_operand.vmem [shape: bf16[64,1024], index: 11, kind: input, shape index: {}]   ;;  %s5817_s12 = inlined_call_operand.vmem [shape: f32[64,1], index: 12, kind: input, shape index: {}]   ;;  %s5818_s13 = inlined_call_operand.vmem [shape: f32[64,128], index: 13, kind: output, shape index: {}]  }
   0x1   :  { %s4546_s27 = smov 0  }
   0x2 LB: > { %s4559_s29 = sadd.s32 1, %s4467_s27   ;;  %s32_s14 = sadd.s32 1, %s4463_s26  ;;  %s4467_s27 = sphi %s4546_s27, %s6007_s27   ;;  %s4463_s26 = sphi %s4544_s26, %s6006_s26   ;;  %s4459_s25 = sphi %s4542_s25, %s6005_s25  }
   0x3   : > { %s27_s30 = ssub.s32 %s4467_s27, %s4559_s29  ;;  %p39_p0 = scmp.ne.s32.totalorder %s4463_s26, %s4459_s25 }
   0x4   : > { %s29_s15 = sor.u32 %s27_s30, %s27_s30  ;;  %p40_p2 = scmp.eq.s32.totalorder %s4467_s27, 0 }
   0x5   : > { %p30_p1 = scmp.eq.s32.totalorder %s29_s15, 0  ;;  %p3619_p4 = scmp.ge.s32.totalorder %s4467_s27, 4 }
   0x6   : > { %p4570_p3 = por %p40_p2, %p39_p0 }
   0x7   : > { %s4568_s16 = scalar_select %p30_p1, %s4463_s26, %s32_s14  }
   0x8   : > { %389 = sbr.rel (%p3619_p4) target bundleno = 63 (0x3f), region = 48 }
   0xf   : > { %392 = sbr.rel (!%p4570_p3) target bundleno = 54 (0x36), region = 52  ;;  %s394_s18 = sand.u32 (%p4570_p3), 1, %s4463_s26  }
  0x10   : > { %s3622_s19 = sshll.u32 (%p4570_p3), %s4467_s27, 1  ;;  %s3620_s20 = sshll.u32 (%p4570_p3), %s394_s18, 8 }
  0x11   : > { %s3784_s21 = sshll.u32 (%p4570_p3), %s4467_s27, 8  ;;  %s4588_s15 = scalar_lea.vmem (%p4570_p3), [#allocation2], %s3620_s20 }
  0x12   : > { %s400_s22 = sadd.s32 (%p4570_p3), %s3784_s21, %s3622_s19 }
  0x13   : > { %s3624_s23 = sshll.u32 (%p4570_p3), %s400_s22, 2 }
  0x14   : > { %s4583_s14 = scalar_lea.vmem (%p4570_p3), %s5805_s0, %s3624_s23 }
  0x15   : > { %v492_v0 = vld [vmem:[%s4583_s14] sm:$0xff] (%p4570_p3) }
  0x16   : > { %v494_v1 = vld [vmem:[%s4583_s14 + $0x20] sm:$0xff]  ;;  %493 = vst [vmem:[%s4588_s15] sm:$0xff] %v492_v0 }
  0x17   : > { %v496_v2 = vld [vmem:[%s4583_s14 + $0x40] sm:$0xff]  ;;  %495 = vst [vmem:[%s4588_s15 + $0x8] sm:$0xff] %v494_v1 }
  0x18   : > { %497 = vst [vmem:[%s4588_s15 + $0x10] sm:$0xff] %v496_v2  ;;  %v498_v3 = vld [vmem:[%s4583_s14 + $0x60] sm:$0xff] }
  0x19   : > { %v500_v4 = vld [vmem:[%s4583_s14 + $0x80] sm:$0xff]  ;;  %499 = vst [vmem:[%s4588_s15 + $0x18] sm:$0xff] %v498_v3 }
  0x1a   : > { %v502_v5 = vld [vmem:[%s4583_s14 + $0xa0] sm:$0xff]  ;;  %501 = vst [vmem:[%s4588_s15 + $0x20] sm:$0xff] %v500_v4 }
  0x1b   : > { %503 = vst [vmem:[%s4588_s15 + $0x28] sm:$0xff] %v502_v5  ;;  %v504_v6 = vld [vmem:[%s4583_s14 + $0xc0] sm:$0xff] }
  0x1c   : > { %v506_v7 = vld [vmem:[%s4583_s14 + $0xe0] sm:$0xff]  ;;  %505 = vst [vmem:[%s4588_s15 + $0x30] sm:$0xff] %v504_v6 }
  0x1d   : > { %v508_v8 = vld [vmem:[%s4583_s14 + $0x100] sm:$0xff]  ;;  %507 = vst [vmem:[%s4588_s15 + $0x38] sm:$0xff] %v506_v7 }
  0x1e   : > { %509 = vst [vmem:[%s4588_s15 + $0x40] sm:$0xff] %v508_v8  ;;  %v510_v9 = vld [vmem:[%s4583_s14 + $0x120] sm:$0xff] }
  0x1f   : > { %v512_v10 = vld [vmem:[%s4583_s14 + $0x140] sm:$0xff]  ;;  %511 = vst [vmem:[%s4588_s15 + $0x48] sm:$0xff] %v510_v9 }
  0x20   : > { %v514_v11 = vld [vmem:[%s4583_s14 + $0x160] sm:$0xff]  ;;  %513 = vst [vmem:[%s4588_s15 + $0x50] sm:$0xff] %v512_v10 }
  0x21   : > { %515 = vst [vmem:[%s4588_s15 + $0x58] sm:$0xff] %v514_v11  ;;  %v516_v12 = vld [vmem:[%s4583_s14 + $0x180] sm:$0xff] }
  0x22   : > { %v518_v13 = vld [vmem:[%s4583_s14 + $0x1a0] sm:$0xff]  ;;  %517 = vst [vmem:[%s4588_s15 + $0x60] sm:$0xff] %v516_v12 }
  0x23   : > { %v520_v14 = vld [vmem:[%s4583_s14 + $0x1c0] sm:$0xff]  ;;  %519 = vst [vmem:[%s4588_s15 + $0x68] sm:$0xff] %v518_v13 }
  0x24   : > { %521 = vst [vmem:[%s4588_s15 + $0x70] sm:$0xff] %v520_v14  ;;  %v522_v15 = vld [vmem:[%s4583_s14 + $0x1e0] sm:$0xff] }
  0x25   : > { %v524_v16 = vld [vmem:[%s4583_s14 + $0x200] sm:$0xff]  ;;  %523 = vst [vmem:[%s4588_s15 + $0x78] sm:$0xff] %v522_v15 }
  0x26   : > { %v526_v17 = vld [vmem:[%s4583_s14 + $0x220] sm:$0xff]  ;;  %525 = vst [vmem:[%s4588_s15 + $0x80] sm:$0xff] %v524_v16 }
  0x27   : > { %527 = vst [vmem:[%s4588_s15 + $0x88] sm:$0xff] %v526_v17  ;;  %v528_v18 = vld [vmem:[%s4583_s14 + $0x240] sm:$0xff] }
  0x28   : > { %v530_v19 = vld [vmem:[%s4583_s14 + $0x260] sm:$0xff]  ;;  %529 = vst [vmem:[%s4588_s15 + $0x90] sm:$0xff] %v528_v18 }
  0x29   : > { %v532_v20 = vld [vmem:[%s4583_s14 + $0x280] sm:$0xff]  ;;  %531 = vst [vmem:[%s4588_s15 + $0x98] sm:$0xff] %v530_v19 }
  0x2a   : > { %533 = vst [vmem:[%s4588_s15 + $0xa0] sm:$0xff] %v532_v20  ;;  %v534_v21 = vld [vmem:[%s4583_s14 + $0x2a0] sm:$0xff] }
  0x2b   : > { %v536_v22 = vld [vmem:[%s4583_s14 + $0x2c0] sm:$0xff]  ;;  %535 = vst [vmem:[%s4588_s15 + $0xa8] sm:$0xff] %v534_v21 }
  0x2c   : > { %v538_v23 = vld [vmem:[%s4583_s14 + $0x2e0] sm:$0xff]  ;;  %537 = vst [vmem:[%s4588_s15 + $0xb0] sm:$0xff] %v536_v22 }
  0x2d   : > { %539 = vst [vmem:[%s4588_s15 + $0xb8] sm:$0xff] %v538_v23  ;;  %v540_v24 = vld [vmem:[%s4583_s14 + $0x300] sm:$0xff] }
  0x2e   : > { %v542_v25 = vld [vmem:[%s4583_s14 + $0x320] sm:$0xff]  ;;  %541 = vst [vmem:[%s4588_s15 + $0xc0] sm:$0xff] %v540_v24 }
  0x2f   : > { %v544_v26 = vld [vmem:[%s4583_s14 + $0x340] sm:$0xff]  ;;  %543 = vst [vmem:[%s4588_s15 + $0xc8] sm:$0xff] %v542_v25 }
  0x30   : > { %545 = vst [vmem:[%s4588_s15 + $0xd0] sm:$0xff] %v544_v26  ;;  %v546_v27 = vld [vmem:[%s4583_s14 + $0x360] sm:$0xff] }
  0x31   : > { %v548_v28 = vld [vmem:[%s4583_s14 + $0x380] sm:$0xff]  ;;  %547 = vst [vmem:[%s4588_s15 + $0xd8] sm:$0xff] %v546_v27 }
  0x32   : > { %v550_v29 = vld [vmem:[%s4583_s14 + $0x3a0] sm:$0xff]  ;;  %549 = vst [vmem:[%s4588_s15 + $0xe0] sm:$0xff] %v548_v28 }
  0x33   : > { %551 = vst [vmem:[%s4588_s15 + $0xe8] sm:$0xff] %v550_v29  ;;  %v552_v30 = vld [vmem:[%s4583_s14 + $0x3c0] sm:$0xff] }
  0x34   : > { %v554_v31 = vld [vmem:[%s4583_s14 + $0x3e0] sm:$0xff]  ;;  %553 = vst [vmem:[%s4588_s15 + $0xf0] sm:$0xff] %v552_v30 }
  0x35   : > { %555 = vst [vmem:[%s4588_s15 + $0xf8] sm:$0xff] %v554_v31 }
  0x36 PF: > { %579 = sbr.rel (!%p4570_p3) target bundleno = 63 (0x3f), region = 98  ;;  %s581_s18 = sand.u32 (%p4570_p3), 1, %s4463_s26  }
  0x37   : > { %s3627_s19 = sshll.u32 (%p4570_p3), %s4467_s27, 1  ;;  %s3625_s20 = sshll.u32 (%p4570_p3), %s581_s18, 4 }
  0x38   : > { %s3785_s21 = sshll.u32 (%p4570_p3), %s4467_s27, 4  ;;  %s583_s14 = scalar_lea.vmem (%p4570_p3), [#allocation3], %s3625_s20 }
  0x39   : > { %s587_s22 = sadd.s32 (%p4570_p3), %s3785_s21, %s3627_s19 }
  0x3a   : > { %s3629_s23 = sshll.u32 (%p4570_p3), %s587_s22, 2 }
  0x3b   : > { %s589_s28 = scalar_lea.vmem (%p4570_p3), %s5816_s11, %s3629_s23 }
  0x3c   : > { %v619_v32 = vld [vmem:[%s589_s28] sm:$0xff] (%p4570_p3) }
  0x3d   : > { %v621_v33 = vld [vmem:[%s589_s28 + $0x20] sm:$0xff]  ;;  %620 = vst [vmem:[%s583_s14] sm:$0xff] %v619_v32 }
  0x3e   : > { %622 = vst [vmem:[%s583_s14 + $0x8] sm:$0xff] %v621_v33 }
  0x3f PF: > { %p3630_p5 = scmp.ge.s32.totalorder %s4467_s27, 1  ;;  %p636_p6 = scmp.lt.s32.totalorder %s4467_s27, 5 }
  0x41   : > { %p637_p7 = pnand %p3630_p5, %p636_p6 }
  0x43   : > { %640 = sbr.rel (%p637_p7) target bundleno = 2572 (0xa0c), region = 140 }
  0x4a   : > { %s5878_s17 = sadd.s32 4294967295, %s4467_s27   ;;  %s643_s18 = sand.u32 1, %s4459_s25   ;;  %v5821_v34 = vmov 0   ;;  %v4266_v8 = vld [vmem:[%s5808_s3 + $0x4] ss:$8 sps:$4 sm:$0xff]   ;;  %vm4471_vm0 = vmmov 0  }
  0x4b   : > { %s3633_s15 = sshll.u32 %s5878_s17, 5  ;;  %s3631_s28 = sshll.u32 %s643_s18, 8  ;;  %4200 = vset.pattern.permute.xlu0 %v5821_v34  ;;  %4201 = vset.pattern.permute.xlu1 %v5821_v34  ;;  %v4268_v9 = vld [vmem:[%s5808_s3] ss:$8 sps:$4 sm:$0xff]   ;;  %v4269_v10 = vld [vmem:[%s5808_s3 + $0x14] ss:$8 sps:$4 sm:$0xff]  }
  0x4c   : > { %p715_p8 = scmp.lt.s32.totalorder %s3633_s15, 127  ;;  %s4668_s19 = scalar_lea.vmem [#allocation2], %s3631_s28  ;;  %1666 = vmatprep.subr.bf16.mxu1 %v4266_v8  ;;  %v4271_v15 = vld [vmem:[%s5808_s3 + $0x10] ss:$8 sps:$4 sm:$0xff]   ;;  %v4272_v16 = vld [vmem:[%s5808_s3 + $0x24] ss:$8 sps:$4 sm:$0xff]  }
  0x4d   : > { %v4218_v35 = vld [vmem:[%s4668_s19 + $0x4] ss:$8 sps:$4 sm:$0xff]   ;;  %v4220_v60 = vld [vmem:[%s4668_s19] ss:$8 sps:$4 sm:$0xff]   ;;  %v4221_v62 = vld [vmem:[%s4668_s19 + $0x14] ss:$8 sps:$4 sm:$0xff]   ;;  %1667 = vmatpush1.bf16.msra.mxu1 %v4268_v9 }
  0x4e   : > { %s6009_s15 = smov (!%p715_p8, %s3633_s15), 127  ;;  %1125 = vmatprep.mubr.bf16.mxu0 %v4218_v35  ;;  %v4223_v2 = vld [vmem:[%s4668_s19 + $0x10] ss:$8 sps:$4 sm:$0xff]   ;;  %v4224_v4 = vld [vmem:[%s4668_s19 + $0x24] ss:$8 sps:$4 sm:$0xff]   ;;  %1668 = vmatprep.subr.bf16.mxu1 %v4269_v10 }
  0x4f   : > { %s3636_s20 = sshll.u32 %s6009_s15, 2  ;;  %s3634_s24 = sshll.u32 %s6009_s15, 3  ;;  %v4226_v11 = vld [vmem:[%s4668_s19 + $0x20] ss:$8 sps:$4 sm:$0xff]   ;;  %v4227_v13 = vld [vmem:[%s4668_s19 + $0x34] ss:$8 sps:$4 sm:$0xff]  }
  0x50   : > { %s4674_s23 = scalar_lea.vmem %s5807_s2, %s3636_s20  ;;  %s4696_s17 = scalar_lea.vmem %s5806_s1, %s3634_s24  ;;  %v4229_v19 = vld [vmem:[%s4668_s19 + $0x30] ss:$8 sps:$4 sm:$0xff]   ;;  %v4274_v21 = vld [vmem:[%s5808_s3 + $0x20] ss:$8 sps:$4 sm:$0xff]   ;;  %v4275_v22 = vld [vmem:[%s5808_s3 + $0x34] ss:$8 sps:$4 sm:$0xff]  }
  0x51   : > { %v4202_v36 = vld [vmem:[%s4674_s23 + $0x40] sm:$0xff]   ;;  %v4204_v38 = vld [vmem:[%s4674_s23 + $0x48] sm:$0xff]   ;;  %v4206_v40 = vld [vmem:[%s4674_s23 + $0x50] sm:$0xff]   ;;  %1669 = vmatpush1.bf16.msra.mxu1 %v4271_v15  ;;  %s5879_s20 = sadd.s32 4294967295, %s4467_s27  }
  0x52   : > { %v4203_v37 = vld [vmem:[%s4674_s23] sm:$0xff]   ;;  %3786 = vmatprep.subr.bf16.mxu0 %v4202_v36  ;;  %v4680_v39 = vld [vmem:[%s4674_s23 + $0x8] sm:$0xff]   ;;  %v4685_v41 = vld [vmem:[%s4674_s23 + $0x10] sm:$0xff]   ;;  %1670 = vmatprep.subr.bf16.mxu1 %v4272_v16  ;;  %s3637_s21 = sshll.u32 %s5879_s20, 1 }
  0x53   : > { %3787 = vmatpush3.bf16.msra.mxu0 %v4203_v37  ;;  %1698 = vmatprep.mubr.bf16.mxu1 %v4203_v37  ;;  %v4208_v42 = vld [vmem:[%s4674_s23 + $0x58] sm:$0xff]   ;;  %v4210_v44 = vld [vmem:[%s4674_s23 + $0x60] sm:$0xff]   ;;  %v4212_v46 = vld [vmem:[%s4674_s23 + $0x68] sm:$0xff]   ;;  %p729_p9 = scmp.lt.s32.totalorder %s3637_s21, 7 }
  0x54   : > { %3788 = vmatprep.subr.bf16.mxu0 %v4204_v38  ;;  %v4690_v43 = vld [vmem:[%s4674_s23 + $0x18] sm:$0xff]   ;;  %v4699_v45 = vld [vmem:[%s4674_s23 + $0x20] sm:$0xff]   ;;  %v774_v48 = vld [vmem:[%s4696_s17 + $0x8] sm:$0xff] }
  0x55   : > { %v773_v47 = vld [vmem:[%s4696_s17] sm:$0xff]  ;;  %v775_v49 = vld [vmem:[%s4696_s17 + $0x10] sm:$0xff]  ;;  %v4708_v50 = vld [vmem:[%s4674_s23 + $0x28] sm:$0xff]   ;;  %1671 = vmatpush1.bf16.msra.mxu1 %v4274_v21  ;;  %s6011_s21 = smov (!%p729_p9, %s3637_s21), 7 }
  0x56   : > { %1256 = vperm.xlu0 %4200, %v773_v47   ;;  %1266 = vperm.xlu1 %4201, %v775_v49   ;;  %v4214_v51 = vld [vmem:[%s4674_s23 + $0x70] sm:$0xff]   ;;  %v776_v52 = vld [vmem:[%s4696_s17 + $0x18] sm:$0xff]  ;;  %v777_v53 = vld [vmem:[%s4696_s17 + $0x20] sm:$0xff]  ;;  %s5819_s27 = sshll.u32 %s6011_s21, 3 }
  0x57   : > { %3789 = vmatpush3.bf16.msra.mxu0 %v4680_v39  ;;  %v4715_v54 = vld [vmem:[%s4674_s23 + $0x30] sm:$0xff]   ;;  %v4216_v55 = vld [vmem:[%s4674_s23 + $0x78] sm:$0xff]   ;;  %v778_v56 = vld [vmem:[%s4696_s17 + $0x28] sm:$0xff]  ;;  %1672 = vmatprep.subr.bf16.mxu1 %v4275_v22  ;;  %s732_s14 = scalar_lea.vmem %s5817_s12, %s5819_s27 }
  0x58   : > { %3790 = vmatprep.subr.bf16.mxu0 %v4206_v40  ;;  %v779_v57 = vld [vmem:[%s4696_s17 + $0x30] sm:$0xff]  ;;  %v4722_v58 = vld [vmem:[%s4674_s23 + $0x38] sm:$0xff]   ;;  %v781_v61 = vld [vmem:[%s4696_s17 + $0x40] sm:$0xff] }
  0x59   : > { %v780_v59 = vld [vmem:[%s4696_s17 + $0x38] sm:$0xff]  ;;  %v782_v63 = vld [vmem:[%s4696_s17 + $0x48] sm:$0xff]  ;;  %v783_v0 = vld [vmem:[%s4696_s17 + $0x50] sm:$0xff] }
  0x5a   : > { %1261 = vperm.xlu0 %4200, %v774_v48   ;;  %1271 = vperm.xlu1 %4201, %v776_v52   ;;  %v784_v1 = vld [vmem:[%s4696_s17 + $0x58] sm:$0xff]  ;;  %v785_v3 = vld [vmem:[%s4696_s17 + $0x60] sm:$0xff]  ;;  %v786_v5 = vld [vmem:[%s4696_s17 + $0x68] sm:$0xff] }
  0x5b   : > { %3791 = vmatpush3.bf16.msra.mxu0 %v4685_v41  ;;  %v787_v6 = vld [vmem:[%s4696_s17 + $0x70] sm:$0xff]  ;;  %v788_v7 = vld [vmem:[%s4696_s17 + $0x78] sm:$0xff]  ;;  %v789_v12 = vld [vmem:[%s4696_s17 + $0x80] sm:$0xff] }
  0x5c   : > { %3792 = vmatprep.subr.bf16.mxu0 %v4208_v42  ;;  %v790_v14 = vld [vmem:[%s4696_s17 + $0x88] sm:$0xff]  ;;  %v791_v17 = vld [vmem:[%s4696_s17 + $0x90] sm:$0xff]  ;;  %v792_v18 = vld [vmem:[%s4696_s17 + $0x98] sm:$0xff] }
  0x5d   : > { %v793_v20 = vld [vmem:[%s4696_s17 + $0xa0] sm:$0xff]  ;;  %v794_v24 = vld [vmem:[%s4696_s17 + $0xa8] sm:$0xff]  ;;  %v795_v25 = vld [vmem:[%s4696_s17 + $0xb0] sm:$0xff] }
  0x5e   : > { %1276 = vperm.xlu0 %4200, %v777_v53   ;;  %1281 = vperm.xlu1 %4201, %v778_v56   ;;  %v4230_v23 = vld [vmem:[%s4668_s19 + $0x44] ss:$8 sps:$4 sm:$0xff]   ;;  %v4277_v26 = vld [vmem:[%s5808_s3 + $0x30] ss:$8 sps:$4 sm:$0xff]   ;;  %v4232_v29 = vld [vmem:[%s4668_s19 + $0x40] ss:$8 sps:$4 sm:$0xff]  }
  0x5f   : > { %3793 = vmatpush3.bf16.msra.mxu0 %v4690_v43  ;;  %v4278_v27 = vld [vmem:[%s5808_s3 + $0x44] ss:$8 sps:$4 sm:$0xff]   ;;  %v796_v28 = vld [vmem:[%s4696_s17 + $0xb8] sm:$0xff]  ;;  %1673 = vmatpush1.bf16.msra.mxu1 %v4277_v26  ;;  %v4280_v31 = vld [vmem:[%s5808_s3 + $0x40] ss:$8 sps:$4 sm:$0xff]  }
  0x60   : > { %3794 = vmatprep.subr.bf16.mxu0 %v4210_v44  ;;  %v797_v30 = vld [vmem:[%s4696_s17 + $0xc0] sm:$0xff]  ;;  %v4281_v32 = vld [vmem:[%s5808_s3 + $0x54] ss:$8 sps:$4 sm:$0xff]   ;;  %1674 = vmatprep.subr.bf16.mxu1 %v4278_v27  ;;  %v798_v35 = vld [vmem:[%s4696_s17 + $0xc8] sm:$0xff] }
  0x61   : > { %v4233_v33 = vld [vmem:[%s4668_s19 + $0x54] ss:$8 sps:$4 sm:$0xff]   ;;  %v4283_v37 = vld [vmem:[%s5808_s3 + $0x50] ss:$8 sps:$4 sm:$0xff]   ;;  %v4284_v38 = vld [vmem:[%s5808_s3 + $0x64] ss:$8 sps:$4 sm:$0xff]  }
  0x62   : > { %1286 = vperm.xlu0 %4200, %v779_v57   ;;  %1291 = vperm.xlu1 %4201, %v780_v59   ;;  %v799_v36 = vld [vmem:[%s4696_s17 + $0xd0] sm:$0xff]  ;;  %v800_v40 = vld [vmem:[%s4696_s17 + $0xd8] sm:$0xff]  ;;  %v801_v44 = vld [vmem:[%s4696_s17 + $0xe0] sm:$0xff] }
  0x63   : > { %3795 = vmatpush3.bf16.msra.mxu0 %v4699_v45  ;;  %1675 = vmatpush1.bf16.msra.mxu1 %v4280_v31  ;;  %v4235_v42 = vld [vmem:[%s4668_s19 + $0x50] ss:$8 sps:$4 sm:$0xff]   ;;  %v4287_v47 = vld [vmem:[%s5808_s3 + $0x74] ss:$8 sps:$4 sm:$0xff]   ;;  %v4236_v48 = vld [vmem:[%s4668_s19 + $0x64] ss:$8 sps:$4 sm:$0xff]  }
  0x64   : > { %3796 = vmatprep.subr.bf16.mxu0 %v4212_v46  ;;  %1676 = vmatprep.subr.bf16.mxu1 %v4281_v32  ;;  %v4286_v46 = vld [vmem:[%s5808_s3 + $0x60] ss:$8 sps:$4 sm:$0xff]   ;;  %v4289_v52 = vld [vmem:[%s5808_s3 + $0x70] ss:$8 sps:$4 sm:$0xff]   ;;  %v4290_v53 = vld [vmem:[%s5808_s3 + $0x84] ss:$8 sps:$4 sm:$0xff]  }
  0x65   : > { %v802_v49 = vld [vmem:[%s4696_s17 + $0xe8] sm:$0xff]  ;;  %v3338_v57 = vld [vmem:[%s732_s14] sm:$0xff]  ;;  %v4305_v8 = vld [vmem:[%s5808_s3 + $0xd4] ss:$8 sps:$4 sm:$0xff]  }
  0x66   : > { %1296 = vperm.xlu0 %4200, %v781_v61   ;;  %1301 = vperm.xlu1 %4201, %v782_v63   ;;  %v4238_v56 = vld [vmem:[%s4668_s19 + $0x60] ss:$8 sps:$4 sm:$0xff]   ;;  %v4239_v61 = vld [vmem:[%s4668_s19 + $0x74] ss:$8 sps:$4 sm:$0xff]   ;;  %v4295_v63 = vld [vmem:[%s5808_s3 + $0x90] ss:$8 sps:$4 sm:$0xff]  }
  0x67   : > { %3797 = vmatpush3.bf16.msra.mxu0 %v4708_v50  ;;  %1677 = vmatpush1.bf16.msra.mxu1 %v4283_v37  ;;  %v4292_v59 = vld [vmem:[%s5808_s3 + $0x80] ss:$8 sps:$4 sm:$0xff]   ;;  %v4245_v10 = vld [vmem:[%s4668_s19 + $0x94] ss:$8 sps:$4 sm:$0xff]   ;;  %v4308_v16 = vld [vmem:[%s5808_s3 + $0xe4] ss:$8 sps:$4 sm:$0xff]  }
  0x68   : > { %3798 = vmatprep.subr.bf16.mxu0 %v4214_v51  ;;  %1678 = vmatprep.subr.bf16.mxu1 %v4284_v38  ;;  %v803_v51 = vld [vmem:[%s4696_s17 + $0xf0] sm:$0xff]  ;;  %v4244_v9 = vld [vmem:[%s4668_s19 + $0x80] ss:$8 sps:$4 sm:$0xff]  }
  0x69   : > { %v4251_v15 = vld [vmem:[%s4668_s19 + $0xb4] ss:$8 sps:$4 sm:$0xff]   ;;  %v4313_v21 = vld [vmem:[%s5808_s3 + $0xf0] ss:$8 sps:$4 sm:$0xff]   ;;  %v4256_v22 = vld [vmem:[%s4668_s19 + $0xc0] ss:$8 sps:$4 sm:$0xff]  }
  0x6a   : > { %1306 = vperm.xlu0 %4200, %v783_v0   ;;  %1311 = vperm.xlu1 %4201, %v784_v1   ;;  %v4296_v0 = vld [vmem:[%s5808_s3 + $0xa4] ss:$8 sps:$4 sm:$0xff]   ;;  %v4298_v1 = vld [vmem:[%s5808_s3 + $0xa0] ss:$8 sps:$4 sm:$0xff]   ;;  %v4263_v27 = vld [vmem:[%s4668_s19 + $0xf4] ss:$8 sps:$4 sm:$0xff]  }
  0x6b   : > { %3799 = vmatpush3.bf16.msra.mxu0 %v4715_v54  ;;  %1679 = vmatpush1.bf16.msra.mxu1 %v4286_v46  ;;  %v4262_v26 = vld [vmem:[%s4668_s19 + $0xe0] ss:$8 sps:$4 sm:$0xff]   ;;  %v4319_v38 = vld [vmem:[%s5810_s5 + $0x14] ss:$8 sps:$4 sm:$0xff]  }
  0x6c   : > { %3800 = vmatprep.subr.bf16.mxu0 %v4216_v55  ;;  %1680 = vmatprep.subr.bf16.mxu1 %v4287_v47  ;;  %v804_v55 = vld [vmem:[%s4696_s17 + $0xf8] sm:$0xff]  ;;  %s6004_s17 = sshll.u32 %s6011_s21, 3 }
  0x6d   : > { %s738_s15 = scalar_lea.vmem %s5818_s13, %s6004_s17 }
  0x6e   : > { %1316 = vperm.xlu0 %4200, %v785_v3   ;;  %1321 = vperm.xlu1 %4201, %v786_v5   ;;  %v4241_v3 = vld [vmem:[%s4668_s19 + $0x70] ss:$8 sps:$4 sm:$0xff]  }
  0x6f   : > { %3801 = vmatpush3.bf16.msra.mxu0 %v4722_v58  ;;  %1681 = vmatpush1.bf16.msra.mxu1 %v4289_v52  ;;  %v4301_v5 = vld [vmem:[%s5808_s3 + $0xb0] ss:$8 sps:$4 sm:$0xff]  }
  0x70   : > { %1682 = vmatprep.subr.bf16.mxu1 %v4290_v53 }
  0x72   : > { %1126 = vmatmul.mubr.bf16.vlgmr.msra.gmra.mrb[0].mxu0 %v4220_v60  ;;  %1326 = vperm.xlu0 %4200, %v787_v6   ;;  %v4293_v60 = vld [vmem:[%s5808_s3 + $0x94] ss:$8 sps:$4 sm:$0xff]   ;;  %v4302_v6 = vld [vmem:[%s5808_s3 + $0xc4] ss:$8 sps:$4 sm:$0xff]  }
  0x73   : > { %1133 = vmatprep.mubr.bf16.mxu0 %v4221_v62  ;;  %1331 = vperm.xlu1 %4201, %v788_v7   ;;  %v3339_v62 = vld [vmem:[%s732_s14 + $0x8] sm:$0xff]  ;;  %s5638_s14 = sshll.u32 %s643_s18, 4 }
  0x74   : > { %1683 = vmatpush1.bf16.msra.mxu1 %v4292_v59  ;;  %v4304_v7 = vld [vmem:[%s5808_s3 + $0xc0] ss:$8 sps:$4 sm:$0xff]   ;;  %v4325_v59 = vld [vmem:[%s5810_s5 + $0x34] ss:$8 sps:$4 sm:$0xff]   ;;  %s652_s20 = scalar_lea.vmem [#allocation3], %s5638_s14 }
  0x75   : > { %1684 = vmatprep.subr.bf16.mxu1 %v4293_v60 }
  0x76   : > { %1336 = vperm.xlu0 %4200, %v789_v12   ;;  %v4247_v12 = vld [vmem:[%s4668_s19 + $0x90] ss:$8 sps:$4 sm:$0xff]  }
  0x77   : > { %1341 = vperm.xlu1 %4201, %v790_v14   ;;  %v4250_v14 = vld [vmem:[%s4668_s19 + $0xa0] ss:$8 sps:$4 sm:$0xff]  }
  0x78   : > { %1685 = vmatpush1.bf16.msra.mxu1 %v4295_v63  ;;  %v4323_v63 = vld [vmem:[%s5810_s5 + $0x30] ss:$8 sps:$4 sm:$0xff]  }
  0x79   : > { %1686 = vmatprep.subr.bf16.mxu1 %v4296_v0 }
  0x7a   : > { %1134 = vmatmul.mubr.bf16.gmra.mrb[4].mxu0 %v4223_v2  ;;  %1346 = vperm.xlu0 %4200, %v791_v17   ;;  %v4299_v2 = vld [vmem:[%s5808_s3 + $0xb4] ss:$8 sps:$4 sm:$0xff]   ;;  %v4253_v17 = vld [vmem:[%s4668_s19 + $0xb0] ss:$8 sps:$4 sm:$0xff]  }
  0x7b   : > { %1141 = vmatprep.mubr.bf16.mxu0 %v4224_v4  ;;  %1351 = vperm.xlu1 %4201, %v792_v18   ;;  %v4242_v4 = vld [vmem:[%s4668_s19 + $0x84] ss:$8 sps:$4 sm:$0xff]   ;;  %v4310_v18 = vld [vmem:[%s5808_s3 + $0xe0] ss:$8 sps:$4 sm:$0xff]  }
  0x7c   : > { %1687 = vmatpush1.bf16.msra.mxu1 %v4298_v1 }
  0x7d   : > { %1688 = vmatprep.subr.bf16.mxu1 %v4299_v2  ;;  %v4328_v2 = vld [vmem:[%s5810_s5 + $0x44] ss:$8 sps:$4 sm:$0xff]  }
  0x7e   : > { %1356 = vperm.xlu0 %4200, %v793_v20   ;;  %v4311_v20 = vld [vmem:[%s5808_s3 + $0xf4] ss:$8 sps:$4 sm:$0xff]  }
  0x7f   : > { %1361 = vperm.xlu1 %4201, %v794_v24   ;;  %v4259_v24 = vld [vmem:[%s4668_s19 + $0xd0] ss:$8 sps:$4 sm:$0xff]  }
  0x80   : > { %1689 = vmatpush1.bf16.msra.mxu1 %v4301_v5  ;;  %v4326_v5 = vld [vmem:[%s5810_s5 + $0x40] ss:$8 sps:$4 sm:$0xff]  }
  0x81   : > { %1690 = vmatprep.subr.bf16.mxu1 %v4302_v6 }
  0x82   : > { %1142 = vmatmul.mubr.bf16.gmra.mrb[8].mxu0 %v4226_v11  ;;  %1366 = vperm.xlu0 %4200, %v795_v25   ;;  %v4307_v11 = vld [vmem:[%s5808_s3 + $0xd0] ss:$8 sps:$4 sm:$0xff]   ;;  %v4260_v25 = vld [vmem:[%s4668_s19 + $0xe4] ss:$8 sps:$4 sm:$0xff]  }
  0x83   : > { %1149 = vmatprep.mubr.bf16.mxu0 %v4227_v13  ;;  %1371 = vperm.xlu1 %4201, %v796_v28   ;;  %v4248_v13 = vld [vmem:[%s4668_s19 + $0xa4] ss:$8 sps:$4 sm:$0xff]   ;;  %v4265_v28 = vld [vmem:[%s4668_s19 + $0xf0] ss:$8 sps:$4 sm:$0xff]  }
  0x84   : > { %1691 = vmatpush1.bf16.msra.mxu1 %v4304_v7 }
  0x85   : > { %1692 = vmatprep.subr.bf16.mxu1 %v4305_v8  ;;  %v4331_v8 = vld [vmem:[%s5810_s5 + $0x54] ss:$8 sps:$4 sm:$0xff]  }
  0x86   : > { %1376 = vperm.xlu0 %4200, %v797_v30  }
  0x87   : > { %1381 = vperm.xlu1 %4201, %v798_v35   ;;  %v4314_v35 = vld [vmem:[%s5810_s5] ss:$8 sps:$4 sm:$0xff]  }
  0x88   : > { %1693 = vmatpush1.bf16.msra.mxu1 %v4307_v11 }
  0x89   : > { %1694 = vmatprep.subr.bf16.mxu1 %v4308_v16  ;;  %v4334_v16 = vld [vmem:[%s5810_s5 + $0x64] ss:$8 sps:$4 sm:$0xff]  }
  0x8a   : > { %1150 = vmatmul.mubr.bf16.gmra.mrb[12].mxu0 %v4229_v19  ;;  %1386 = vperm.xlu0 %4200, %v799_v36   ;;  %v4254_v19 = vld [vmem:[%s4668_s19 + $0xc4] ss:$8 sps:$4 sm:$0xff]  }
  0x8b   : > { %1157 = vmatprep.mubr.bf16.mxu0 %v4230_v23  ;;  %1391 = vperm.xlu1 %4201, %v800_v40   ;;  %v4257_v23 = vld [vmem:[%s4668_s19 + $0xd4] ss:$8 sps:$4 sm:$0xff]   ;;  %v4316_v36 = vld [vmem:[%s5810_s5 + $0x4] ss:$8 sps:$4 sm:$0xff]  }
  0x8c   : > { %1695 = vmatpush1.bf16.msra.mxu1 %v4310_v18  ;;  %2147 = vmatprep.subr.bf16.mxu0 %v4316_v36 }
  0x8d   : > { %1696 = vmatprep.subr.bf16.mxu1 %v4311_v20  ;;  %2148 = vmatpush1.bf16.msra.mxu0 %v4314_v35  ;;  %v4338_v35 = vld [vmem:[%s5810_s5 + $0x80] ss:$8 sps:$4 sm:$0xff]  }
  0x8e   : > { %1396 = vperm.xlu0 %4200, %v801_v44   ;;  %v4317_v44 = vld [vmem:[%s5810_s5 + $0x10] ss:$8 sps:$4 sm:$0xff]   ;;  %2149 = vmatprep.subr.bf16.mxu0 %v4319_v38  ;;  %v4343_v38 = vld [vmem:[%s5810_s5 + $0x94] ss:$8 sps:$4 sm:$0xff]  }
  0x8f   : > { %1401 = vperm.xlu1 %4201, %v802_v49  }
  0x90   : > { %1697 = vmatpush1.bf16.msra.mxu1 %v4313_v21 }
  0x91   : > { %2150 = vmatpush1.bf16.msra.mxu0 %v4317_v44 }
  0x92   : > { %1158 = vmatmul.mubr.bf16.gmra.mrb[16].mxu0 %v4232_v29  ;;  %1406 = vperm.xlu0 %4200, %v803_v51  }
  0x93   : > { %1165 = vmatprep.mubr.bf16.mxu0 %v4233_v33  ;;  %1411 = vperm.xlu1 %4201, %v804_v55   ;;  %v4320_v55 = vld [vmem:[%s5810_s5 + $0x20] ss:$8 sps:$4 sm:$0xff]  }
  0x96   : > { %3342 = vperm.xlu0 %4200, %v3338_v57  }
  0x97   : > { %3347 = vperm.xlu1 %4201, %v3339_v62  }
  0x9a   : > { %1166 = vmatmul.mubr.bf16.gmra.mrb[20].mxu0 %v4235_v42 }
  0x9b   : > { %1173 = vmatprep.mubr.bf16.mxu0 %v4236_v48  ;;  %v4322_v48 = vld [vmem:[%s5810_s5 + $0x24] ss:$8 sps:$4 sm:$0xff]  }
  0x9c   : > { %2151 = vmatprep.subr.bf16.mxu0 %v4322_v48  ;;  %v4341_v48 = vld [vmem:[%s5810_s5 + $0x90] ss:$8 sps:$4 sm:$0xff]  }
  0x9d   : > { %2152 = vmatpush1.bf16.msra.mxu0 %v4320_v55 }
  0x9e   : > { %2153 = vmatprep.subr.bf16.mxu0 %v4325_v59 }
  0xa1   : > { %2154 = vmatpush1.bf16.msra.mxu0 %v4323_v63 }
  0xa2   : > { %1174 = vmatmul.mubr.bf16.gmra.mrb[24].mxu0 %v4238_v56  ;;  %2155 = vmatprep.subr.bf16.mxu0 %v4328_v2 }
  0xa3   : > { %1181 = vmatprep.mubr.bf16.mxu0 %v4239_v61 }
  0xa5   : > { %2156 = vmatpush1.bf16.msra.mxu0 %v4326_v5  ;;  %v4352_v5 = vld [vmem:[%s5810_s5 + $0xc4] ss:$8 sps:$4 sm:$0xff]  }
  0xa6   : > { %2157 = vmatprep.subr.bf16.mxu0 %v4331_v8  ;;  %v4350_v8 = vld [vmem:[%s5810_s5 + $0xc0] ss:$8 sps:$4 sm:$0xff]  }
  0xaa   : > { %1182 = vmatmul.mubr.bf16.gmra.mrb[28].mxu0 %v4241_v3 }
  0xab   : > { %1189 = vmatprep.mubr.bf16.mxu0 %v4242_v4 }
  0xb2   : > { %1190 = vmatmul.mubr.bf16.gmra.mrb[32].mxu0 %v4244_v9 }
  0xb3   : > { %1197 = vmatprep.mubr.bf16.mxu0 %v4245_v10 }
  0xba   : > { %1198 = vmatmul.mubr.bf16.gmra.mrb[36].mxu0 %v4247_v12 }
  0xbb   : > { %1205 = vmatprep.mubr.bf16.mxu0 %v4248_v13  ;;  %v4329_v13 = vld [vmem:[%s5810_s5 + $0x50] ss:$8 sps:$4 sm:$0xff]  }
  0xbc   : > { %2158 = vmatpush1.bf16.msra.mxu0 %v4329_v13  ;;  %v4355_v13 = vld [vmem:[%s5810_s5 + $0xd4] ss:$8 sps:$4 sm:$0xff]  }
  0xbd   : > { %2159 = vmatprep.subr.bf16.mxu0 %v4334_v16 }
  0xc2   : > { %1206 = vmatmul.mubr.bf16.gmra.mrb[40].mxu0 %v4250_v14 }
  0xc3   : > { %1213 = vmatprep.mubr.bf16.mxu0 %v4251_v15 }
  0xca   : > { %1214 = vmatmul.mubr.bf16.gmra.mrb[44].mxu0 %v4253_v17 }
  0xcb   : > { %1221 = vmatprep.mubr.bf16.mxu0 %v4254_v19  ;;  %v4332_v19 = vld [vmem:[%s5810_s5 + $0x60] ss:$8 sps:$4 sm:$0xff]  }
  0xcc   : > { %2160 = vmatpush1.bf16.msra.mxu0 %v4332_v19 }
  0xd2   : > { %1222 = vmatmul.mubr.bf16.gmra.mrb[48].mxu0 %v4256_v22  ;;  %v4337_v22 = vld [vmem:[%s5810_s5 + $0x74] ss:$8 sps:$4 sm:$0xff]  }
  0xd3   : > { %1229 = vmatprep.mubr.bf16.mxu0 %v4257_v23  ;;  %2161 = vmatprep.subr.bf16.mxu0 %v4337_v22 }
  0xd5   : > { %v4887_v29 = vpop.permute.xlu0 %1256  ;;  %v4908_v49 = vpop.permute.xlu1 %1266 }
  0xd6   : > { %5880 = vst [vmem:[#allocation4_spill] sm:$0xff] %v4887_v29 }
  0xd9   : > { %v4898_v42 = vpop.permute.xlu0 %1261  ;;  %v4917_v62 = vpop.permute.xlu1 %1271 }
  0xda   : > { %1230 = vmatmul.mubr.bf16.gmra.mrb[52].mxu0 %v4259_v24 }
  0xdb   : > { %1237 = vmatprep.mubr.bf16.mxu0 %v4260_v25 }
  0xdd   : > { %v4934_v11 = vpop.permute.xlu0 %1276  ;;  %v4936_v12 = vpop.permute.xlu1 %1281 }
  0xe1   : > { %v4953_v25 = vpop.permute.xlu0 %1286 }
  0xe2   : > { %1238 = vmatmul.mubr.bf16.gmra.mrb[56].mxu0 %v4262_v26  ;;  %v4955_v26 = vpop.permute.xlu1 %1291 }
  0xe3   : > { %1245 = vmatprep.mubr.bf16.mxu0 %v4263_v27  ;;  %v4335_v27 = vld [vmem:[%s5810_s5 + $0x70] ss:$8 sps:$4 sm:$0xff]  }
  0xe4   : > { %2162 = vmatpush1.bf16.msra.mxu0 %v4335_v27 }
  0xea   : > { %1246 = vmatmul.mubr.bf16.gmra.mrb[60].mxu0 %v4265_v28 }
 0x145   : > { %v3802_v30 = vpop.f32.mrb[0].mxu0 }
 0x146   : > { %v3803_v31 = vpop.f32.mrb[1].mxu0 }
 0x147   : > { %v3804_v32 = vadd.f32 %v3803_v31, %v3802_v30  ;;  %v3805_v33 = vpop.f32.mrb[2].mxu0  ;;  %v4340_v31 = vld [vmem:[%s5810_s5 + $0x84] ss:$8 sps:$4 sm:$0xff]  }
 0x148   : > { %v3806_v37 = vpop.f32.mrb[3].mxu0  ;;  %2163 = vmatprep.subr.bf16.mxu0 %v4340_v31 }
 0x149   : > { %v3807_v40 = vadd.f32 %v3806_v37, %v3805_v33  ;;  %v1414_v46 = vmul.f32 %v3804_v32, %v4887_v29  ;;  %2164 = vmatpush1.bf16.msra.mxu0 %v4338_v35 }
 0x14a   : > { %2165 = vmatprep.subr.bf16.mxu0 %v4343_v38 }
 0x14b   : > { %v1415_v47 = vmul.f32 %v3807_v40, %v4898_v42 }
 0x14d   : > { %v3808_v51 = vpop.f32.mrb[4].mxu0  ;;  %v1446_v52 = vpack.c.bf16 %v1415_v47, %v1414_v46  ;;  %v4972_v46 = vpop.permute.xlu0 %1296  ;;  %2166 = vmatpush1.bf16.msra.mxu0 %v4341_v48 }
 0x14e   : > { %v3809_v53 = vpop.f32.mrb[5].mxu0  ;;  %v4974_v47 = vpop.permute.xlu1 %1301 }
 0x14f   : > { %v3810_v56 = vadd.f32 %v3809_v53, %v3808_v51  ;;  %v3811_v57 = vpop.f32.mrb[6].mxu0  ;;  %1699 = vmatmul.mubr.bf16.vlgmr.msra.gmra.mrb[0].mxu1 %v1446_v52  ;;  %v4346_v53 = vld [vmem:[%s5810_s5 + $0xa4] ss:$8 sps:$4 sm:$0xff]  }
 0x150   : > { %v3812_v60 = vpop.f32.mrb[7].mxu0  ;;  %1708 = vmatprep.mubr.bf16.mxu1 %v4680_v39  ;;  %2167 = vmatprep.subr.bf16.mxu0 %v4346_v53 }
 0x151   : > { %v3813_v61 = vadd.f32 %v3812_v60, %v3811_v57  ;;  %v1416_v0 = vmul.f32 %v3810_v56, %v4908_v49  ;;  %v4344_v57 = vld [vmem:[%s5810_s5 + $0xa0] ss:$8 sps:$4 sm:$0xff]  }
 0x152   : > { %v4993_v2 = vpop.permute.xlu1 %1311  ;;  %2168 = vmatpush1.bf16.msra.mxu0 %v4344_v57 }
 0x153   : > { %v1417_v1 = vmul.f32 %v3813_v61, %v4917_v62  ;;  %v4349_v61 = vld [vmem:[%s5810_s5 + $0xb4] ss:$8 sps:$4 sm:$0xff]  }
 0x154   : > { %2169 = vmatprep.subr.bf16.mxu0 %v4349_v61 }
 0x155   : > { %v3814_v3 = vpop.f32.mrb[8].mxu0  ;;  %v1447_v4 = vpack.c.bf16 %v1417_v1, %v1416_v0  ;;  %v4991_v1 = vpop.permute.xlu0 %1306 }
 0x156   : > { %v3815_v39 = vpop.f32.mrb[9].mxu0 }
 0x157   : > { %v3816_v6 = vadd.f32 %v3815_v39, %v3814_v3  ;;  %v3817_v7 = vpop.f32.mrb[10].mxu0  ;;  %1709 = vmatmul.mubr.bf16.gmra.mrb[4].mxu1 %v1447_v4  ;;  %v4347_v3 = vld [vmem:[%s5810_s5 + $0xb0] ss:$8 sps:$4 sm:$0xff]  }
 0x158   : > { %v3818_v9 = vpop.f32.mrb[11].mxu0  ;;  %1718 = vmatprep.mubr.bf16.mxu1 %v4685_v41  ;;  %2170 = vmatpush1.bf16.msra.mxu0 %v4347_v3 }
 0x159   : > { %v3819_v10 = vadd.f32 %v3818_v9, %v3817_v7  ;;  %v1418_v14 = vmul.f32 %v3816_v6, %v4934_v11  ;;  %2171 = vmatprep.subr.bf16.mxu0 %v4352_v5  ;;  %v5010_v16 = vpop.permute.xlu0 %1316 }
 0x15b   : > { %v1419_v15 = vmul.f32 %v3819_v10, %v4936_v12 }
 0x15c   : > { %2172 = vmatpush1.bf16.msra.mxu0 %v4350_v8 }
 0x15d   : > { %v3820_v41 = vpop.f32.mrb[12].mxu0  ;;  %v1448_v17 = vpack.c.bf16 %v1419_v15, %v1418_v14  ;;  %2173 = vmatprep.subr.bf16.mxu0 %v4355_v13 }
 0x15e   : > { %v3821_v18 = vpop.f32.mrb[13].mxu0 }
 0x15f   : > { %v3822_v20 = vadd.f32 %v3821_v18, %v3820_v41  ;;  %v3823_v21 = vpop.f32.mrb[14].mxu0  ;;  %1719 = vmatmul.mubr.bf16.gmra.mrb[8].mxu1 %v1448_v17  ;;  %v5012_v41 = vpop.permute.xlu1 %1321  ;;  %v4353_v17 = vld [vmem:[%s5810_s5 + $0xd0] ss:$8 sps:$4 sm:$0xff]  }
 0x160   : > { %v3824_v23 = vpop.f32.mrb[15].mxu0  ;;  %1728 = vmatprep.mubr.bf16.mxu1 %v4690_v43  ;;  %2174 = vmatpush1.bf16.msra.mxu0 %v4353_v17 }
 0x161   : > { %v3825_v24 = vadd.f32 %v3824_v23, %v3823_v21  ;;  %v1420_v28 = vmul.f32 %v3822_v20, %v4953_v25 }
 0x163   : > { %v1421_v30 = vmul.f32 %v3825_v24, %v4955_v26 }
 0x165   : > { %v3826_v43 = vpop.f32.mrb[16].mxu0  ;;  %v1449_v32 = vpack.c.bf16 %v1421_v30, %v1420_v28  ;;  %v5020_v28 = vpop.permute.xlu0 %1326 }
 0x166   : > { %v3827_v33 = vpop.f32.mrb[17].mxu0  ;;  %v5022_v30 = vpop.permute.xlu1 %1331 }
 0x167   : > { %v3828_v36 = vadd.f32 %v3827_v33, %v3826_v43  ;;  %v3829_v37 = vpop.f32.mrb[18].mxu0  ;;  %1729 = vmatmul.mubr.bf16.gmra.mrb[12].mxu1 %v1449_v32 }
 0x168   : > { %v3830_v40 = vpop.f32.mrb[19].mxu0  ;;  %1738 = vmatprep.mubr.bf16.mxu1 %v4699_v45 }
 0x169   : > { %v3831_v44 = vadd.f32 %v3830_v40, %v3829_v37  ;;  %v1422_v51 = vmul.f32 %v3828_v36, %v4972_v46  ;;  %v4405_v40 = vld [vmem:[%s4674_s23 + $0x40] sm:$0xff]  }
 0x16a   : > { %v5029_v48 = vpop.permute.xlu1 %1341 }
 0x16b   : > { %v1423_v52 = vmul.f32 %v3831_v44, %v4974_v47  ;;  %v5027_v44 = vpop.permute.xlu0 %1336 }
 0x16d   : > { %v3832_v45 = vpop.f32.mrb[20].mxu0  ;;  %v1450_v55 = vpack.c.bf16 %v1423_v52, %v1422_v51 }
 0x16e   : > { %v3833_v56 = vpop.f32.mrb[21].mxu0 }
 0x16f   : > { %v3834_v59 = vadd.f32 %v3833_v56, %v3832_v45  ;;  %v3835_v60 = vpop.f32.mrb[22].mxu0  ;;  %1739 = vmatmul.mubr.bf16.gmra.mrb[16].mxu1 %v1450_v55 }
 0x170   : > { %v3836_v63 = vpop.f32.mrb[23].mxu0  ;;  %1748 = vmatprep.mubr.bf16.mxu1 %v4708_v50 }
 0x171   : > { %v3837_v0 = vadd.f32 %v3836_v63, %v3835_v60  ;;  %v1424_v4 = vmul.f32 %v3834_v59, %v4991_v1  ;;  %v4406_v60 = vld [vmem:[%s4674_s23 + $0x48] sm:$0xff]   ;;  %v5034_v63 = vpop.permute.xlu0 %1346 }
 0x173   : > { %v1425_v39 = vmul.f32 %v3837_v0, %v4993_v2  ;;  %v5036_v0 = vpop.permute.xlu1 %1351 }
 0x175   : > { %v3838_v50 = vpop.f32.mrb[24].mxu0  ;;  %v1451_v6 = vpack.c.bf16 %v1425_v39, %v1424_v4  ;;  %v5041_v13 = vpop.permute.xlu0 %1356 }
 0x176   : > { %v3839_v7 = vpop.f32.mrb[25].mxu0 }
 0x177   : > { %v3840_v9 = vadd.f32 %v3839_v7, %v3838_v50  ;;  %v3841_v10 = vpop.f32.mrb[26].mxu0  ;;  %1749 = vmatmul.mubr.bf16.gmra.mrb[20].mxu1 %v1451_v6 }
 0x178   : > { %v3842_v14 = vpop.f32.mrb[27].mxu0  ;;  %1758 = vmatprep.mubr.bf16.mxu1 %v4715_v54 }
 0x179   : > { %v3843_v15 = vadd.f32 %v3842_v14, %v3841_v10  ;;  %v1426_v18 = vmul.f32 %v3840_v9, %v5010_v16  ;;  %v4407_v9 = vld [vmem:[%s4674_s23 + $0x50] sm:$0xff]   ;;  %v5043_v14 = vpop.permute.xlu1 %1361 }
 0x17a   : > { %5881 = vst [vmem:[#allocation5_spill] sm:$0xff] %v5043_v14 }
 0x17b   : > { %v1427_v19 = vmul.f32 %v3843_v15, %v5012_v41 }
 0x17d   : > { %v3844_v20 = vpop.f32.mrb[28].mxu0  ;;  %v1452_v21 = vpack.c.bf16 %v1427_v19, %v1426_v18 }
 0x17e   : > { %v3845_v22 = vpop.f32.mrb[29].mxu0 }
 0x17f   : > { %v3846_v54 = vadd.f32 %v3845_v22, %v3844_v20  ;;  %v3847_v23 = vpop.f32.mrb[30].mxu0  ;;  %1759 = vmatmul.mubr.bf16.gmra.mrb[24].mxu1 %v1452_v21 }
 0x180   : > { %v3848_v24 = vpop.f32.mrb[31].mxu0  ;;  %1768 = vmatprep.mubr.bf16.mxu1 %v4722_v58 }
 0x181   : > { %v3849_v27 = vadd.f32 %v3848_v24, %v3847_v23  ;;  %v1428_v31 = vmul.f32 %v3846_v54, %v5020_v28  ;;  %v4408_v23 = vld [vmem:[%s4674_s23 + $0x58] sm:$0xff]  }
 0x183   : > { %v1429_v43 = vmul.f32 %v3849_v27, %v5022_v30  ;;  %v5048_v27 = vpop.permute.xlu0 %1366 }
 0x184   : > { %5882 = vst [vmem:[#allocation6_spill] sm:$0xff] %v5048_v27 }
 0x185   : > { %v3850_v32 = vpop.f32.mrb[32].mxu0  ;;  %v1453_v33 = vpack.c.bf16 %v1429_v43, %v1428_v31  ;;  %v5050_v31 = vpop.permute.xlu1 %1371 }
 0x186   : > { %v3851_v35 = vpop.f32.mrb[33].mxu0  ;;  %5883 = vst [vmem:[#allocation7_spill] sm:$0xff] %v5050_v31 }
 0x187   : > { %v3852_v36 = vadd.f32 %v3851_v35, %v3850_v32  ;;  %v3853_v37 = vpop.f32.mrb[34].mxu0  ;;  %1769 = vmatmul.mubr.bf16.gmra.mrb[28].mxu1 %v1453_v33  ;;  %v4358_v33 = vld [vmem:[%s5810_s5 + $0xe4] ss:$8 sps:$4 sm:$0xff]   ;;  %v4356_v35 = vld [vmem:[%s5810_s5 + $0xe0] ss:$8 sps:$4 sm:$0xff]  }
 0x188   : > { %v3854_v38 = vpop.f32.mrb[35].mxu0  ;;  %1778 = vmatprep.mubr.bf16.mxu1 %v4405_v40  ;;  %2175 = vmatprep.subr.bf16.mxu0 %v4358_v33 }
 0x189   : > { %v3855_v58 = vadd.f32 %v3854_v38, %v3853_v37  ;;  %v1430_v51 = vmul.f32 %v3852_v36, %v5027_v44  ;;  %2176 = vmatpush1.bf16.msra.mxu0 %v4356_v35 }
 0x18b   : > { %v1431_v52 = vmul.f32 %v3855_v58, %v5029_v48 }
 0x18d   : > { %v3856_v53 = vpop.f32.mrb[36].mxu0  ;;  %v1454_v45 = vpack.c.bf16 %v1431_v52, %v1430_v51  ;;  %v4361_v51 = vld [vmem:[%s5810_s5 + $0xf4] ss:$8 sps:$4 sm:$0xff]  }
 0x18e   : > { %v3857_v55 = vpop.f32.mrb[37].mxu0  ;;  %2177 = vmatprep.subr.bf16.mxu0 %v4361_v51  ;;  %v4412_v51 = vld [vmem:[%s4674_s23 + $0x78] sm:$0xff]  }
 0x18f   : > { %v3858_v56 = vadd.f32 %v3857_v55, %v3856_v53  ;;  %v3859_v57 = vpop.f32.mrb[38].mxu0  ;;  %1779 = vmatmul.mubr.bf16.gmra.mrb[32].mxu1 %v1454_v45  ;;  %v4409_v53 = vld [vmem:[%s4674_s23 + $0x60] sm:$0xff]   ;;  %v4359_v45 = vld [vmem:[%s5810_s5 + $0xf0] ss:$8 sps:$4 sm:$0xff]  }
 0x190   : > { %v3860_v59 = vpop.f32.mrb[39].mxu0  ;;  %1788 = vmatprep.mubr.bf16.mxu1 %v4406_v60  ;;  %2178 = vmatpush1.bf16.msra.mxu0 %v4359_v45 }
 0x191   : > { %v3861_v61 = vadd.f32 %v3860_v59, %v3859_v57  ;;  %v1432_v3 = vmul.f32 %v3858_v56, %v5034_v63  ;;  %v5067_v56 = vpop.permute.xlu0 %1376  ;;  %v5069_v57 = vpop.permute.xlu1 %1381 }
 0x192   : > { %5884 = vst [vmem:[#allocation8_spill] sm:$0xff] %v5067_v56  ;;  %5885 = vst [vmem:[#allocation9_spill] sm:$0xff] %v5069_v57 }
 0x193   : > { %v1433_v4 = vmul.f32 %v3861_v61, %v5036_v0 }
 0x195   : > { %v3862_v39 = vpop.f32.mrb[40].mxu0  ;;  %v1455_v5 = vpack.c.bf16 %v1433_v4, %v1432_v3 }
 0x196   : > { %v3863_v50 = vpop.f32.mrb[41].mxu0 }
 0x197   : > { %v3864_v6 = vadd.f32 %v3863_v50, %v3862_v39  ;;  %v3865_v7 = vpop.f32.mrb[42].mxu0  ;;  %1789 = vmatmul.mubr.bf16.gmra.mrb[36].mxu1 %v1455_v5 }
 0x198   : > { %v3866_v8 = vpop.f32.mrb[43].mxu0  ;;  %1798 = vmatprep.mubr.bf16.mxu1 %v4407_v9  ;;  %v5076_v9 = vpop.permute.xlu1 %1391 }
 0x199   : > { %v3867_v10 = vadd.f32 %v3866_v8, %v3865_v7  ;;  %v1434_v15 = vmul.f32 %v3864_v6, %v5041_v13  ;;  %v4410_v6 = vld [vmem:[%s4674_s23 + $0x68] sm:$0xff]   ;;  %v5074_v8 = vpop.permute.xlu0 %1386  ;;  %5887 = vst [vmem:[#allocation11_spill] sm:$0xff] %v5076_v9 }
 0x19a   : > { %5886 = vst [vmem:[#allocation10_spill] sm:$0xff] %v5074_v8 }
 0x19b   : > { %v1435_v17 = vmul.f32 %v3867_v10, %v5043_v14 }
 0x19d   : > { %v3868_v18 = vpop.f32.mrb[44].mxu0  ;;  %v1456_v19 = vpack.c.bf16 %v1435_v17, %v1434_v15 }
 0x19e   : > { %v3869_v20 = vpop.f32.mrb[45].mxu0 }
 0x19f   : > { %v3870_v21 = vadd.f32 %v3869_v20, %v3868_v18  ;;  %v3871_v22 = vpop.f32.mrb[46].mxu0  ;;  %1799 = vmatmul.mubr.bf16.gmra.mrb[40].mxu1 %v1456_v19 }
 0x1a0   : > { %v3872_v54 = vpop.f32.mrb[47].mxu0  ;;  %1808 = vmatprep.mubr.bf16.mxu1 %v4408_v23 }
 0x1a1   : > { %v3873_v24 = vadd.f32 %v3872_v54, %v3871_v22  ;;  %v1436_v43 = vmul.f32 %v3870_v21, %v5048_v27  ;;  %v4411_v54 = vld [vmem:[%s4674_s23 + $0x70] sm:$0xff]  }
 0x1a3   : > { %v1437_v32 = vmul.f32 %v3873_v24, %v5050_v31  ;;  %v5081_v24 = vpop.permute.xlu0 %1396 }
 0x1a4   : > { %5888 = vst [vmem:[#allocation12_spill] sm:$0xff] %v5081_v24 }
 0x1a5   : > { %v3874_v36 = vpop.f32.mrb[48].mxu0  ;;  %v1457_v37 = vpack.c.bf16 %v1437_v32, %v1436_v43  ;;  %v5083_v43 = vpop.permute.xlu1 %1401 }
 0x1a6   : > { %v3875_v38 = vpop.f32.mrb[49].mxu0  ;;  %5889 = vst [vmem:[#allocation13_spill] sm:$0xff] %v5083_v43 }
 0x1a7   : > { %v3876_v40 = vadd.f32 %v3875_v38, %v3874_v36  ;;  %v3877_v58 = vpop.f32.mrb[50].mxu0  ;;  %1809 = vmatmul.mubr.bf16.gmra.mrb[44].mxu1 %v1457_v37 }
 0x1a8   : > { %v3878_v52 = vpop.f32.mrb[51].mxu0  ;;  %1818 = vmatprep.mubr.bf16.mxu1 %v4409_v53  ;;  %v5088_v53 = vpop.permute.xlu0 %1406 }
 0x1a9   : > { %v3879_v55 = vadd.f32 %v3878_v52, %v3877_v58  ;;  %v1438_v59 = vmul.f32 %v3876_v40, %v5067_v56  ;;  %5890 = vst [vmem:[#allocation14_spill] sm:$0xff] %v5088_v53  ;;  %v5090_v45 = vpop.permute.xlu1 %1411 }
 0x1aa   : > { %5891 = vst [vmem:[#allocation15_spill] sm:$0xff] %v5090_v45 }
 0x1ab   : > { %v1439_v60 = vmul.f32 %v3879_v55, %v5069_v57 }
 0x1ad   : > { %v3880_v61 = vpop.f32.mrb[52].mxu0  ;;  %v1458_v3 = vpack.c.bf16 %v1439_v60, %v1438_v59 }
 0x1ae   : > { %v3881_v4 = vpop.f32.mrb[53].mxu0 }
 0x1af   : > { %v3882_v39 = vadd.f32 %v3881_v4, %v3880_v61  ;;  %v3883_v5 = vpop.f32.mrb[54].mxu0  ;;  %1819 = vmatmul.mubr.bf16.gmra.mrb[48].mxu1 %v1458_v3  ;;  %v5095_v61 = vld [vmem:[%s4668_s19 + $0x4] ss:$8 sps:$4 sm:$0xff]   ;;  %v5820_v3 = vlaneseq }
 0x1b0   : > { %v3884_v50 = vpop.f32.mrb[55].mxu0  ;;  %1828 = vmatprep.mubr.bf16.mxu1 %v4410_v6 }
 0x1b1   : > { %v3885_v7 = vadd.f32 %v3884_v50, %v3883_v5  ;;  %v1440_v10 = vmul.f32 %v3882_v39, %v5074_v8  ;;  %v1497_v4 = vshrl.u32 %v5820_v3, 7  ;;  %v1494_v5 = vld [vmem:[%s5809_s4] sm:$0x3] }
 0x1b3   : > { %v1441_v15 = vmul.f32 %v3885_v7, %v5076_v9  ;;  %v1498_v39 = vsub.s32 0, %v1497_v4  ;;  %v1502_v50 = vsub.s32 1, %v1497_v4 }
 0x1b5   : > { %v3886_v17 = vpop.f32.mrb[56].mxu0  ;;  %v1459_v18 = vpack.c.bf16 %v1441_v15, %v1440_v10  ;;  %v5102_v6 = vrot.slane %v1494_v5, %v1498_v39  ;;  %v5104_v7 = vrot.slane %v1494_v5, %v1502_v50 }
 0x1b6   : > { %v3887_v19 = vpop.f32.mrb[57].mxu0 }
 0x1b7   : > { %v3888_v20 = vadd.f32 %v3887_v19, %v3886_v17  ;;  %v3889_v21 = vpop.f32.mrb[58].mxu0  ;;  %1829 = vmatmul.mubr.bf16.gmra.mrb[52].mxu1 %v1459_v18 }
 0x1b8   : > { %v3890_v22 = vpop.f32.mrb[59].mxu0  ;;  %1838 = vmatprep.mubr.bf16.mxu1 %v4411_v54 }
 0x1b9   : > { %v3891_v23 = vadd.f32 %v3890_v22, %v3889_v21  ;;  %v1442_v32 = vmul.f32 %v3888_v20, %v5081_v24 }
 0x1bb   : > { %v1443_v33 = vmul.f32 %v3891_v23, %v5083_v43 }
 0x1bd   : > { %v3892_v35 = vpop.f32.mrb[60].mxu0  ;;  %v1460_v36 = vpack.c.bf16 %v1443_v33, %v1442_v32 }
 0x1be   : > { %v3893_v37 = vpop.f32.mrb[61].mxu0 }
 0x1bf   : > { %v3894_v38 = vadd.f32 %v3893_v37, %v3892_v35  ;;  %v3895_v40 = vpop.f32.mrb[62].mxu0  ;;  %1839 = vmatmul.mubr.bf16.gmra.mrb[56].mxu1 %v1460_v36 }
 0x1c0   : > { %v3896_v58 = vpop.f32.mrb[63].mxu0  ;;  %1848 = vmatprep.mubr.bf16.mxu1 %v4412_v51 }
 0x1c1   : > { %v3897_v52 = vadd.f32 %v3896_v58, %v3895_v40  ;;  %v1444_v55 = vmul.f32 %v3894_v38, %v5088_v53 }
 0x1c3   : > { %v1445_v59 = vmul.f32 %v3897_v52, %v5090_v45 }
 0x1c5   : > { %v1461_v60 = vpack.c.bf16 %v1445_v59, %v1444_v55 }
 0x1c7   : > { %1849 = vmatmul.mubr.bf16.gmra.mrb[60].mxu1 %v1461_v60 }
 0x1c8   : > { %2388 = vmatprep.mubr.bf16.mxu1 %v5095_v61 }
 0x222   : > { %v1700_v10 = vpop.f32.mrb[0].mxu1 }
 0x223   : > { %v1701_v15 = vadd.f32 %v1700_v10, %v5102_v6  ;;  %v1702_v17 = vpop.f32.mrb[1].mxu1 }
 0x224   : > { %v1703_v18 = vadd.f32 %v1702_v17, %v5104_v7  ;;  %v1704_v19 = vpop.f32.mrb[2].mxu1 }
 0x225   : > { %v1705_v20 = vadd.f32 %v1704_v19, %v5102_v6  ;;  %v1706_v21 = vpop.f32.mrb[3].mxu1  ;;  %v1859_v54 = vmax.f32 %v1701_v15, 0.0 }
 0x226   : > { %v1707_v22 = vadd.f32 %v1706_v21, %v5104_v7  ;;  %v1860_v32 = vmax.f32 %v1703_v18, 0.0 }
 0x227   : > { %v1861_v23 = vmax.f32 %v1705_v20, 0.0 }
 0x228   : > { %v1862_v33 = vmax.f32 %v1707_v22, 0.0 }
 0x229   : > { %v1923_v35 = vpack.c.bf16 %v1861_v23, %v1859_v54 }
 0x22a   : > { %v1924_v36 = vpack.c.bf16 %v1862_v33, %v1860_v32  ;;  %v1710_v37 = vpop.f32.mrb[4].mxu1 }
 0x22b   : > { %v1711_v38 = vadd.f32 %v1710_v37, %v5102_v6  ;;  %v1712_v40 = vpop.f32.mrb[5].mxu1 }
 0x22c   : > { %v1713_v58 = vadd.f32 %v1712_v40, %v5104_v7  ;;  %v1714_v51 = vpop.f32.mrb[6].mxu1  ;;  %2179 = vmatprep.mubr.bf16.mxu0 %v1924_v36 }
 0x22d   : > { %v1715_v52 = vadd.f32 %v1714_v51, %v5102_v6  ;;  %v1716_v55 = vpop.f32.mrb[7].mxu1  ;;  %2180 = vmatmul.mubr.bf16.vlgmr.msra.gmra.mrb[64].mxu0 %v1923_v35  ;;  %v1863_v60 = vmax.f32 %v1711_v38, 0.0 }
 0x22e   : > { %v1717_v59 = vadd.f32 %v1716_v55, %v5104_v7  ;;  %v1864_v39 = vmax.f32 %v1713_v58, 0.0 }
 0x22f   : > { %v1865_v4 = vmax.f32 %v1715_v52, 0.0 }
 0x230   : > { %v1866_v5 = vmax.f32 %v1717_v59, 0.0 }
 0x231   : > { %v1925_v50 = vpack.c.bf16 %v1865_v4, %v1863_v60 }
 0x232   : > { %v1926_v10 = vpack.c.bf16 %v1866_v5, %v1864_v39  ;;  %v1720_v15 = vpop.f32.mrb[8].mxu1 }
 0x233   : > { %v1721_v17 = vadd.f32 %v1720_v15, %v5102_v6  ;;  %v1722_v18 = vpop.f32.mrb[9].mxu1 }
 0x234   : > { %v1723_v19 = vadd.f32 %v1722_v18, %v5104_v7  ;;  %v1724_v20 = vpop.f32.mrb[10].mxu1  ;;  %2189 = vmatprep.mubr.bf16.mxu0 %v1926_v10 }
 0x235   : > { %v1725_v21 = vadd.f32 %v1724_v20, %v5102_v6  ;;  %v1726_v22 = vpop.f32.mrb[11].mxu1  ;;  %2190 = vmatmul.mubr.bf16.gmra.mrb[68].mxu0 %v1925_v50  ;;  %v1867_v23 = vmax.f32 %v1721_v17, 0.0 }
 0x236   : > { %v1727_v54 = vadd.f32 %v1726_v22, %v5104_v7  ;;  %v1868_v33 = vmax.f32 %v1723_v19, 0.0 }
 0x237   : > { %v1869_v32 = vmax.f32 %v1725_v21, 0.0 }
 0x238   : > { %v1870_v35 = vmax.f32 %v1727_v54, 0.0 }
 0x239   : > { %v1927_v36 = vpack.c.bf16 %v1869_v32, %v1867_v23 }
 0x23a   : > { %v1928_v37 = vpack.c.bf16 %v1870_v35, %v1868_v33  ;;  %v1730_v38 = vpop.f32.mrb[12].mxu1 }
 0x23b   : > { %v1731_v40 = vadd.f32 %v1730_v38, %v5102_v6  ;;  %v1732_v58 = vpop.f32.mrb[13].mxu1 }
 0x23c   : > { %v1733_v51 = vadd.f32 %v1732_v58, %v5104_v7  ;;  %v1734_v52 = vpop.f32.mrb[14].mxu1  ;;  %2199 = vmatprep.mubr.bf16.mxu0 %v1928_v37 }
 0x23d   : > { %v1735_v55 = vadd.f32 %v1734_v52, %v5102_v6  ;;  %v1736_v59 = vpop.f32.mrb[15].mxu1  ;;  %2200 = vmatmul.mubr.bf16.gmra.mrb[72].mxu0 %v1927_v36  ;;  %v1871_v4 = vmax.f32 %v1731_v40, 0.0 }
 0x23e   : > { %v1737_v60 = vadd.f32 %v1736_v59, %v5104_v7  ;;  %v1872_v5 = vmax.f32 %v1733_v51, 0.0 }
 0x23f   : > { %v1873_v39 = vmax.f32 %v1735_v55, 0.0 }
 0x240   : > { %v1874_v50 = vmax.f32 %v1737_v60, 0.0 }
 0x241   : > { %v1929_v10 = vpack.c.bf16 %v1873_v39, %v1871_v4 }
 0x242   : > { %v1930_v15 = vpack.c.bf16 %v1874_v50, %v1872_v5  ;;  %v1740_v17 = vpop.f32.mrb[16].mxu1 }
 0x243   : > { %v1741_v18 = vadd.f32 %v1740_v17, %v5102_v6  ;;  %v1742_v19 = vpop.f32.mrb[17].mxu1 }
 0x244   : > { %v1743_v20 = vadd.f32 %v1742_v19, %v5104_v7  ;;  %v1744_v21 = vpop.f32.mrb[18].mxu1  ;;  %2209 = vmatprep.mubr.bf16.mxu0 %v1930_v15 }
 0x245   : > { %v1745_v22 = vadd.f32 %v1744_v21, %v5102_v6  ;;  %v1746_v54 = vpop.f32.mrb[19].mxu1  ;;  %2210 = vmatmul.mubr.bf16.gmra.mrb[76].mxu0 %v1929_v10  ;;  %v1875_v32 = vmax.f32 %v1741_v18, 0.0 }
 0x246   : > { %v1747_v23 = vadd.f32 %v1746_v54, %v5104_v7  ;;  %v1876_v35 = vmax.f32 %v1743_v20, 0.0 }
 0x247   : > { %v1877_v33 = vmax.f32 %v1745_v22, 0.0 }
 0x248   : > { %v1878_v36 = vmax.f32 %v1747_v23, 0.0 }
 0x249   : > { %v1931_v37 = vpack.c.bf16 %v1877_v33, %v1875_v32 }
 0x24a   : > { %v1932_v38 = vpack.c.bf16 %v1878_v36, %v1876_v35  ;;  %v1750_v40 = vpop.f32.mrb[20].mxu1 }
 0x24b   : > { %v1751_v58 = vadd.f32 %v1750_v40, %v5102_v6  ;;  %v1752_v51 = vpop.f32.mrb[21].mxu1 }
 0x24c   : > { %v1753_v52 = vadd.f32 %v1752_v51, %v5104_v7  ;;  %v1754_v55 = vpop.f32.mrb[22].mxu1  ;;  %2219 = vmatprep.mubr.bf16.mxu0 %v1932_v38 }
 0x24d   : > { %v1755_v59 = vadd.f32 %v1754_v55, %v5102_v6  ;;  %v1756_v60 = vpop.f32.mrb[23].mxu1  ;;  %2220 = vmatmul.mubr.bf16.gmra.mrb[80].mxu0 %v1931_v37  ;;  %v1879_v39 = vmax.f32 %v1751_v58, 0.0 }
 0x24e   : > { %v1757_v4 = vadd.f32 %v1756_v60, %v5104_v7  ;;  %v1880_v50 = vmax.f32 %v1753_v52, 0.0 }
 0x24f   : > { %v1881_v5 = vmax.f32 %v1755_v59, 0.0 }
 0x250   : > { %v1882_v10 = vmax.f32 %v1757_v4, 0.0 }
 0x251   : > { %v1933_v15 = vpack.c.bf16 %v1881_v5, %v1879_v39 }
 0x252   : > { %v1934_v17 = vpack.c.bf16 %v1882_v10, %v1880_v50  ;;  %v1760_v18 = vpop.f32.mrb[24].mxu1 }
 0x253   : > { %v1761_v19 = vadd.f32 %v1760_v18, %v5102_v6  ;;  %v1762_v20 = vpop.f32.mrb[25].mxu1 }
 0x254   : > { %v1763_v21 = vadd.f32 %v1762_v20, %v5104_v7  ;;  %v1764_v22 = vpop.f32.mrb[26].mxu1  ;;  %2229 = vmatprep.mubr.bf16.mxu0 %v1934_v17 }
 0x255   : > { %v1765_v54 = vadd.f32 %v1764_v22, %v5102_v6  ;;  %v1766_v23 = vpop.f32.mrb[27].mxu1  ;;  %2230 = vmatmul.mubr.bf16.gmra.mrb[84].mxu0 %v1933_v15  ;;  %v1883_v33 = vmax.f32 %v1761_v19, 0.0 }
 0x256   : > { %v1767_v32 = vadd.f32 %v1766_v23, %v5104_v7  ;;  %v1884_v36 = vmax.f32 %v1763_v21, 0.0 }
 0x257   : > { %v1885_v35 = vmax.f32 %v1765_v54, 0.0 }
 0x258   : > { %v1886_v37 = vmax.f32 %v1767_v32, 0.0 }
 0x259   : > { %v1935_v38 = vpack.c.bf16 %v1885_v35, %v1883_v33 }
 0x25a   : > { %v1936_v40 = vpack.c.bf16 %v1886_v37, %v1884_v36  ;;  %v1770_v58 = vpop.f32.mrb[28].mxu1 }
 0x25b   : > { %v1771_v51 = vadd.f32 %v1770_v58, %v5102_v6  ;;  %v1772_v52 = vpop.f32.mrb[29].mxu1 }
 0x25c   : > { %v1773_v55 = vadd.f32 %v1772_v52, %v5104_v7  ;;  %v1774_v59 = vpop.f32.mrb[30].mxu1  ;;  %2239 = vmatprep.mubr.bf16.mxu0 %v1936_v40 }
 0x25d   : > { %v1775_v60 = vadd.f32 %v1774_v59, %v5102_v6  ;;  %v1776_v4 = vpop.f32.mrb[31].mxu1  ;;  %2240 = vmatmul.mubr.bf16.gmra.mrb[88].mxu0 %v1935_v38  ;;  %v1887_v5 = vmax.f32 %v1771_v51, 0.0 }
 0x25e   : > { %v1777_v39 = vadd.f32 %v1776_v4, %v5104_v7  ;;  %v1888_v10 = vmax.f32 %v1773_v55, 0.0 }
 0x25f   : > { %v1889_v50 = vmax.f32 %v1775_v60, 0.0 }
 0x260   : > { %v1890_v15 = vmax.f32 %v1777_v39, 0.0 }
 0x261   : > { %v1937_v17 = vpack.c.bf16 %v1889_v50, %v1887_v5 }
 0x262   : > { %v1938_v18 = vpack.c.bf16 %v1890_v15, %v1888_v10  ;;  %v1780_v19 = vpop.f32.mrb[32].mxu1 }
 0x263   : > { %v1781_v20 = vadd.f32 %v1780_v19, %v5102_v6  ;;  %v1782_v21 = vpop.f32.mrb[33].mxu1 }
 0x264   : > { %v1783_v22 = vadd.f32 %v1782_v21, %v5104_v7  ;;  %v1784_v54 = vpop.f32.mrb[34].mxu1  ;;  %2249 = vmatprep.mubr.bf16.mxu0 %v1938_v18 }
 0x265   : > { %v1785_v23 = vadd.f32 %v1784_v54, %v5102_v6  ;;  %v1786_v32 = vpop.f32.mrb[35].mxu1  ;;  %2250 = vmatmul.mubr.bf16.gmra.mrb[92].mxu0 %v1937_v17  ;;  %v1891_v35 = vmax.f32 %v1781_v20, 0.0 }
 0x266   : > { %v1787_v33 = vadd.f32 %v1786_v32, %v5104_v7  ;;  %v1892_v37 = vmax.f32 %v1783_v22, 0.0 }
 0x267   : > { %v1893_v36 = vmax.f32 %v1785_v23, 0.0 }
 0x268   : > { %v1894_v38 = vmax.f32 %v1787_v33, 0.0 }
 0x269   : > { %v1939_v40 = vpack.c.bf16 %v1893_v36, %v1891_v35 }
 0x26a   : > { %v1940_v58 = vpack.c.bf16 %v1894_v38, %v1892_v37  ;;  %v1790_v51 = vpop.f32.mrb[36].mxu1 }
 0x26b   : > { %v1791_v52 = vadd.f32 %v1790_v51, %v5102_v6  ;;  %v1792_v55 = vpop.f32.mrb[37].mxu1 }
 0x26c   : > { %v1793_v59 = vadd.f32 %v1792_v55, %v5104_v7  ;;  %v1794_v60 = vpop.f32.mrb[38].mxu1  ;;  %2259 = vmatprep.mubr.bf16.mxu0 %v1940_v58 }
 0x26d   : > { %v1795_v4 = vadd.f32 %v1794_v60, %v5102_v6  ;;  %v1796_v39 = vpop.f32.mrb[39].mxu1  ;;  %2260 = vmatmul.mubr.bf16.gmra.mrb[96].mxu0 %v1939_v40  ;;  %v1895_v50 = vmax.f32 %v1791_v52, 0.0 }
 0x26e   : > { %v1797_v5 = vadd.f32 %v1796_v39, %v5104_v7  ;;  %v1896_v15 = vmax.f32 %v1793_v59, 0.0 }
 0x26f   : > { %v1897_v10 = vmax.f32 %v1795_v4, 0.0 }
 0x270   : > { %v1898_v17 = vmax.f32 %v1797_v5, 0.0 }
 0x271   : > { %v1941_v18 = vpack.c.bf16 %v1897_v10, %v1895_v50 }
 0x272   : > { %v1942_v19 = vpack.c.bf16 %v1898_v17, %v1896_v15  ;;  %v1800_v20 = vpop.f32.mrb[40].mxu1 }
 0x273   : > { %v1801_v21 = vadd.f32 %v1800_v20, %v5102_v6  ;;  %v1802_v22 = vpop.f32.mrb[41].mxu1 }
 0x274   : > { %v1803_v54 = vadd.f32 %v1802_v22, %v5104_v7  ;;  %v1804_v23 = vpop.f32.mrb[42].mxu1  ;;  %2269 = vmatprep.mubr.bf16.mxu0 %v1942_v19 }
 0x275   : > { %v1805_v32 = vadd.f32 %v1804_v23, %v5102_v6  ;;  %v1806_v33 = vpop.f32.mrb[43].mxu1  ;;  %2270 = vmatmul.mubr.bf16.gmra.mrb[100].mxu0 %v1941_v18  ;;  %v1899_v36 = vmax.f32 %v1801_v21, 0.0 }
 0x276   : > { %v1807_v35 = vadd.f32 %v1806_v33, %v5104_v7  ;;  %v1900_v38 = vmax.f32 %v1803_v54, 0.0 }
 0x277   : > { %v1901_v37 = vmax.f32 %v1805_v32, 0.0 }
 0x278   : > { %v1902_v40 = vmax.f32 %v1807_v35, 0.0 }
 0x279   : > { %v1943_v58 = vpack.c.bf16 %v1901_v37, %v1899_v36 }
 0x27a   : > { %v1944_v51 = vpack.c.bf16 %v1902_v40, %v1900_v38  ;;  %v1810_v52 = vpop.f32.mrb[44].mxu1 }
 0x27b   : > { %v1811_v55 = vadd.f32 %v1810_v52, %v5102_v6  ;;  %v1812_v59 = vpop.f32.mrb[45].mxu1 }
 0x27c   : > { %v1813_v60 = vadd.f32 %v1812_v59, %v5104_v7  ;;  %v1814_v4 = vpop.f32.mrb[46].mxu1  ;;  %2279 = vmatprep.mubr.bf16.mxu0 %v1944_v51 }
 0x27d   : > { %v1815_v39 = vadd.f32 %v1814_v4, %v5102_v6  ;;  %v1816_v5 = vpop.f32.mrb[47].mxu1  ;;  %2280 = vmatmul.mubr.bf16.gmra.mrb[104].mxu0 %v1943_v58  ;;  %v1903_v10 = vmax.f32 %v1811_v55, 0.0 }
 0x27e   : > { %v1817_v50 = vadd.f32 %v1816_v5, %v5104_v7  ;;  %v1904_v17 = vmax.f32 %v1813_v60, 0.0 }
 0x27f   : > { %v1905_v15 = vmax.f32 %v1815_v39, 0.0 }
 0x280   : > { %v1906_v18 = vmax.f32 %v1817_v50, 0.0 }
 0x281   : > { %v1945_v19 = vpack.c.bf16 %v1905_v15, %v1903_v10 }
 0x282   : > { %v1946_v20 = vpack.c.bf16 %v1906_v18, %v1904_v17  ;;  %v1820_v21 = vpop.f32.mrb[48].mxu1 }
 0x283   : > { %v1821_v22 = vadd.f32 %v1820_v21, %v5102_v6  ;;  %v1822_v54 = vpop.f32.mrb[49].mxu1 }
 0x284   : > { %v1823_v23 = vadd.f32 %v1822_v54, %v5104_v7  ;;  %v1824_v32 = vpop.f32.mrb[50].mxu1  ;;  %2289 = vmatprep.mubr.bf16.mxu0 %v1946_v20 }
 0x285   : > { %v1825_v33 = vadd.f32 %v1824_v32, %v5102_v6  ;;  %v1826_v35 = vpop.f32.mrb[51].mxu1  ;;  %2290 = vmatmul.mubr.bf16.gmra.mrb[108].mxu0 %v1945_v19  ;;  %v1907_v37 = vmax.f32 %v1821_v22, 0.0 }
 0x286   : > { %v1827_v36 = vadd.f32 %v1826_v35, %v5104_v7  ;;  %v1908_v40 = vmax.f32 %v1823_v23, 0.0 }
 0x287   : > { %v1909_v38 = vmax.f32 %v1825_v33, 0.0 }
 0x288   : > { %v1910_v58 = vmax.f32 %v1827_v36, 0.0 }
 0x289   : > { %v1947_v51 = vpack.c.bf16 %v1909_v38, %v1907_v37 }
 0x28a   : > { %v1948_v52 = vpack.c.bf16 %v1910_v58, %v1908_v40  ;;  %v1830_v55 = vpop.f32.mrb[52].mxu1 }
 0x28b   : > { %v1831_v59 = vadd.f32 %v1830_v55, %v5102_v6  ;;  %v1832_v60 = vpop.f32.mrb[53].mxu1 }
 0x28c   : > { %v1833_v4 = vadd.f32 %v1832_v60, %v5104_v7  ;;  %v1834_v39 = vpop.f32.mrb[54].mxu1  ;;  %2299 = vmatprep.mubr.bf16.mxu0 %v1948_v52 }
 0x28d   : > { %v1835_v5 = vadd.f32 %v1834_v39, %v5102_v6  ;;  %v1836_v50 = vpop.f32.mrb[55].mxu1  ;;  %2300 = vmatmul.mubr.bf16.gmra.mrb[112].mxu0 %v1947_v51  ;;  %v1911_v15 = vmax.f32 %v1831_v59, 0.0 }
 0x28e   : > { %v1837_v10 = vadd.f32 %v1836_v50, %v5104_v7  ;;  %v1912_v18 = vmax.f32 %v1833_v4, 0.0 }
 0x28f   : > { %v1913_v17 = vmax.f32 %v1835_v5, 0.0 }
 0x290   : > { %v1914_v19 = vmax.f32 %v1837_v10, 0.0 }
 0x291   : > { %v1949_v20 = vpack.c.bf16 %v1913_v17, %v1911_v15 }
 0x292   : > { %v1950_v21 = vpack.c.bf16 %v1914_v19, %v1912_v18  ;;  %v1840_v22 = vpop.f32.mrb[56].mxu1 }
 0x293   : > { %v1841_v54 = vadd.f32 %v1840_v22, %v5102_v6  ;;  %v1842_v23 = vpop.f32.mrb[57].mxu1 }
 0x294   : > { %v1843_v32 = vadd.f32 %v1842_v23, %v5104_v7  ;;  %v1844_v33 = vpop.f32.mrb[58].mxu1  ;;  %2309 = vmatprep.mubr.bf16.mxu0 %v1950_v21 }
 0x295   : > { %v1845_v35 = vadd.f32 %v1844_v33, %v5102_v6  ;;  %v1846_v36 = vpop.f32.mrb[59].mxu1  ;;  %2310 = vmatmul.mubr.bf16.gmra.mrb[116].mxu0 %v1949_v20  ;;  %v1915_v38 = vmax.f32 %v1841_v54, 0.0 }
 0x296   : > { %v1847_v37 = vadd.f32 %v1846_v36, %v5104_v7  ;;  %v1916_v58 = vmax.f32 %v1843_v32, 0.0 }
 0x297   : > { %v1917_v40 = vmax.f32 %v1845_v35, 0.0 }
 0x298   : > { %v1918_v51 = vmax.f32 %v1847_v37, 0.0 }
 0x299   : > { %v1951_v52 = vpack.c.bf16 %v1917_v40, %v1915_v38 }
 0x29a   : > { %v1952_v55 = vpack.c.bf16 %v1918_v51, %v1916_v58  ;;  %v1850_v59 = vpop.f32.mrb[60].mxu1 }
 0x29b   : > { %v1851_v60 = vadd.f32 %v1850_v59, %v5102_v6  ;;  %v1852_v4 = vpop.f32.mrb[61].mxu1 }
 0x29c   : > { %v1853_v39 = vadd.f32 %v1852_v4, %v5104_v7  ;;  %v1854_v5 = vpop.f32.mrb[62].mxu1  ;;  %2319 = vmatprep.mubr.bf16.mxu0 %v1952_v55 }
 0x29d   : > { %v1855_v50 = vadd.f32 %v1854_v5, %v5102_v6  ;;  %v1856_v10 = vpop.f32.mrb[63].mxu1  ;;  %2320 = vmatmul.mubr.bf16.gmra.mrb[120].mxu0 %v1951_v52  ;;  %v1919_v17 = vmax.f32 %v1851_v60, 0.0 }
 0x29e   : > { %v1857_v15 = vadd.f32 %v1856_v10, %v5104_v7  ;;  %v1920_v19 = vmax.f32 %v1853_v39, 0.0 }
 0x29f   : > { %v1921_v18 = vmax.f32 %v1855_v50, 0.0 }
 0x2a0   : > { %v1922_v20 = vmax.f32 %v1857_v15, 0.0 }
 0x2a1   : > { %v1953_v21 = vpack.c.bf16 %v1921_v18, %v1919_v17 }
 0x2a2   : > { %v1954_v22 = vpack.c.bf16 %v1922_v20, %v1920_v19 }
 0x2a4   : > { %2329 = vmatprep.mubr.bf16.mxu0 %v1954_v22 }
 0x2a5   : > { %2330 = vmatmul.mubr.bf16.gmra.mrb[124].mxu0 %v1953_v21 }
 0x2a6   : > { %2796 = vmatprep.mubr.bf16.mxu0 %v5821_v34 }
 0x300   : > { %v2181_v54 = vpop.f32.mrb[64].mxu0 }
 0x301   : > { %v5171_v23 = vpop.f32.mrb[65].mxu0 }
 0x302   : > { %v2185_v32 = vpop.f32.mrb[66].mxu0 }
 0x303   : > { %v2340_v33 = vpack.c.bf16 %v2185_v32, %v2181_v54  ;;  %v5173_v6 = vpop.f32.mrb[67].mxu0 }
 0x308   : > { %v2191_v35 = vpop.f32.mrb[68].mxu0 }
 0x309   : > { %v5175_v36 = vpop.f32.mrb[69].mxu0 }
 0x30a   : > { %v2195_v7 = vpop.f32.mrb[70].mxu0 }
 0x30b   : > { %v2341_v37 = vpack.c.bf16 %v2195_v7, %v2191_v35  ;;  %v5177_v38 = vpop.f32.mrb[71].mxu0 }
 0x310   : > { %v2201_v40 = vpop.f32.mrb[72].mxu0 }
 0x311   : > { %v5179_v58 = vpop.f32.mrb[73].mxu0 }
 0x312   : > { %v2205_v51 = vpop.f32.mrb[74].mxu0 }
 0x313   : > { %v2342_v52 = vpack.c.bf16 %v2205_v51, %v2201_v40  ;;  %v5181_v55 = vpop.f32.mrb[75].mxu0 }
 0x318   : > { %v2211_v59 = vpop.f32.mrb[76].mxu0 }
 0x319   : > { %v5183_v60 = vpop.f32.mrb[77].mxu0 }
 0x31a   : > { %v2215_v4 = vpop.f32.mrb[78].mxu0 }
 0x31b   : > { %v2343_v39 = vpack.c.bf16 %v2215_v4, %v2211_v59  ;;  %v5185_v5 = vpop.f32.mrb[79].mxu0 }
 0x320   : > { %v2221_v50 = vpop.f32.mrb[80].mxu0 }
 0x321   : > { %v5187_v10 = vpop.f32.mrb[81].mxu0 }
 0x322   : > { %v2225_v15 = vpop.f32.mrb[82].mxu0 }
 0x323   : > { %v2344_v17 = vpack.c.bf16 %v2225_v15, %v2221_v50  ;;  %v5189_v18 = vpop.f32.mrb[83].mxu0 }
 0x328   : > { %v2231_v19 = vpop.f32.mrb[84].mxu0 }
 0x329   : > { %v5191_v20 = vpop.f32.mrb[85].mxu0 }
 0x32a   : > { %v2235_v21 = vpop.f32.mrb[86].mxu0 }
 0x32b   : > { %v2345_v22 = vpack.c.bf16 %v2235_v21, %v2231_v19  ;;  %v5193_v54 = vpop.f32.mrb[87].mxu0 }
 0x330   : > { %v2241_v32 = vpop.f32.mrb[88].mxu0 }
 0x331   : > { %v5195_v35 = vpop.f32.mrb[89].mxu0 }
 0x332   : > { %v2245_v7 = vpop.f32.mrb[90].mxu0 }
 0x333   : > { %v2346_v40 = vpack.c.bf16 %v2245_v7, %v2241_v32  ;;  %v5197_v51 = vpop.f32.mrb[91].mxu0 }
 0x338   : > { %v5199_v59 = vpop.f32.mrb[92].mxu0 }
 0x339   : > { %v5201_v4 = vpop.f32.mrb[93].mxu0 }
 0x33a   : > { %v5203_v50 = vpop.f32.mrb[94].mxu0 }
 0x33b   : > { %v5207_v3 = vpop.f32.mrb[95].mxu0 }
 0x340   : > { %v2261_v19 = vpop.f32.mrb[96].mxu0 }
 0x341   : > { %v5209_v21 = vpop.f32.mrb[97].mxu0 }
 0x342   : > { %v2265_v34 = vpop.f32.mrb[98].mxu0 }
 0x343   : > { %v2348_v45 = vpack.c.bf16 %v2265_v34, %v2261_v19  ;;  %v5211_v53 = vpop.f32.mrb[99].mxu0 }
 0x345   : > { %3898 = vmatprep.subr.bf16.mxu1 %v2348_v45 }
 0x346   : > { %3899 = vmatpush3.bf16.msra.mxu1 %v2340_v33 }
 0x348   : > { %v2271_v32 = vpop.f32.mrb[100].mxu0 }
 0x349   : > { %v5213_v7 = vpop.f32.mrb[101].mxu0 }
 0x34a   : > { %v2275_v43 = vpop.f32.mrb[102].mxu0 }
 0x34b   : > { %v2349_v24 = vpack.c.bf16 %v2275_v43, %v2271_v32  ;;  %v5215_v9 = vpop.f32.mrb[103].mxu0 }
 0x34d   : > { %3900 = vmatprep.subr.bf16.mxu1 %v2349_v24 }
 0x34e   : > { %3901 = vmatpush3.bf16.msra.mxu1 %v2341_v37 }
 0x350   : > { %v2281_v15 = vpop.f32.mrb[104].mxu0 }
 0x351   : > { %v5217_v8 = vpop.f32.mrb[105].mxu0 }
 0x352   : > { %v2285_v57 = vpop.f32.mrb[106].mxu0 }
 0x353   : > { %v2350_v56 = vpack.c.bf16 %v2285_v57, %v2281_v15  ;;  %v5219_v31 = vpop.f32.mrb[107].mxu0 }
 0x355   : > { %3902 = vmatprep.subr.bf16.mxu1 %v2350_v56 }
 0x356   : > { %3903 = vmatpush3.bf16.msra.mxu1 %v2342_v52 }
 0x358   : > { %v2291_v34 = vpop.f32.mrb[108].mxu0 }
 0x359   : > { %v5221_v45 = vpop.f32.mrb[109].mxu0 }
 0x35a   : > { %5892 = vst [vmem:[#allocation16_spill] sm:$0xff] %v5221_v45  ;;  %v2295_v33 = vpop.f32.mrb[110].mxu0 }
 0x35b   : > { %v2351_v19 = vpack.c.bf16 %v2295_v33, %v2291_v34  ;;  %v5223_v27 = vpop.f32.mrb[111].mxu0 }
 0x35d   : > { %3904 = vmatprep.subr.bf16.mxu1 %v2351_v19 }
 0x35e   : > { %3905 = vmatpush3.bf16.msra.mxu1 %v2343_v39 }
 0x360   : > { %v2301_v24 = vpop.f32.mrb[112].mxu0 }
 0x361   : > { %v5225_v43 = vpop.f32.mrb[113].mxu0 }
 0x362   : > { %5893 = vst [vmem:[#allocation17_spill] sm:$0xff] %v5225_v43  ;;  %v2305_v37 = vpop.f32.mrb[114].mxu0 }
 0x363   : > { %v2352_v32 = vpack.c.bf16 %v2305_v37, %v2301_v24  ;;  %v5227_v14 = vpop.f32.mrb[115].mxu0  ;;  %v4362_v37 = vld [vmem:[%s5812_s7] ss:$8 sps:$4 sm:$0xff]  }
 0x365   : > { %3906 = vmatprep.subr.bf16.mxu1 %v2352_v32 }
 0x366   : > { %3907 = vmatpush3.bf16.msra.mxu1 %v2344_v17 }
 0x368   : > { %v2311_v56 = vpop.f32.mrb[116].mxu0 }
 0x369   : > { %v5229_v57 = vpop.f32.mrb[117].mxu0 }
 0x36a   : > { %v2315_v52 = vpop.f32.mrb[118].mxu0 }
 0x36b   : > { %v2353_v15 = vpack.c.bf16 %v2315_v52, %v2311_v56  ;;  %v5231_v45 = vpop.f32.mrb[119].mxu0  ;;  %v4367_v56 = vld [vmem:[%s5812_s7 + $0x14] ss:$8 sps:$4 sm:$0xff]  }
 0x36d   : > { %3908 = vmatprep.subr.bf16.mxu1 %v2353_v15  ;;  %v4365_v15 = vld [vmem:[%s5812_s7 + $0x10] ss:$8 sps:$4 sm:$0xff]  }
 0x36e   : > { %3909 = vmatpush3.bf16.msra.mxu1 %v2345_v22  ;;  %v4364_v22 = vld [vmem:[%s5812_s7 + $0x4] ss:$8 sps:$4 sm:$0xff]  }
 0x36f   : > { %2764 = vmatprep.subr.bf16.mxu0 %v4364_v22  ;;  %v5277_v22 = vld [vmem:[%s4668_s19 + $0x10] ss:$8 sps:$4 sm:$0xff]  }
 0x370   : > { %v2321_v34 = vpop.f32.mrb[120].mxu0  ;;  %2765 = vmatpush1.bf16.msra.mxu0 %v4362_v37  ;;  %v4373_v37 = vld [vmem:[%s5812_s7 + $0x34] ss:$8 sps:$4 sm:$0xff]   ;;  %5901 = vst [vmem:[#allocation24_spill] sm:$0xff] %v5277_v22 }
 0x371   : > { %v5233_v39 = vpop.f32.mrb[121].mxu0  ;;  %2766 = vmatprep.subr.bf16.mxu0 %v4367_v56  ;;  %v5285_v56 = vld [vmem:[%s4668_s19 + $0x20] ss:$8 sps:$4 sm:$0xff]  }
 0x372   : > { %5894 = vst [vmem:[#allocation18_spill] sm:$0xff] %v5233_v39  ;;  %v2325_v33 = vpop.f32.mrb[122].mxu0  ;;  %5903 = vst [vmem:[#allocation26_spill] sm:$0xff] %v5285_v56 }
 0x373   : > { %v2354_v19 = vpack.c.bf16 %v2325_v33, %v2321_v34  ;;  %v5235_v43 = vpop.f32.mrb[123].mxu0  ;;  %v4370_v34 = vld [vmem:[%s5812_s7 + $0x24] ss:$8 sps:$4 sm:$0xff]   ;;  %v5898_v33 = vpack.c.bf16 %v5203_v50, %v5199_v59  ;;  %v5270_v59 = vld [vmem:[%s4668_s19 + $0x14] ss:$8 sps:$4 sm:$0xff]  }
 0x374   : > { %5895 = vst [vmem:[#allocation19_spill] sm:$0xff] %v5235_v43  ;;  %2767 = vmatpush1.bf16.msra.mxu0 %v4365_v15  ;;  %5900 = vst [vmem:[#allocation23_spill] sm:$0xff] %v5270_v59  ;;  %v4371_v50 = vld [vmem:[%s5812_s7 + $0x30] ss:$8 sps:$4 sm:$0xff]  }
 0x375   : > { %3910 = vmatprep.subr.bf16.mxu1 %v2354_v19  ;;  %v4368_v19 = vld [vmem:[%s5812_s7 + $0x20] ss:$8 sps:$4 sm:$0xff]   ;;  %2768 = vmatprep.subr.bf16.mxu0 %v4370_v34  ;;  %v5293_v15 = vld [vmem:[%s4668_s19 + $0x30] ss:$8 sps:$4 sm:$0xff]   ;;  %v5297_v34 = vld [vmem:[%s4668_s19 + $0x44] ss:$8 sps:$4 sm:$0xff]  }
 0x376   : > { %3911 = vmatpush3.bf16.msra.mxu1 %v2346_v40  ;;  %5905 = vst [vmem:[#allocation28_spill] sm:$0xff] %v5293_v15  ;;  %5906 = vst [vmem:[#allocation29_spill] sm:$0xff] %v5297_v34 }
 0x378   : > { %v2331_v24 = vpop.f32.mrb[124].mxu0  ;;  %2769 = vmatpush1.bf16.msra.mxu0 %v4368_v19  ;;  %v5305_v19 = vld [vmem:[%s4668_s19 + $0x54] ss:$8 sps:$4 sm:$0xff]  }
 0x379   : > { %v5237_v17 = vpop.f32.mrb[125].mxu0  ;;  %2770 = vmatprep.subr.bf16.mxu0 %v4373_v37  ;;  %5908 = vst [vmem:[#allocation31_spill] sm:$0xff] %v5305_v19  ;;  %v5309_v37 = vld [vmem:[%s4668_s19 + $0x50] ss:$8 sps:$4 sm:$0xff]  }
 0x37a   : > { %5896 = vst [vmem:[#allocation20_spill] sm:$0xff] %v5237_v17  ;;  %v2335_v32 = vpop.f32.mrb[126].mxu0  ;;  %5909 = vst [vmem:[#allocation32_spill] sm:$0xff] %v5309_v37 }
 0x37b   : > { %v2355_v52 = vpack.c.bf16 %v2335_v32, %v2331_v24  ;;  %v5248_v40 = vpop.f32.mrb[127].mxu0  ;;  %v5263_v24 = vld [vmem:[%s4668_s19] ss:$8 sps:$4 sm:$0xff]   ;;  %v5281_v32 = vld [vmem:[%s4668_s19 + $0x24] ss:$8 sps:$4 sm:$0xff]  }
 0x37c   : > { %5897 = vst [vmem:[#allocation21_spill] sm:$0xff] %v5248_v40  ;;  %5899 = vst [vmem:[#allocation22_spill] sm:$0xff] %v5263_v24  ;;  %2771 = vmatpush1.bf16.msra.mxu0 %v4371_v50  ;;  %v5313_v50 = vld [vmem:[%s4668_s19 + $0x64] ss:$8 sps:$4 sm:$0xff]  }
 0x37d   : > { %3912 = vmatprep.subr.bf16.mxu1 %v2355_v52  ;;  %5902 = vst [vmem:[#allocation25_spill] sm:$0xff] %v5281_v32  ;;  %v5289_v52 = vld [vmem:[%s4668_s19 + $0x34] ss:$8 sps:$4 sm:$0xff]   ;;  %5910 = vst [vmem:[#allocation33_spill] sm:$0xff] %v5313_v50 }
 0x37e   : > { %3913 = vmatpush3.bf16.msra.mxu1 %v5898_v33  ;;  %5904 = vst [vmem:[#allocation27_spill] sm:$0xff] %v5289_v52  ;;  %v5301_v33 = vld [vmem:[%s4668_s19 + $0x40] ss:$8 sps:$4 sm:$0xff]  }
 0x37f   : > { %5907 = vst [vmem:[#allocation30_spill] sm:$0xff] %v5301_v33 }
 0x381   : > { %2389 = vmatmul.mubr.bf16.vlgmr.msra.gmra.mrb[64].mxu1 %v5263_v24 }
 0x382   : > { %2396 = vmatprep.mubr.bf16.mxu1 %v5270_v59 }
 0x389   : > { %2397 = vmatmul.mubr.bf16.gmra.mrb[68].mxu1 %v5277_v22 }
 0x38a   : > { %2404 = vmatprep.mubr.bf16.mxu1 %v5281_v32 }
 0x391   : > { %2405 = vmatmul.mubr.bf16.gmra.mrb[72].mxu1 %v5285_v56 }
 0x392   : > { %2412 = vmatprep.mubr.bf16.mxu1 %v5289_v52  ;;  %v5405_v52 = vld [vmem:[%s4668_s19 + $0xe0] ss:$8 sps:$4 sm:$0xff]  }
 0x393   : > { %5927 = vst [vmem:[#allocation50_spill] sm:$0xff] %v5405_v52 }
 0x399   : > { %2413 = vmatmul.mubr.bf16.gmra.mrb[76].mxu1 %v5293_v15  ;;  %v5333_v15 = vld [vmem:[%s4668_s19 + $0x80] ss:$8 sps:$4 sm:$0xff]  }
 0x39a   : > { %2420 = vmatprep.mubr.bf16.mxu1 %v5297_v34  ;;  %v5317_v34 = vld [vmem:[%s4668_s19 + $0x60] ss:$8 sps:$4 sm:$0xff]   ;;  %5915 = vst [vmem:[#allocation38_spill] sm:$0xff] %v5333_v15 }
 0x39b   : > { %5911 = vst [vmem:[#allocation34_spill] sm:$0xff] %v5317_v34 }
 0x3a1   : > { %2421 = vmatmul.mubr.bf16.gmra.mrb[80].mxu1 %v5301_v33  ;;  %v5321_v33 = vld [vmem:[%s4668_s19 + $0x74] ss:$8 sps:$4 sm:$0xff]  }
 0x3a2   : > { %2428 = vmatprep.mubr.bf16.mxu1 %v5305_v19  ;;  %5912 = vst [vmem:[#allocation35_spill] sm:$0xff] %v5321_v33  ;;  %v5325_v19 = vld [vmem:[%s4668_s19 + $0x70] ss:$8 sps:$4 sm:$0xff]  }
 0x3a3   : > { %5913 = vst [vmem:[#allocation36_spill] sm:$0xff] %v5325_v19 }
 0x3a9   : > { %2429 = vmatmul.mubr.bf16.gmra.mrb[84].mxu1 %v5309_v37  ;;  %v5329_v37 = vld [vmem:[%s4668_s19 + $0x84] ss:$8 sps:$4 sm:$0xff]  }
 0x3aa   : > { %2436 = vmatprep.mubr.bf16.mxu1 %v5313_v50  ;;  %5914 = vst [vmem:[#allocation37_spill] sm:$0xff] %v5329_v37  ;;  %v5337_v50 = vld [vmem:[%s4668_s19 + $0x94] ss:$8 sps:$4 sm:$0xff]  }
 0x3ab   : > { %5916 = vst [vmem:[#allocation39_spill] sm:$0xff] %v5337_v50 }
 0x3b1   : > { %2437 = vmatmul.mubr.bf16.gmra.mrb[88].mxu1 %v5317_v34  ;;  %v5341_v34 = vld [vmem:[%s4668_s19 + $0x90] ss:$8 sps:$4 sm:$0xff]  }
 0x3b2   : > { %2444 = vmatprep.mubr.bf16.mxu1 %v5321_v33  ;;  %5917 = vst [vmem:[#allocation40_spill] sm:$0xff] %v5341_v34  ;;  %v5345_v33 = vld [vmem:[%s4668_s19 + $0xa4] ss:$8 sps:$4 sm:$0xff]  }
 0x3b3   : > { %5918 = vst [vmem:[#allocation41_spill] sm:$0xff] %v5345_v33 }
 0x3b9   : > { %2445 = vmatmul.mubr.bf16.gmra.mrb[92].mxu1 %v5325_v19  ;;  %v5349_v19 = vld [vmem:[%s4668_s19 + $0xa0] ss:$8 sps:$4 sm:$0xff]  }
 0x3ba   : > { %2452 = vmatprep.mubr.bf16.mxu1 %v5329_v37  ;;  %5919 = vst [vmem:[#allocation42_spill] sm:$0xff] %v5349_v19  ;;  %v5353_v37 = vld [vmem:[%s4668_s19 + $0xb4] ss:$8 sps:$4 sm:$0xff]  }
 0x3bb   : > { %5920 = vst [vmem:[#allocation43_spill] sm:$0xff] %v5353_v37 }
 0x3c1   : > { %2453 = vmatmul.mubr.bf16.gmra.mrb[96].mxu1 %v5333_v15  ;;  %v5373_v15 = vld [vmem:[%s4668_s19 + $0xc4] ss:$8 sps:$4 sm:$0xff]  }
 0x3c2   : > { %2460 = vmatprep.mubr.bf16.mxu1 %v5337_v50  ;;  %v4376_v50 = vld [vmem:[%s5812_s7 + $0x44] ss:$8 sps:$4 sm:$0xff]   ;;  %5922 = vst [vmem:[#allocation45_spill] sm:$0xff] %v5373_v15 }
 0x3c3   : > { %2772 = vmatprep.subr.bf16.mxu0 %v4376_v50  ;;  %v4383_v50 = vld [vmem:[%s5812_s7 + $0x70] ss:$8 sps:$4 sm:$0xff]  }
 0x3c9   : > { %2461 = vmatmul.mubr.bf16.gmra.mrb[100].mxu1 %v5341_v34  ;;  %v4374_v34 = vld [vmem:[%s5812_s7 + $0x40] ss:$8 sps:$4 sm:$0xff]  }
 0x3ca   : > { %2468 = vmatprep.mubr.bf16.mxu1 %v5345_v33  ;;  %2773 = vmatpush1.bf16.msra.mxu0 %v4374_v34  ;;  %v4379_v33 = vld [vmem:[%s5812_s7 + $0x54] ss:$8 sps:$4 sm:$0xff]   ;;  %v4382_v34 = vld [vmem:[%s5812_s7 + $0x64] ss:$8 sps:$4 sm:$0xff]  }
 0x3cb   : > { %2774 = vmatprep.subr.bf16.mxu0 %v4379_v33  ;;  %v4380_v33 = vld [vmem:[%s5812_s7 + $0x60] ss:$8 sps:$4 sm:$0xff]  }
 0x3d1   : > { %2469 = vmatmul.mubr.bf16.gmra.mrb[104].mxu1 %v5349_v19  ;;  %v4377_v19 = vld [vmem:[%s5812_s7 + $0x50] ss:$8 sps:$4 sm:$0xff]  }
 0x3d2   : > { %2476 = vmatprep.mubr.bf16.mxu1 %v5353_v37  ;;  %v5369_v37 = vld [vmem:[%s4668_s19 + $0xb0] ss:$8 sps:$4 sm:$0xff]   ;;  %2775 = vmatpush1.bf16.msra.mxu0 %v4377_v19  ;;  %v4385_v19 = vld [vmem:[%s5812_s7 + $0x74] ss:$8 sps:$4 sm:$0xff]  }
 0x3d3   : > { %5921 = vst [vmem:[#allocation44_spill] sm:$0xff] %v5369_v37  ;;  %2776 = vmatprep.subr.bf16.mxu0 %v4382_v34  ;;  %v5397_v34 = vld [vmem:[%s4668_s19 + $0xd0] ss:$8 sps:$4 sm:$0xff]  }
 0x3d4   : > { %5925 = vst [vmem:[#allocation48_spill] sm:$0xff] %v5397_v34 }
 0x3d6   : > { %2777 = vmatpush1.bf16.msra.mxu0 %v4380_v33  ;;  %v5401_v33 = vld [vmem:[%s4668_s19 + $0xe4] ss:$8 sps:$4 sm:$0xff]  }
 0x3d7   : > { %2778 = vmatprep.subr.bf16.mxu0 %v4385_v19  ;;  %5926 = vst [vmem:[#allocation49_spill] sm:$0xff] %v5401_v33  ;;  %v5409_v19 = vld [vmem:[%s4668_s19 + $0xf4] ss:$8 sps:$4 sm:$0xff]  }
 0x3d8   : > { %5928 = vst [vmem:[#allocation51_spill] sm:$0xff] %v5409_v19 }
 0x3d9   : > { %2477 = vmatmul.mubr.bf16.gmra.mrb[108].mxu1 %v5369_v37  ;;  %v5393_v37 = vld [vmem:[%s4668_s19 + $0xd4] ss:$8 sps:$4 sm:$0xff]  }
 0x3da   : > { %2484 = vmatprep.mubr.bf16.mxu1 %v5373_v15  ;;  %v5389_v15 = vld [vmem:[%s4668_s19 + $0xc0] ss:$8 sps:$4 sm:$0xff]   ;;  %2779 = vmatpush1.bf16.msra.mxu0 %v4383_v50  ;;  %5924 = vst [vmem:[#allocation47_spill] sm:$0xff] %v5393_v37  ;;  %v5413_v50 = vld [vmem:[%s4668_s19 + $0xf0] ss:$8 sps:$4 sm:$0xff]  }
 0x3db   : > { %5923 = vst [vmem:[#allocation46_spill] sm:$0xff] %v5389_v15  ;;  %5929 = vst [vmem:[#allocation52_spill] sm:$0xff] %v5413_v50 }
 0x3e1   : > { %2485 = vmatmul.mubr.bf16.gmra.mrb[112].mxu1 %v5389_v15 }
 0x3e2   : > { %2492 = vmatprep.mubr.bf16.mxu1 %v5393_v37 }
 0x3e9   : > { %2493 = vmatmul.mubr.bf16.gmra.mrb[116].mxu1 %v5397_v34 }
 0x3ea   : > { %2500 = vmatprep.mubr.bf16.mxu1 %v5401_v33 }
 0x3f1   : > { %2501 = vmatmul.mubr.bf16.gmra.mrb[120].mxu1 %v5405_v52  ;;  %v5421_v52 = vld [vmem:[%s5811_s6] ss:$0 sm:$0xff] }
 0x3f2   : > { %2508 = vmatprep.mubr.bf16.mxu1 %v5409_v19 }
 0x3f9   : > { %2509 = vmatmul.mubr.bf16.gmra.mrb[124].mxu1 %v5413_v50 }
 0x3fa   : > { %3005 = vmatprep.mubr.bf16.mxu1 %v5095_v61 }
 0x454   : > { %v3914_v37 = vpop.f32.mrb[64].mxu1 }
 0x455   : > { %v3915_v34 = vpop.f32.mrb[65].mxu1 }
 0x456   : > { %v3916_v15 = vadd.f32 %v3915_v34, %v3914_v37  ;;  %v3917_v56 = vpop.f32.mrb[66].mxu1 }
 0x457   : > { %v3918_v32 = vpop.f32.mrb[67].mxu1 }
 0x458   : > { %v2517_v33 = vmul.f32 %v3916_v15, %v4887_v29  ;;  %v3919_v22 = vadd.f32 %v3918_v32, %v3917_v56 }
 0x45a   : > { %v2549_v19 = vadd.f32 %v2517_v33, %v5171_v23  ;;  %v2518_v59 = vmul.f32 %v3919_v22, %v4898_v42 }
 0x45c   : > { %v2588_v50 = vadd.f32 %v5421_v52, %v2549_v19  ;;  %v2550_v61 = vadd.f32 %v2518_v59, %v5173_v6  ;;  %v3920_v24 = vpop.f32.mrb[68].mxu1 }
 0x45d   : > { %v3921_v37 = vpop.f32.mrb[69].mxu1 }
 0x45e   : > { %v2589_v34 = vadd.f32 %v5421_v52, %v2550_v61  ;;  %v3922_v40 = vadd.f32 %v3921_v37, %v3920_v24  ;;  %v3923_v15 = vpop.f32.mrb[70].mxu1  ;;  %v2620_v56 = vmax.f32 %v2588_v50, 0.0  ;;  %v5930_v24 = vmov 0  }
 0x45f   : > { %v3924_v32 = vpop.f32.mrb[71].mxu1 }
 0x460   : > { %v2621_v29 = vmax.f32 %v2589_v34, 0.0  ;;  %v2519_v17 = vmul.f32 %v3922_v40, %v4908_v49  ;;  %v3925_v43 = vadd.f32 %v3924_v32, %v3923_v15 }
 0x462   : > { %v2652_v39 = vpack.c.bf16 %v2621_v29, %v2620_v56  ;;  %v2551_v23 = vadd.f32 %v2519_v17, %v5175_v36  ;;  %v2520_v22 = vmul.f32 %v3925_v43, %v4917_v62 }
 0x464   : > { %v2552_v33 = vadd.f32 %v2520_v22, %v5177_v38  ;;  %v3926_v6 = vpop.f32.mrb[72].mxu1  ;;  %2797 = vmatmul.mubr.bf16.vlgmr.msra.gmra.mrb[128].mxu0 %v2652_v39  ;;  %v2590_v59 = vadd.f32 %v5421_v52, %v2551_v23 }
 0x465   : > { %v3927_v19 = vpop.f32.mrb[73].mxu1  ;;  %2806 = vmatprep.mubr.bf16.mxu0 %v5930_v24 }
 0x466   : > { %v3928_v61 = vadd.f32 %v3927_v19, %v3926_v6  ;;  %v3929_v50 = vpop.f32.mrb[74].mxu1  ;;  %v2591_v37 = vadd.f32 %v5421_v52, %v2552_v33  ;;  %v2622_v36 = vmax.f32 %v2590_v59, 0.0 }
 0x467   : > { %v3930_v40 = vpop.f32.mrb[75].mxu1 }
 0x468   : > { %v2521_v29 = vmul.f32 %v3928_v61, %v4934_v11  ;;  %v3931_v34 = vadd.f32 %v3930_v40, %v3929_v50  ;;  %v2623_v17 = vmax.f32 %v2591_v37, 0.0 }
 0x46a   : > { %v2553_v43 = vadd.f32 %v2521_v29, %v5179_v58  ;;  %v2522_v38 = vmul.f32 %v3931_v34, %v4936_v12  ;;  %v2653_v39 = vpack.c.bf16 %v2623_v17, %v2622_v36 }
 0x46c   : > { %v2554_v15 = vadd.f32 %v2522_v38, %v5181_v55  ;;  %v3932_v32 = vpop.f32.mrb[76].mxu1  ;;  %2807 = vmatmul.mubr.bf16.gmra.mrb[132].mxu0 %v2653_v39  ;;  %v2592_v56 = vadd.f32 %v5421_v52, %v2553_v43 }
 0x46d   : > { %v3933_v23 = vpop.f32.mrb[77].mxu1  ;;  %2816 = vmatprep.mubr.bf16.mxu0 %v5930_v24 }
 0x46e   : > { %v3934_v22 = vadd.f32 %v3933_v23, %v3932_v32  ;;  %v3935_v33 = vpop.f32.mrb[78].mxu1  ;;  %v2593_v6 = vadd.f32 %v5421_v52, %v2554_v15  ;;  %v2624_v61 = vmax.f32 %v2592_v56, 0.0 }
 0x46f   : > { %v3936_v59 = vpop.f32.mrb[79].mxu1 }
 0x470   : > { %v2523_v19 = vmul.f32 %v3934_v22, %v4953_v25  ;;  %v3937_v58 = vadd.f32 %v3936_v59, %v3935_v33  ;;  %v2625_v50 = vmax.f32 %v2593_v6, 0.0 }
 0x472   : > { %v2555_v37 = vadd.f32 %v2523_v19, %v5183_v60  ;;  %v2524_v55 = vmul.f32 %v3937_v58, %v4955_v26  ;;  %v2654_v40 = vpack.c.bf16 %v2625_v50, %v2624_v61 }
 0x474   : > { %v2556_v29 = vadd.f32 %v2524_v55, %v5185_v5  ;;  %v3938_v34 = vpop.f32.mrb[80].mxu1  ;;  %2817 = vmatmul.mubr.bf16.gmra.mrb[136].mxu0 %v2654_v40  ;;  %v2594_v36 = vadd.f32 %v5421_v52, %v2555_v37 }
 0x475   : > { %v3939_v17 = vpop.f32.mrb[81].mxu1  ;;  %2826 = vmatprep.mubr.bf16.mxu0 %v5930_v24 }
 0x476   : > { %v3940_v43 = vadd.f32 %v3939_v17, %v3938_v34  ;;  %v3941_v38 = vpop.f32.mrb[82].mxu1  ;;  %v2595_v39 = vadd.f32 %v5421_v52, %v2556_v29  ;;  %v2626_v56 = vmax.f32 %v2594_v36, 0.0 }
 0x477   : > { %v3942_v15 = vpop.f32.mrb[83].mxu1 }
 0x478   : > { %v2525_v32 = vmul.f32 %v3940_v43, %v4972_v46  ;;  %v3943_v60 = vadd.f32 %v3942_v15, %v3941_v38  ;;  %v2627_v23 = vmax.f32 %v2595_v39, 0.0 }
 0x47a   : > { %v2557_v22 = vadd.f32 %v2525_v32, %v5187_v10  ;;  %v2526_v5 = vmul.f32 %v3943_v60, %v4974_v47  ;;  %v2655_v33 = vpack.c.bf16 %v2627_v23, %v2626_v56 }
 0x47c   : > { %v2558_v6 = vadd.f32 %v2526_v5, %v5189_v18  ;;  %v3944_v59 = vpop.f32.mrb[84].mxu1  ;;  %2827 = vmatmul.mubr.bf16.gmra.mrb[140].mxu0 %v2655_v33  ;;  %v2596_v19 = vadd.f32 %v5421_v52, %v2557_v22 }
 0x47d   : > { %v3945_v58 = vpop.f32.mrb[85].mxu1  ;;  %2836 = vmatprep.mubr.bf16.mxu0 %v5930_v24 }
 0x47e   : > { %v3946_v61 = vadd.f32 %v3945_v58, %v3944_v59  ;;  %v3947_v50 = vpop.f32.mrb[86].mxu1  ;;  %v2597_v37 = vadd.f32 %v5421_v52, %v2558_v6  ;;  %v2628_v29 = vmax.f32 %v2596_v19, 0.0 }
 0x47f   : > { %v3948_v55 = vpop.f32.mrb[87].mxu1 }
 0x480   : > { %v2527_v40 = vmul.f32 %v3946_v61, %v4991_v1  ;;  %v3949_v10 = vadd.f32 %v3948_v55, %v3947_v50  ;;  %v2629_v34 = vmax.f32 %v2597_v37, 0.0 }
 0x482   : > { %v2559_v36 = vadd.f32 %v2527_v40, %v5191_v20  ;;  %v2528_v18 = vmul.f32 %v3949_v10, %v4993_v2  ;;  %v2656_v17 = vpack.c.bf16 %v2629_v34, %v2628_v29 }
 0x484   : > { %v2560_v43 = vadd.f32 %v2528_v18, %v5193_v54  ;;  %v3950_v38 = vpop.f32.mrb[88].mxu1  ;;  %2837 = vmatmul.mubr.bf16.gmra.mrb[144].mxu0 %v2656_v17  ;;  %v2598_v39 = vadd.f32 %v5421_v52, %v2559_v36 }
 0x485   : > { %v3951_v15 = vpop.f32.mrb[89].mxu1  ;;  %2846 = vmatprep.mubr.bf16.mxu0 %v5930_v24 }
 0x486   : > { %v3952_v32 = vadd.f32 %v3951_v15, %v3950_v38  ;;  %v3953_v60 = vpop.f32.mrb[90].mxu1  ;;  %v2599_v56 = vadd.f32 %v5421_v52, %v2560_v43  ;;  %v2630_v5 = vmax.f32 %v2598_v39, 0.0 }
 0x487   : > { %v3954_v23 = vpop.f32.mrb[91].mxu1 }
 0x488   : > { %v2529_v22 = vmul.f32 %v3952_v32, %v5010_v16  ;;  %v3955_v20 = vadd.f32 %v3954_v23, %v3953_v60  ;;  %v2631_v33 = vmax.f32 %v2599_v56, 0.0 }
 0x48a   : > { %v2561_v6 = vadd.f32 %v2529_v22, %v5195_v35  ;;  %v2530_v54 = vmul.f32 %v3955_v20, %v5012_v41  ;;  %v2657_v59 = vpack.c.bf16 %v2631_v33, %v2630_v5 }
 0x48c   : > { %v2562_v19 = vadd.f32 %v2530_v54, %v5197_v51  ;;  %v3956_v58 = vpop.f32.mrb[92].mxu1  ;;  %2847 = vmatmul.mubr.bf16.gmra.mrb[148].mxu0 %v2657_v59  ;;  %v2600_v61 = vadd.f32 %v5421_v52, %v2561_v6 }
 0x48d   : > { %v3957_v50 = vpop.f32.mrb[93].mxu1  ;;  %2856 = vmatprep.mubr.bf16.mxu0 %v5930_v24 }
 0x48e   : > { %v3958_v37 = vadd.f32 %v3957_v50, %v3956_v58  ;;  %v3959_v55 = vpop.f32.mrb[94].mxu1  ;;  %v2601_v40 = vadd.f32 %v5421_v52, %v2562_v19  ;;  %v2632_v34 = vmax.f32 %v2600_v61, 0.0 }
 0x48f   : > { %v3960_v10 = vpop.f32.mrb[95].mxu1 }
 0x490   : > { %v2531_v29 = vmul.f32 %v3958_v37, %v5020_v28  ;;  %v3961_v35 = vadd.f32 %v3960_v10, %v3959_v55  ;;  %v2633_v36 = vmax.f32 %v2601_v40, 0.0 }
 0x492   : > { %v2563_v18 = vadd.f32 %v2531_v29, %v5201_v4  ;;  %v2532_v51 = vmul.f32 %v3961_v35, %v5022_v30  ;;  %v2658_v17 = vpack.c.bf16 %v2633_v36, %v2632_v34 }
 0x494   : > { %v2564_v43 = vadd.f32 %v2532_v51, %v5207_v3  ;;  %v3962_v38 = vpop.f32.mrb[96].mxu1  ;;  %2857 = vmatmul.mubr.bf16.gmra.mrb[152].mxu0 %v2658_v17  ;;  %v2602_v39 = vadd.f32 %v5421_v52, %v2563_v18 }
 0x495   : > { %v3963_v15 = vpop.f32.mrb[97].mxu1  ;;  %2866 = vmatprep.mubr.bf16.mxu0 %v5930_v24 }
 0x496   : > { %v3964_v32 = vadd.f32 %v3963_v15, %v3962_v38  ;;  %v3965_v60 = vpop.f32.mrb[98].mxu1  ;;  %v2603_v56 = vadd.f32 %v5421_v52, %v2564_v43  ;;  %v2634_v20 = vmax.f32 %v2602_v39, 0.0 }
 0x497   : > { %v3966_v23 = vpop.f32.mrb[99].mxu1 }
 0x498   : > { %v2533_v22 = vmul.f32 %v3964_v32, %v5027_v44  ;;  %v3967_v4 = vadd.f32 %v3966_v23, %v3965_v60  ;;  %v2635_v5 = vmax.f32 %v2603_v56, 0.0 }
 0x49a   : > { %v2565_v33 = vadd.f32 %v2533_v22, %v5209_v21  ;;  %v2534_v3 = vmul.f32 %v3967_v4, %v5029_v48  ;;  %v2659_v6 = vpack.c.bf16 %v2635_v5, %v2634_v20 }
 0x49c   : > { %v2566_v54 = vadd.f32 %v2534_v3, %v5211_v53  ;;  %v3968_v59 = vpop.f32.mrb[100].mxu1  ;;  %2867 = vmatmul.mubr.bf16.gmra.mrb[156].mxu0 %v2659_v6  ;;  %v2604_v19 = vadd.f32 %v5421_v52, %v2565_v33 }
 0x49d   : > { %v3969_v58 = vpop.f32.mrb[101].mxu1  ;;  %2876 = vmatprep.mubr.bf16.mxu0 %v5930_v24 }
 0x49e   : > { %v3970_v61 = vadd.f32 %v3969_v58, %v3968_v59  ;;  %v3971_v50 = vpop.f32.mrb[102].mxu1  ;;  %v2605_v37 = vadd.f32 %v5421_v52, %v2566_v54  ;;  %v2636_v10 = vmax.f32 %v2604_v19, 0.0  ;;  %v5932_v58 = vld [vmem:[#allocation6_spill] sm:$0xff] }
 0x49f   : > { %v3972_v55 = vpop.f32.mrb[103].mxu1 }
 0x4a0   : > { %v2535_v40 = vmul.f32 %v3970_v61, %v5034_v63  ;;  %v3973_v21 = vadd.f32 %v3972_v55, %v3971_v50  ;;  %v2637_v29 = vmax.f32 %v2605_v37, 0.0  ;;  %v5933_v55 = vld [vmem:[#allocation16_spill] sm:$0xff] }
 0x4a2   : > { %v2567_v35 = vadd.f32 %v2535_v40, %v5213_v7  ;;  %v2536_v53 = vmul.f32 %v3973_v21, %v5036_v0  ;;  %v2660_v34 = vpack.c.bf16 %v2637_v29, %v2636_v10 }
 0x4a4   : > { %v2568_v36 = vadd.f32 %v2536_v53, %v5215_v9  ;;  %v3974_v18 = vpop.f32.mrb[104].mxu1  ;;  %2877 = vmatmul.mubr.bf16.gmra.mrb[160].mxu0 %v2660_v34  ;;  %v2606_v51 = vadd.f32 %v5421_v52, %v2567_v35  ;;  %v5931_v9 = vld [vmem:[#allocation5_spill] sm:$0xff] }
 0x4a5   : > { %v3975_v17 = vpop.f32.mrb[105].mxu1  ;;  %2886 = vmatprep.mubr.bf16.mxu0 %v5930_v24 }
 0x4a6   : > { %v3976_v43 = vadd.f32 %v3975_v17, %v3974_v18  ;;  %v3977_v38 = vpop.f32.mrb[106].mxu1  ;;  %v2607_v39 = vadd.f32 %v5421_v52, %v2568_v36  ;;  %v2638_v60 = vmax.f32 %v2606_v51, 0.0 }
 0x4a7   : > { %v3978_v15 = vpop.f32.mrb[107].mxu1 }
 0x4a8   : > { %v2537_v32 = vmul.f32 %v3976_v43, %v5041_v13  ;;  %v3979_v7 = vadd.f32 %v3978_v15, %v3977_v38  ;;  %v2639_v56 = vmax.f32 %v2607_v39, 0.0  ;;  %v5935_v43 = vld [vmem:[#allocation8_spill] sm:$0xff] }
 0x4aa   : > { %v2569_v23 = vadd.f32 %v2537_v32, %v5217_v8  ;;  %v2538_v22 = vmul.f32 %v3979_v7, %v5931_v9  ;;  %v2661_v4 = vpack.c.bf16 %v2639_v56, %v2638_v60  ;;  %v5936_v7 = vld [vmem:[#allocation17_spill] sm:$0xff] }
 0x4ac   : > { %v2570_v20 = vadd.f32 %v2538_v22, %v5219_v31  ;;  %v3980_v5 = vpop.f32.mrb[108].mxu1  ;;  %2887 = vmatmul.mubr.bf16.gmra.mrb[164].mxu0 %v2661_v4  ;;  %v2608_v33 = vadd.f32 %v5421_v52, %v2569_v23  ;;  %v5934_v31 = vld [vmem:[#allocation7_spill] sm:$0xff] }
 0x4ad   : > { %v3981_v3 = vpop.f32.mrb[109].mxu1  ;;  %2896 = vmatprep.mubr.bf16.mxu0 %v5930_v24 }
 0x4ae   : > { %v3982_v6 = vadd.f32 %v3981_v3, %v3980_v5  ;;  %v3983_v54 = vpop.f32.mrb[110].mxu1  ;;  %v2609_v59 = vadd.f32 %v5421_v52, %v2570_v20  ;;  %v2640_v50 = vmax.f32 %v2608_v33, 0.0 }
 0x4af   : > { %v3984_v19 = vpop.f32.mrb[111].mxu1 }
 0x4b0   : > { %v2539_v61 = vmul.f32 %v3982_v6, %v5932_v58  ;;  %v3985_v8 = vadd.f32 %v3984_v19, %v3983_v54  ;;  %v2641_v37 = vmax.f32 %v2609_v59, 0.0  ;;  %v5938_v59 = vld [vmem:[#allocation10_spill] sm:$0xff] }
 0x4b2   : > { %v2571_v40 = vadd.f32 %v2539_v61, %v5933_v55  ;;  %v2540_v21 = vmul.f32 %v3985_v8, %v5934_v31  ;;  %v2662_v10 = vpack.c.bf16 %v2641_v37, %v2640_v50 }
 0x4b4   : > { %v2572_v29 = vadd.f32 %v2540_v21, %v5223_v27  ;;  %v3986_v35 = vpop.f32.mrb[112].mxu1  ;;  %2897 = vmatmul.mubr.bf16.gmra.mrb[168].mxu0 %v2662_v10  ;;  %v2610_v53 = vadd.f32 %v5421_v52, %v2571_v40  ;;  %v5937_v27 = vld [vmem:[#allocation9_spill] sm:$0xff] }
 0x4b5   : > { %v3987_v34 = vpop.f32.mrb[113].mxu1  ;;  %2906 = vmatprep.mubr.bf16.mxu0 %v5930_v24 }
 0x4b6   : > { %v3988_v36 = vadd.f32 %v3987_v34, %v3986_v35  ;;  %v3989_v18 = vpop.f32.mrb[114].mxu1  ;;  %v2611_v51 = vadd.f32 %v5421_v52, %v2572_v29  ;;  %v2642_v15 = vmax.f32 %v2610_v53, 0.0 }
 0x4b7   : > { %v3990_v17 = vpop.f32.mrb[115].mxu1 }
 0x4b8   : > { %v2541_v38 = vmul.f32 %v3988_v36, %v5935_v43  ;;  %v3991_v39 = vadd.f32 %v3990_v17, %v3989_v18  ;;  %v2643_v32 = vmax.f32 %v2611_v51, 0.0  ;;  %v5940_v51 = vld [vmem:[#allocation12_spill] sm:$0xff] }
 0x4ba   : > { %v2573_v60 = vadd.f32 %v2541_v38, %v5936_v7  ;;  %v2542_v56 = vmul.f32 %v3991_v39, %v5937_v27  ;;  %v2663_v23 = vpack.c.bf16 %v2643_v32, %v2642_v15  ;;  %v5941_v15 = vld [vmem:[#allocation18_spill] sm:$0xff] }
 0x4bc   : > { %v2574_v22 = vadd.f32 %v2542_v56, %v5227_v14  ;;  %v3992_v4 = vpop.f32.mrb[116].mxu1  ;;  %2907 = vmatmul.mubr.bf16.gmra.mrb[172].mxu0 %v2663_v23  ;;  %v2612_v20 = vadd.f32 %v5421_v52, %v2573_v60  ;;  %v5939_v14 = vld [vmem:[#allocation11_spill] sm:$0xff] }
 0x4bd   : > { %v3993_v5 = vpop.f32.mrb[117].mxu1  ;;  %2916 = vmatprep.mubr.bf16.mxu0 %v5930_v24  ;;  %v5943_v56 = vld [vmem:[#allocation19_spill] sm:$0xff] }
 0x4be   : > { %v3994_v33 = vadd.f32 %v3993_v5, %v3992_v4  ;;  %v3995_v3 = vpop.f32.mrb[118].mxu1  ;;  %v2613_v6 = vadd.f32 %v5421_v52, %v2574_v22  ;;  %v2644_v8 = vmax.f32 %v2612_v20, 0.0 }
 0x4bf   : > { %v3996_v54 = vpop.f32.mrb[119].mxu1 }
 0x4c0   : > { %v2543_v19 = vmul.f32 %v3994_v33, %v5938_v59  ;;  %v3997_v61 = vadd.f32 %v3996_v54, %v3995_v3  ;;  %v2645_v50 = vmax.f32 %v2613_v6, 0.0  ;;  %v5944_v54 = vld [vmem:[#allocation14_spill] sm:$0xff] }
 0x4c2   : > { %v2575_v37 = vadd.f32 %v2543_v19, %v5229_v57  ;;  %v2544_v55 = vmul.f32 %v3997_v61, %v5939_v14  ;;  %v2664_v40 = vpack.c.bf16 %v2645_v50, %v2644_v8 }
 0x4c4   : > { %v2576_v21 = vadd.f32 %v2544_v55, %v5231_v45  ;;  %v3998_v10 = vpop.f32.mrb[120].mxu1  ;;  %2917 = vmatmul.mubr.bf16.gmra.mrb[176].mxu0 %v2664_v40  ;;  %v2614_v29 = vadd.f32 %v5421_v52, %v2575_v37  ;;  %v5942_v45 = vld [vmem:[#allocation13_spill] sm:$0xff]  ;;  %v5945_v37 = vld [vmem:[#allocation20_spill] sm:$0xff]  ;;  %v5946_v40 = vld [vmem:[#allocation15_spill] sm:$0xff] }
 0x4c5   : > { %v3999_v35 = vpop.f32.mrb[121].mxu1  ;;  %2926 = vmatprep.mubr.bf16.mxu0 %v5930_v24 }
 0x4c6   : > { %v4000_v53 = vadd.f32 %v3999_v35, %v3998_v10  ;;  %v4001_v34 = vpop.f32.mrb[122].mxu1  ;;  %v2615_v36 = vadd.f32 %v5421_v52, %v2576_v21  ;;  %v2646_v38 = vmax.f32 %v2614_v29, 0.0  ;;  %v5947_v29 = vld [vmem:[#allocation21_spill] sm:$0xff] }
 0x4c7   : > { %v4002_v18 = vpop.f32.mrb[123].mxu1 }
 0x4c8   : > { %v2545_v17 = vmul.f32 %v4000_v53, %v5940_v51  ;;  %v4003_v57 = vadd.f32 %v4002_v18, %v4001_v34  ;;  %v2647_v39 = vmax.f32 %v2615_v36, 0.0 }
 0x4ca   : > { %v2577_v32 = vadd.f32 %v2545_v17, %v5941_v15  ;;  %v2546_v7 = vmul.f32 %v4003_v57, %v5942_v45  ;;  %v2665_v60 = vpack.c.bf16 %v2647_v39, %v2646_v38 }
 0x4cc   : > { %v2578_v23 = vadd.f32 %v2546_v7, %v5943_v56  ;;  %v4004_v22 = vpop.f32.mrb[124].mxu1  ;;  %2927 = vmatmul.mubr.bf16.gmra.mrb[180].mxu0 %v2665_v60  ;;  %v2616_v4 = vadd.f32 %v5421_v52, %v2577_v32 }
 0x4cd   : > { %v4005_v20 = vpop.f32.mrb[125].mxu1  ;;  %2936 = vmatprep.mubr.bf16.mxu0 %v5930_v24 }
 0x4ce   : > { %v4006_v5 = vadd.f32 %v4005_v20, %v4004_v22  ;;  %v4007_v33 = vpop.f32.mrb[126].mxu1  ;;  %v2617_v3 = vadd.f32 %v5421_v52, %v2578_v23  ;;  %v2648_v8 = vmax.f32 %v2616_v4, 0.0 }
 0x4cf   : > { %v4008_v6 = vpop.f32.mrb[127].mxu1 }
 0x4d0   : > { %v2547_v19 = vmul.f32 %v4006_v5, %v5944_v54  ;;  %v4009_v61 = vadd.f32 %v4008_v6, %v4007_v33  ;;  %v2649_v50 = vmax.f32 %v2617_v3, 0.0 }
 0x4d2   : > { %v2579_v55 = vadd.f32 %v2547_v19, %v5945_v37  ;;  %v2548_v21 = vmul.f32 %v4009_v61, %v5946_v40  ;;  %v2666_v10 = vpack.c.bf16 %v2649_v50, %v2648_v8 }
 0x4d4   : > { %v2580_v35 = vadd.f32 %v2548_v21, %v5947_v29  ;;  %2937 = vmatmul.mubr.bf16.gmra.mrb[184].mxu0 %v2666_v10  ;;  %v2618_v53 = vadd.f32 %v5421_v52, %v2579_v55 }
 0x4d5   : > { %2946 = vmatprep.mubr.bf16.mxu0 %v5930_v24 }
 0x4d6   : > { %v2619_v34 = vadd.f32 %v5421_v52, %v2580_v35  ;;  %v2650_v36 = vmax.f32 %v2618_v53, 0.0 }
 0x4d8   : > { %v2651_v18 = vmax.f32 %v2619_v34, 0.0 }
 0x4da   : > { %v2667_v17 = vpack.c.bf16 %v2651_v18, %v2650_v36 }
 0x4dc   : > { %2947 = vmatmul.mubr.bf16.gmra.mrb[188].mxu0 %v2667_v17 }
 0x537   : > { %v2798_v57 = vpop.f32.mrb[128].mxu0 }
 0x538   : > { %v5533_v38 = vpop.f32.mrb[129].mxu0 }
 0x539   : > { %v2802_v39 = vpop.f32.mrb[130].mxu0 }
 0x53a   : > { %v2957_v15 = vpack.c.bf16 %v2802_v39, %v2798_v57  ;;  %v5535_v32 = vpop.f32.mrb[131].mxu0 }
 0x53f   : > { %v2808_v7 = vpop.f32.mrb[132].mxu0 }
 0x540   : > { %v5537_v60 = vpop.f32.mrb[133].mxu0 }
 0x541   : > { %v2812_v56 = vpop.f32.mrb[134].mxu0 }
 0x542   : > { %v2958_v23 = vpack.c.bf16 %v2812_v56, %v2808_v7  ;;  %v5539_v22 = vpop.f32.mrb[135].mxu0 }
 0x547   : > { %v2818_v24 = vpop.f32.mrb[136].mxu0 }
 0x548   : > { %v5541_v52 = vpop.f32.mrb[137].mxu0 }
 0x549   : > { %v2822_v4 = vpop.f32.mrb[138].mxu0 }
 0x54a   : > { %v2959_v20 = vpack.c.bf16 %v2822_v4, %v2818_v24  ;;  %v5543_v5 = vpop.f32.mrb[139].mxu0 }
 0x54f   : > { %v2828_v33 = vpop.f32.mrb[140].mxu0 }
 0x550   : > { %v5545_v3 = vpop.f32.mrb[141].mxu0 }
 0x551   : > { %v2832_v6 = vpop.f32.mrb[142].mxu0 }
 0x552   : > { %v2960_v19 = vpack.c.bf16 %v2832_v6, %v2828_v33  ;;  %v5547_v61 = vpop.f32.mrb[143].mxu0 }
 0x557   : > { %v2838_v8 = vpop.f32.mrb[144].mxu0 }
 0x558   : > { %v5549_v50 = vpop.f32.mrb[145].mxu0 }
 0x559   : > { %v2842_v37 = vpop.f32.mrb[146].mxu0 }
 0x55a   : > { %v2961_v55 = vpack.c.bf16 %v2842_v37, %v2838_v8  ;;  %v5551_v21 = vpop.f32.mrb[147].mxu0 }
 0x55f   : > { %v2848_v10 = vpop.f32.mrb[148].mxu0 }
 0x560   : > { %v5553_v29 = vpop.f32.mrb[149].mxu0 }
 0x561   : > { %v2852_v35 = vpop.f32.mrb[150].mxu0 }
 0x562   : > { %v2962_v53 = vpack.c.bf16 %v2852_v35, %v2848_v10  ;;  %v5555_v34 = vpop.f32.mrb[151].mxu0 }
 0x567   : > { %v2858_v36 = vpop.f32.mrb[152].mxu0 }
 0x568   : > { %v5557_v18 = vpop.f32.mrb[153].mxu0 }
 0x569   : > { %v2862_v17 = vpop.f32.mrb[154].mxu0 }
 0x56a   : > { %v2963_v57 = vpack.c.bf16 %v2862_v17, %v2858_v36  ;;  %v5559_v39 = vpop.f32.mrb[155].mxu0 }
 0x56f   : > { %v2868_v7 = vpop.f32.mrb[156].mxu0 }
 0x570   : > { %v5561_v56 = vpop.f32.mrb[157].mxu0 }
 0x571   : > { %v2872_v24 = vpop.f32.mrb[158].mxu0 }
 0x572   : > { %v2964_v4 = vpack.c.bf16 %v2872_v24, %v2868_v7  ;;  %v5563_v33 = vpop.f32.mrb[159].mxu0 }
 0x577   : > { %v2878_v6 = vpop.f32.mrb[160].mxu0 }
 0x578   : > { %v5565_v8 = vpop.f32.mrb[161].mxu0 }
 0x579   : > { %v2882_v37 = vpop.f32.mrb[162].mxu0 }
 0x57a   : > { %v2965_v10 = vpack.c.bf16 %v2882_v37, %v2878_v6  ;;  %v5567_v35 = vpop.f32.mrb[163].mxu0 }
 0x57c   : > { %4010 = vmatprep.subr.bf16.mxu1 %v2965_v10 }
 0x57d   : > { %4011 = vmatpush3.bf16.msra.mxu1 %v2957_v15 }
 0x57f   : > { %v2888_v40 = vpop.f32.mrb[164].mxu0 }
 0x580   : > { %v5569_v36 = vpop.f32.mrb[165].mxu0 }
 0x581   : > { %v2892_v17 = vpop.f32.mrb[166].mxu0 }
 0x582   : > { %v2966_v54 = vpack.c.bf16 %v2892_v17, %v2888_v40  ;;  %v5571_v45 = vpop.f32.mrb[167].mxu0 }
 0x584   : > { %4012 = vmatprep.subr.bf16.mxu1 %v2966_v54 }
 0x585   : > { %4013 = vmatpush3.bf16.msra.mxu1 %v2958_v23 }
 0x587   : > { %v2898_v7 = vpop.f32.mrb[168].mxu0 }
 0x588   : > { %v5573_v24 = vpop.f32.mrb[169].mxu0 }
 0x589   : > { %v2902_v51 = vpop.f32.mrb[170].mxu0 }
 0x58a   : > { %v2967_v14 = vpack.c.bf16 %v2902_v51, %v2898_v7  ;;  %v5575_v59 = vpop.f32.mrb[171].mxu0 }
 0x58c   : > { %4014 = vmatprep.subr.bf16.mxu1 %v2967_v14 }
 0x58d   : > { %4015 = vmatpush3.bf16.msra.mxu1 %v2959_v20 }
 0x58f   : > { %v2908_v6 = vpop.f32.mrb[172].mxu0 }
 0x590   : > { %v5577_v15 = vpop.f32.mrb[173].mxu0 }
 0x591   : > { %v2912_v37 = vpop.f32.mrb[174].mxu0 }
 0x592   : > { %v2968_v10 = vpack.c.bf16 %v2912_v37, %v2908_v6  ;;  %v5579_v27 = vpop.f32.mrb[175].mxu0 }
 0x594   : > { %4016 = vmatprep.subr.bf16.mxu1 %v2968_v10 }
 0x595   : > { %4017 = vmatpush3.bf16.msra.mxu1 %v2960_v19 }
 0x597   : > { %v2918_v54 = vpop.f32.mrb[176].mxu0 }
 0x598   : > { %v5581_v40 = vpop.f32.mrb[177].mxu0 }
 0x599   : > { %5948 = vst [vmem:[#allocation5_spill] sm:$0xff] %v5581_v40  ;;  %v2922_v23 = vpop.f32.mrb[178].mxu0 }
 0x59a   : > { %v2969_v17 = vpack.c.bf16 %v2922_v23, %v2918_v54  ;;  %v5583_v43 = vpop.f32.mrb[179].mxu0 }
 0x59c   : > { %4018 = vmatprep.subr.bf16.mxu1 %v2969_v17 }
 0x59d   : > { %4019 = vmatpush3.bf16.msra.mxu1 %v2961_v55 }
 0x59f   : > { %v2928_v14 = vpop.f32.mrb[180].mxu0 }
 0x5a0   : > { %v5585_v51 = vpop.f32.mrb[181].mxu0 }
 0x5a1   : > { %5949 = vst [vmem:[#allocation6_spill] sm:$0xff] %v5585_v51  ;;  %v2932_v20 = vpop.f32.mrb[182].mxu0 }
 0x5a2   : > { %v2970_v7 = vpack.c.bf16 %v2932_v20, %v2928_v14  ;;  %v5587_v31 = vpop.f32.mrb[183].mxu0  ;;  %v5955_v14 = vld [vmem:[#allocation22_spill] sm:$0xff]  ;;  %v5957_v20 = vld [vmem:[#allocation24_spill] sm:$0xff] }
 0x5a3   : > { %5950 = vst [vmem:[#allocation16_spill] sm:$0xff] %v5587_v31 }
 0x5a4   : > { %4020 = vmatprep.subr.bf16.mxu1 %v2970_v7  ;;  %v5958_v7 = vld [vmem:[#allocation25_spill] sm:$0xff] }
 0x5a5   : > { %4021 = vmatpush3.bf16.msra.mxu1 %v2962_v53  ;;  %v5956_v53 = vld [vmem:[#allocation23_spill] sm:$0xff] }
 0x5a7   : > { %v2938_v6 = vpop.f32.mrb[184].mxu0 }
 0x5a8   : > { %v5589_v19 = vpop.f32.mrb[185].mxu0 }
 0x5a9   : > { %5951 = vst [vmem:[#allocation17_spill] sm:$0xff] %v5589_v19  ;;  %v2942_v37 = vpop.f32.mrb[186].mxu0 }
 0x5aa   : > { %v2971_v10 = vpack.c.bf16 %v2942_v37, %v2938_v6  ;;  %v5591_v40 = vpop.f32.mrb[187].mxu0  ;;  %v5959_v6 = vld [vmem:[#allocation26_spill] sm:$0xff]  ;;  %v5961_v37 = vld [vmem:[#allocation28_spill] sm:$0xff] }
 0x5ab   : > { %5952 = vst [vmem:[#allocation18_spill] sm:$0xff] %v5591_v40 }
 0x5ac   : > { %4022 = vmatprep.subr.bf16.mxu1 %v2971_v10  ;;  %v5962_v10 = vld [vmem:[#allocation29_spill] sm:$0xff] }
 0x5ad   : > { %4023 = vmatpush3.bf16.msra.mxu1 %v2963_v57  ;;  %v5960_v57 = vld [vmem:[#allocation27_spill] sm:$0xff] }
 0x5af   : > { %v2948_v54 = vpop.f32.mrb[188].mxu0 }
 0x5b0   : > { %v5593_v55 = vpop.f32.mrb[189].mxu0 }
 0x5b1   : > { %5953 = vst [vmem:[#allocation19_spill] sm:$0xff] %v5593_v55  ;;  %v2952_v23 = vpop.f32.mrb[190].mxu0 }
 0x5b2   : > { %v2972_v17 = vpack.c.bf16 %v2952_v23, %v2948_v54  ;;  %v5595_v51 = vpop.f32.mrb[191].mxu0  ;;  %v5963_v54 = vld [vmem:[#allocation30_spill] sm:$0xff]  ;;  %v5964_v23 = vld [vmem:[#allocation31_spill] sm:$0xff] }
 0x5b3   : > { %5954 = vst [vmem:[#allocation20_spill] sm:$0xff] %v5595_v51  ;;  %v5986_v51 = vld [vmem:[#allocation4_spill] sm:$0xff] }
 0x5b4   : > { %4024 = vmatprep.subr.bf16.mxu1 %v2972_v17  ;;  %v5966_v17 = vld [vmem:[#allocation33_spill] sm:$0xff] }
 0x5b5   : > { %4025 = vmatpush3.bf16.msra.mxu1 %v2964_v4  ;;  %v5965_v4 = vld [vmem:[#allocation32_spill] sm:$0xff] }
 0x5b8   : > { %3006 = vmatmul.mubr.bf16.vlgmr.msra.gmra.mrb[128].mxu1 %v5955_v14  ;;  %v5967_v14 = vld [vmem:[#allocation34_spill] sm:$0xff] }
 0x5b9   : > { %3013 = vmatprep.mubr.bf16.mxu1 %v5956_v53  ;;  %v5968_v53 = vld [vmem:[#allocation35_spill] sm:$0xff] }
 0x5c0   : > { %3014 = vmatmul.mubr.bf16.gmra.mrb[132].mxu1 %v5957_v20  ;;  %v5969_v20 = vld [vmem:[#allocation36_spill] sm:$0xff] }
 0x5c1   : > { %3021 = vmatprep.mubr.bf16.mxu1 %v5958_v7  ;;  %v5970_v7 = vld [vmem:[#allocation37_spill] sm:$0xff] }
 0x5c8   : > { %3022 = vmatmul.mubr.bf16.gmra.mrb[136].mxu1 %v5959_v6  ;;  %v5971_v6 = vld [vmem:[#allocation38_spill] sm:$0xff] }
 0x5c9   : > { %3029 = vmatprep.mubr.bf16.mxu1 %v5960_v57  ;;  %v5972_v57 = vld [vmem:[#allocation39_spill] sm:$0xff] }
 0x5d0   : > { %3030 = vmatmul.mubr.bf16.gmra.mrb[140].mxu1 %v5961_v37  ;;  %v5973_v37 = vld [vmem:[#allocation40_spill] sm:$0xff] }
 0x5d1   : > { %3037 = vmatprep.mubr.bf16.mxu1 %v5962_v10  ;;  %v5974_v10 = vld [vmem:[#allocation41_spill] sm:$0xff] }
 0x5d8   : > { %3038 = vmatmul.mubr.bf16.gmra.mrb[144].mxu1 %v5963_v54  ;;  %v5975_v54 = vld [vmem:[#allocation42_spill] sm:$0xff] }
 0x5d9   : > { %3045 = vmatprep.mubr.bf16.mxu1 %v5964_v23  ;;  %v5976_v23 = vld [vmem:[#allocation43_spill] sm:$0xff] }
 0x5e0   : > { %3046 = vmatmul.mubr.bf16.gmra.mrb[148].mxu1 %v5965_v4  ;;  %v5977_v4 = vld [vmem:[#allocation44_spill] sm:$0xff] }
 0x5e1   : > { %3053 = vmatprep.mubr.bf16.mxu1 %v5966_v17  ;;  %v5978_v17 = vld [vmem:[#allocation45_spill] sm:$0xff] }
 0x5e8   : > { %3054 = vmatmul.mubr.bf16.gmra.mrb[152].mxu1 %v5967_v14  ;;  %v5979_v14 = vld [vmem:[#allocation46_spill] sm:$0xff] }
 0x5e9   : > { %3061 = vmatprep.mubr.bf16.mxu1 %v5968_v53  ;;  %v5980_v53 = vld [vmem:[#allocation47_spill] sm:$0xff] }
 0x5f0   : > { %3062 = vmatmul.mubr.bf16.gmra.mrb[156].mxu1 %v5969_v20  ;;  %v5981_v20 = vld [vmem:[#allocation48_spill] sm:$0xff] }
 0x5f1   : > { %3069 = vmatprep.mubr.bf16.mxu1 %v5970_v7  ;;  %v5982_v7 = vld [vmem:[#allocation49_spill] sm:$0xff] }
 0x5f8   : > { %3070 = vmatmul.mubr.bf16.gmra.mrb[160].mxu1 %v5971_v6  ;;  %v5983_v6 = vld [vmem:[#allocation50_spill] sm:$0xff] }
 0x5f9   : > { %3077 = vmatprep.mubr.bf16.mxu1 %v5972_v57  ;;  %v5984_v57 = vld [vmem:[#allocation51_spill] sm:$0xff] }
 0x600   : > { %3078 = vmatmul.mubr.bf16.gmra.mrb[164].mxu1 %v5973_v37  ;;  %v5985_v37 = vld [vmem:[#allocation52_spill] sm:$0xff] }
 0x601   : > { %3085 = vmatprep.mubr.bf16.mxu1 %v5974_v10 }
 0x608   : > { %3086 = vmatmul.mubr.bf16.gmra.mrb[168].mxu1 %v5975_v54 }
 0x609   : > { %3093 = vmatprep.mubr.bf16.mxu1 %v5976_v23 }
 0x610   : > { %3094 = vmatmul.mubr.bf16.gmra.mrb[172].mxu1 %v5977_v4 }
 0x611   : > { %3101 = vmatprep.mubr.bf16.mxu1 %v5978_v17 }
 0x618   : > { %3102 = vmatmul.mubr.bf16.gmra.mrb[176].mxu1 %v5979_v14 }
 0x619   : > { %3109 = vmatprep.mubr.bf16.mxu1 %v5980_v53  ;;  %v5632_v53 = vld [vmem:[%s5813_s8] ss:$0 sm:$0xff] }
 0x620   : > { %3110 = vmatmul.mubr.bf16.gmra.mrb[180].mxu1 %v5981_v20 }
 0x621   : > { %3117 = vmatprep.mubr.bf16.mxu1 %v5982_v7 }
 0x628   : > { %3118 = vmatmul.mubr.bf16.gmra.mrb[184].mxu1 %v5983_v6 }
 0x629   : > { %3125 = vmatprep.mubr.bf16.mxu1 %v5984_v57 }
 0x630   : > { %3126 = vmatmul.mubr.bf16.gmra.mrb[188].mxu1 %v5985_v37 }
 0x68b   : > { %v4026_v10 = vpop.f32.mrb[128].mxu1 }
 0x68c   : > { %v4027_v54 = vpop.f32.mrb[129].mxu1 }
 0x68d   : > { %v4028_v23 = vadd.f32 %v4027_v54, %v4026_v10  ;;  %v4029_v4 = vpop.f32.mrb[130].mxu1 }
 0x68e   : > { %v4030_v17 = vpop.f32.mrb[131].mxu1 }
 0x68f   : > { %v3134_v14 = vmul.f32 %v4028_v23, %v5986_v51  ;;  %v4031_v55 = vadd.f32 %v4030_v17, %v4029_v4 }
 0x691   : > { %v3166_v20 = vadd.f32 %v3134_v14, %v5533_v38  ;;  %v3135_v7 = vmul.f32 %v4031_v55, %v4898_v42  ;;  %v4388_v38 = vld [vmem:[%s652_s20 + $0x4] ss:$8 sps:$4 sm:$0xff]  }
 0x692   : > { %3329 = vmatprep.mubr.bf16.mxu0 %v4388_v38 }
 0x693   : > { %v3205_v6 = vadd.f32 %v5632_v53, %v3166_v20  ;;  %v3167_v57 = vadd.f32 %v3135_v7, %v5535_v32  ;;  %v4032_v51 = vpop.f32.mrb[132].mxu1 }
 0x694   : > { %v4033_v37 = vpop.f32.mrb[133].mxu1 }
 0x695   : > { %v3206_v10 = vadd.f32 %v5632_v53, %v3167_v57  ;;  %v4034_v54 = vadd.f32 %v4033_v37, %v4032_v51  ;;  %v4035_v23 = vpop.f32.mrb[134].mxu1  ;;  %v3237_v42 = vmax.f32 %v3205_v6, 0.0 }
 0x696   : > { %v4036_v4 = vpop.f32.mrb[135].mxu1 }
 0x697   : > { %v3238_v55 = vmax.f32 %v3206_v10, 0.0  ;;  %v3136_v17 = vmul.f32 %v4034_v54, %v4908_v49  ;;  %v4037_v14 = vadd.f32 %v4036_v4, %v4035_v23 }
 0x699   : > { %v3168_v20 = vadd.f32 %v3136_v17, %v5537_v60  ;;  %v3137_v32 = vmul.f32 %v4037_v14, %v4917_v62  ;;  %v5649_v7 = vpack.c.bf16 %v3238_v55, %v3237_v42 }
 0x69b   : > { %v3207_v40 = vadd.f32 %v5632_v53, %v3168_v20  ;;  %v3169_v57 = vadd.f32 %v3137_v32, %v5539_v22  ;;  %v4038_v51 = vpop.f32.mrb[136].mxu1 }
 0x69c   : > { %v4039_v37 = vpop.f32.mrb[137].mxu1 }
 0x69d   : > { %v3208_v19 = vadd.f32 %v5632_v53, %v3169_v57  ;;  %v4040_v6 = vadd.f32 %v4039_v37, %v4038_v51  ;;  %v4041_v10 = vpop.f32.mrb[138].mxu1  ;;  %v3239_v49 = vmax.f32 %v3207_v40, 0.0 }
 0x69e   : > { %v4042_v31 = vpop.f32.mrb[139].mxu1 }
 0x69f   : > { %v3240_v54 = vmax.f32 %v3208_v19, 0.0  ;;  %v3138_v23 = vmul.f32 %v4040_v6, %v4934_v11  ;;  %v4043_v60 = vadd.f32 %v4042_v31, %v4041_v10 }
 0x6a1   : > { %v3170_v62 = vadd.f32 %v3138_v23, %v5541_v52  ;;  %v3139_v38 = vmul.f32 %v4043_v60, %v4936_v12  ;;  %v5657_v4 = vpack.c.bf16 %v3240_v54, %v3239_v49 }
 0x6a3   : > { %v3209_v22 = vadd.f32 %v5632_v53, %v3170_v62  ;;  %v3171_v42 = vadd.f32 %v3139_v38, %v5543_v5  ;;  %v4044_v55 = vpop.f32.mrb[140].mxu1 }
 0x6a4   : > { %v4045_v17 = vpop.f32.mrb[141].mxu1 }
 0x6a5   : > { %v3210_v14 = vadd.f32 %v5632_v53, %v3171_v42  ;;  %v4046_v20 = vadd.f32 %v4045_v17, %v4044_v55  ;;  %v4047_v40 = vpop.f32.mrb[142].mxu1  ;;  %v3241_v32 = vmax.f32 %v3209_v22, 0.0 }
 0x6a6   : > { %v4048_v19 = vpop.f32.mrb[143].mxu1 }
 0x6a7   : > { %v3242_v11 = vmax.f32 %v3210_v14, 0.0  ;;  %v3140_v31 = vmul.f32 %v4046_v20, %v4953_v25  ;;  %v4049_v52 = vadd.f32 %v4048_v19, %v4047_v40 }
 0x6a9   : > { %v3172_v12 = vadd.f32 %v3140_v31, %v5545_v3  ;;  %v3141_v57 = vmul.f32 %v4049_v52, %v4955_v26  ;;  %v5665_v51 = vpack.c.bf16 %v3242_v11, %v3241_v32 }
 0x6ab   : > { %v3211_v5 = vadd.f32 %v5632_v53, %v3172_v12  ;;  %v3173_v37 = vadd.f32 %v3141_v57, %v5547_v61  ;;  %v4050_v6 = vpop.f32.mrb[144].mxu1 }
 0x6ac   : > { %v4051_v10 = vpop.f32.mrb[145].mxu1 }
 0x6ad   : > { %v3212_v49 = vadd.f32 %v5632_v53, %v3173_v37  ;;  %v4052_v54 = vadd.f32 %v4051_v10, %v4050_v6  ;;  %v4053_v23 = vpop.f32.mrb[146].mxu1  ;;  %v3243_v62 = vmax.f32 %v3211_v5, 0.0 }
 0x6ae   : > { %v4054_v60 = vpop.f32.mrb[147].mxu1 }
 0x6af   : > { %v3244_v25 = vmax.f32 %v3212_v49, 0.0  ;;  %v3142_v38 = vmul.f32 %v4052_v54, %v4972_v46  ;;  %v4055_v3 = vadd.f32 %v4054_v60, %v4053_v23 }
 0x6b1   : > { %v3174_v26 = vadd.f32 %v3142_v38, %v5549_v50  ;;  %v3143_v22 = vmul.f32 %v4055_v3, %v4974_v47  ;;  %v5673_v42 = vpack.c.bf16 %v3244_v25, %v3243_v62 }
 0x6b3   : > { %v3213_v61 = vadd.f32 %v5632_v53, %v3174_v26  ;;  %v3175_v55 = vadd.f32 %v3143_v22, %v5551_v21  ;;  %v4056_v17 = vpop.f32.mrb[148].mxu1 }
 0x6b4   : > { %v4057_v14 = vpop.f32.mrb[149].mxu1 }
 0x6b5   : > { %v3214_v20 = vadd.f32 %v5632_v53, %v3175_v55  ;;  %v4058_v40 = vadd.f32 %v4057_v14, %v4056_v17  ;;  %v4059_v19 = vpop.f32.mrb[150].mxu1  ;;  %v3245_v11 = vmax.f32 %v3213_v61, 0.0 }
 0x6b6   : > { %v4060_v32 = vpop.f32.mrb[151].mxu1 }
 0x6b7   : > { %v3246_v46 = vmax.f32 %v3214_v20, 0.0  ;;  %v3144_v31 = vmul.f32 %v4058_v40, %v4991_v1  ;;  %v4061_v50 = vadd.f32 %v4060_v32, %v4059_v19 }
 0x6b9   : > { %v3176_v47 = vadd.f32 %v3144_v31, %v5553_v29  ;;  %v3145_v52 = vmul.f32 %v4061_v50, %v4993_v2  ;;  %v5681_v12 = vpack.c.bf16 %v3246_v46, %v3245_v11 }
 0x6bb   : > { %v3215_v21 = vadd.f32 %v5632_v53, %v3176_v47  ;;  %v3177_v57 = vadd.f32 %v3145_v52, %v5555_v34  ;;  %v4062_v5 = vpop.f32.mrb[152].mxu1 }
 0x6bc   : > { %v4063_v37 = vpop.f32.mrb[153].mxu1 }
 0x6bd   : > { %v3216_v6 = vadd.f32 %v5632_v53, %v3177_v57  ;;  %v4064_v10 = vadd.f32 %v4063_v37, %v4062_v5  ;;  %v4065_v49 = vpop.f32.mrb[154].mxu1  ;;  %v3247_v23 = vmax.f32 %v3215_v21, 0.0 }
 0x6be   : > { %v4066_v54 = vpop.f32.mrb[155].mxu1 }
 0x6bf   : > { %v3248_v1 = vmax.f32 %v3216_v6, 0.0  ;;  %v3146_v60 = vmul.f32 %v4064_v10, %v5010_v16  ;;  %v4067_v29 = vadd.f32 %v4066_v54, %v4065_v49 }
 0x6c1   : > { %v3178_v2 = vadd.f32 %v3146_v60, %v5557_v18  ;;  %v3147_v62 = vmul.f32 %v4067_v29, %v5012_v41  ;;  %v5689_v25 = vpack.c.bf16 %v3248_v1, %v3247_v23 }
 0x6c3   : > { %v3217_v34 = vadd.f32 %v5632_v53, %v3178_v2  ;;  %v3179_v38 = vadd.f32 %v3147_v62, %v5559_v39  ;;  %v4068_v3 = vpop.f32.mrb[156].mxu1 }
 0x6c4   : > { %v4069_v26 = vpop.f32.mrb[157].mxu1 }
 0x6c5   : > { %v3218_v22 = vadd.f32 %v5632_v53, %v3179_v38  ;;  %v4070_v61 = vadd.f32 %v4069_v26, %v4068_v3  ;;  %v4071_v55 = vpop.f32.mrb[158].mxu1  ;;  %v3249_v14 = vmax.f32 %v3217_v34, 0.0 }
 0x6c6   : > { %v4072_v17 = vpop.f32.mrb[159].mxu1 }
 0x6c7   : > { %v3250_v16 = vmax.f32 %v3218_v22, 0.0  ;;  %v3148_v20 = vmul.f32 %v4070_v61, %v5020_v28  ;;  %v4073_v18 = vadd.f32 %v4072_v17, %v4071_v55 }
 0x6c9   : > { %v3180_v41 = vadd.f32 %v3148_v20, %v5561_v56  ;;  %v3149_v40 = vmul.f32 %v4073_v18, %v5022_v30  ;;  %v5697_v19 = vpack.c.bf16 %v3250_v16, %v3249_v14 }
 0x6cb   : > { %v3219_v39 = vadd.f32 %v5632_v53, %v3180_v41  ;;  %v3181_v32 = vadd.f32 %v3149_v40, %v5563_v33  ;;  %v4074_v11 = vpop.f32.mrb[160].mxu1 }
 0x6cc   : > { %v4075_v46 = vpop.f32.mrb[161].mxu1 }
 0x6cd   : > { %v3220_v31 = vadd.f32 %v5632_v53, %v3181_v32  ;;  %v4076_v50 = vadd.f32 %v4075_v46, %v4074_v11  ;;  %v4077_v47 = vpop.f32.mrb[162].mxu1  ;;  %v3251_v21 = vmax.f32 %v3219_v39, 0.0 }
 0x6ce   : > { %v4078_v52 = vpop.f32.mrb[163].mxu1 }
 0x6cf   : > { %v3252_v28 = vmax.f32 %v3220_v31, 0.0  ;;  %v3150_v57 = vmul.f32 %v4076_v50, %v5027_v44  ;;  %v4079_v56 = vadd.f32 %v4078_v52, %v4077_v47 }
 0x6d1   : > { %v3182_v30 = vadd.f32 %v3150_v57, %v5565_v8  ;;  %v3151_v5 = vmul.f32 %v4079_v56, %v5029_v48  ;;  %v5705_v37 = vpack.c.bf16 %v3252_v28, %v3251_v21 }
 0x6d3   : > { %v3183_v33 = vadd.f32 %v3151_v5, %v5567_v35  ;;  %v4080_v6 = vpop.f32.mrb[164].mxu1  ;;  %v3221_v10 = vadd.f32 %v5632_v53, %v3182_v30 }
 0x6d4   : > { %v4081_v49 = vpop.f32.mrb[165].mxu1 }
 0x6d5   : > { %v4082_v54 = vadd.f32 %v4081_v49, %v4080_v6  ;;  %v4083_v23 = vpop.f32.mrb[166].mxu1  ;;  %v3222_v1 = vadd.f32 %v5632_v53, %v3183_v33  ;;  %v3253_v2 = vmax.f32 %v3221_v10, 0.0  ;;  %v5988_v33 = vld [vmem:[#allocation8_spill] sm:$0xff] }
 0x6d6   : > { %v4084_v60 = vpop.f32.mrb[167].mxu1 }
 0x6d7   : > { %v3152_v44 = vmul.f32 %v4082_v54, %v5034_v63  ;;  %v4085_v29 = vadd.f32 %v4084_v60, %v4083_v23  ;;  %v3254_v8 = vmax.f32 %v3222_v1, 0.0  ;;  %v5989_v54 = vld [vmem:[#allocation5_spill] sm:$0xff] }
 0x6d9   : > { %v3184_v48 = vadd.f32 %v3152_v44, %v5569_v36  ;;  %v3153_v62 = vmul.f32 %v4085_v29, %v5036_v0  ;;  %v3279_v34 = vpack.c.bf16 %v3254_v8, %v3253_v2 }
 0x6db   : > { %v3185_v35 = vadd.f32 %v3153_v62, %v5571_v45  ;;  %v4086_v38 = vpop.f32.mrb[168].mxu1  ;;  %4122 = vmatprep.subr.bf16.mxu0 %v3279_v34  ;;  %v3223_v3 = vadd.f32 %v5632_v53, %v3184_v48 }
 0x6dc   : > { %v4087_v26 = vpop.f32.mrb[169].mxu1  ;;  %4123 = vmatpush3.bf16.msra.mxu0 %v5649_v7 }
 0x6dd   : > { %v4088_v22 = vadd.f32 %v4087_v26, %v4086_v38  ;;  %v4089_v61 = vpop.f32.mrb[170].mxu1  ;;  %v3224_v63 = vadd.f32 %v5632_v53, %v3185_v35  ;;  %v3255_v14 = vmax.f32 %v3223_v3, 0.0  ;;  %v5991_v35 = vld [vmem:[#allocation10_spill] sm:$0xff] }
 0x6de   : > { %v4090_v55 = vpop.f32.mrb[171].mxu1 }
 0x6df   : > { %v3154_v17 = vmul.f32 %v4088_v22, %v5041_v13  ;;  %v4091_v36 = vadd.f32 %v4090_v55, %v4089_v61  ;;  %v3256_v0 = vmax.f32 %v3224_v63, 0.0  ;;  %v5992_v61 = vld [vmem:[#allocation6_spill] sm:$0xff] }
 0x6e1   : > { %v3186_v16 = vadd.f32 %v3154_v17, %v5573_v24  ;;  %v3155_v45 = vmul.f32 %v4091_v36, %v5931_v9  ;;  %v3280_v20 = vpack.c.bf16 %v3256_v0, %v3255_v14  ;;  %v5994_v36 = vld [vmem:[#allocation16_spill] sm:$0xff] }
 0x6e3   : > { %v3187_v18 = vadd.f32 %v3155_v45, %v5575_v59  ;;  %v4092_v41 = vpop.f32.mrb[172].mxu1  ;;  %4124 = vmatprep.subr.bf16.mxu0 %v3280_v20  ;;  %v3225_v7 = vadd.f32 %v5632_v53, %v3186_v16  ;;  %v5987_v59 = vld [vmem:[#allocation7_spill] sm:$0xff] }
 0x6e4   : > { %v4093_v40 = vpop.f32.mrb[173].mxu1  ;;  %4125 = vmatpush3.bf16.msra.mxu0 %v5657_v4 }
 0x6e5   : > { %v4094_v39 = vadd.f32 %v4093_v40, %v4092_v41  ;;  %v4095_v32 = vpop.f32.mrb[174].mxu1  ;;  %v3226_v13 = vadd.f32 %v5632_v53, %v3187_v18  ;;  %v3257_v31 = vmax.f32 %v3225_v7, 0.0  ;;  %v5995_v7 = vld [vmem:[#allocation12_spill] sm:$0xff] }
 0x6e6   : > { %v4096_v11 = vpop.f32.mrb[175].mxu1 }
 0x6e7   : > { %v3156_v46 = vmul.f32 %v4094_v39, %v5932_v58  ;;  %v4097_v24 = vadd.f32 %v4096_v11, %v4095_v32  ;;  %v3258_v9 = vmax.f32 %v3226_v13, 0.0  ;;  %v5996_v11 = vld [vmem:[#allocation17_spill] sm:$0xff] }
 0x6e9   : > { %v3188_v50 = vadd.f32 %v3156_v46, %v5577_v15  ;;  %v3157_v47 = vmul.f32 %v4097_v24, %v5987_v59  ;;  %v3281_v52 = vpack.c.bf16 %v3258_v9, %v3257_v31  ;;  %v5997_v24 = vld [vmem:[#allocation13_spill] sm:$0xff] }
 0x6eb   : > { %v3189_v21 = vadd.f32 %v3157_v47, %v5579_v27  ;;  %v4098_v28 = vpop.f32.mrb[176].mxu1  ;;  %4126 = vmatprep.subr.bf16.mxu0 %v3281_v52  ;;  %v3227_v4 = vadd.f32 %v5632_v53, %v3188_v50  ;;  %v5990_v27 = vld [vmem:[#allocation9_spill] sm:$0xff]  ;;  %v5998_v50 = vld [vmem:[#allocation18_spill] sm:$0xff] }
 0x6ec   : > { %v4099_v57 = vpop.f32.mrb[177].mxu1  ;;  %4127 = vmatpush3.bf16.msra.mxu0 %v5665_v51 }
 0x6ed   : > { %v4100_v56 = vadd.f32 %v4099_v57, %v4098_v28  ;;  %v4101_v30 = vpop.f32.mrb[178].mxu1  ;;  %v3228_v58 = vadd.f32 %v5632_v53, %v3189_v21  ;;  %v3259_v10 = vmax.f32 %v3227_v4, 0.0 }
 0x6ee   : > { %v4102_v5 = vpop.f32.mrb[179].mxu1 }
 0x6ef   : > { %v3158_v6 = vmul.f32 %v4100_v56, %v5988_v33  ;;  %v4103_v15 = vadd.f32 %v4102_v5, %v4101_v30  ;;  %v3260_v49 = vmax.f32 %v3228_v58, 0.0  ;;  %v5999_v56 = vld [vmem:[#allocation14_spill] sm:$0xff] }
 0x6f1   : > { %v3190_v23 = vadd.f32 %v3158_v6, %v5989_v54  ;;  %v3159_v1 = vmul.f32 %v4103_v15, %v5990_v27  ;;  %v3282_v60 = vpack.c.bf16 %v3260_v49, %v3259_v10  ;;  %v6000_v6 = vld [vmem:[#allocation19_spill] sm:$0xff] }
 0x6f2   : > { %v6001_v10 = vld [vmem:[#allocation15_spill] sm:$0xff] }
 0x6f3   : > { %v3191_v44 = vadd.f32 %v3159_v1, %v5583_v43  ;;  %v4104_v29 = vpop.f32.mrb[180].mxu1  ;;  %4128 = vmatprep.subr.bf16.mxu0 %v3282_v60  ;;  %v3229_v51 = vadd.f32 %v5632_v53, %v3190_v23  ;;  %v5993_v43 = vld [vmem:[#allocation11_spill] sm:$0xff]  ;;  %v6002_v23 = vld [vmem:[#allocation20_spill] sm:$0xff] }
 0x6f4   : > { %v4105_v2 = vpop.f32.mrb[181].mxu1  ;;  %4129 = vmatpush3.bf16.msra.mxu0 %v5673_v42 }
 0x6f5   : > { %v4106_v8 = vadd.f32 %v4105_v2, %v4104_v29  ;;  %v4107_v48 = vpop.f32.mrb[182].mxu1  ;;  %v3230_v62 = vadd.f32 %v5632_v53, %v3191_v44  ;;  %v3261_v26 = vmax.f32 %v3229_v51, 0.0  ;;  %v4386_v51 = vld [vmem:[%s652_s20] ss:$8 sps:$4 sm:$0xff]  }
 0x6f6   : > { %v4108_v34 = vpop.f32.mrb[183].mxu1  ;;  %v4389_v2 = vld [vmem:[%s5814_s9] sm:$0xff]  }
 0x6f7   : > { %v3160_v38 = vmul.f32 %v4106_v8, %v5991_v35  ;;  %v4109_v3 = vadd.f32 %v4108_v34, %v4107_v48  ;;  %v3262_v22 = vmax.f32 %v3230_v62, 0.0  ;;  %v4470_v8 = vmov 0.0   ;;  %v4393_v48 = vld [vmem:[%s5814_s9 + $0x20] sm:$0xff]   ;;  %v4394_v62 = vld [vmem:[%s5814_s9 + $0x28] sm:$0xff]   ;;  %v4395_v34 = vld [vmem:[%s5814_s9 + $0x30] sm:$0xff]  }
 0x6f8   : > { %v4396_v35 = vld [vmem:[%s5814_s9 + $0x38] sm:$0xff]  }
 0x6f9   : > { %v3192_v63 = vadd.f32 %v3160_v38, %v5992_v61  ;;  %v3161_v55 = vmul.f32 %v4109_v3, %v5993_v43  ;;  %v3283_v17 = vpack.c.bf16 %v3262_v22, %v3261_v26  ;;  %v3343_v43 = vpop.permute.xlu0 %3342 }
 0x6fb   : > { %v3193_v14 = vadd.f32 %v3161_v55, %v5994_v36  ;;  %v4110_v0 = vpop.f32.mrb[184].mxu1  ;;  %4130 = vmatprep.subr.bf16.mxu0 %v3283_v17  ;;  %v3231_v42 = vadd.f32 %v5632_v53, %v3192_v63  ;;  %v3348_v55 = vpop.permute.xlu1 %3347 }
 0x6fc   : > { %v4111_v16 = vpop.f32.mrb[185].mxu1  ;;  %4131 = vmatpush3.bf16.msra.mxu0 %v5681_v12 }
 0x6fd   : > { %v4112_v45 = vadd.f32 %v4111_v16, %v4110_v0  ;;  %v4113_v20 = vpop.f32.mrb[186].mxu1  ;;  %v3232_v18 = vadd.f32 %v5632_v53, %v3193_v14  ;;  %v3263_v32 = vmax.f32 %v3231_v42, 0.0  ;;  %v6003_v0 = vlaneseq  ;;  %v3773_v16 = vld [vmem:[%s5815_s10] ss:$0 sm:$0xff] }
 0x6fe   : > { %v4114_v41 = vpop.f32.mrb[187].mxu1 }
 0x6ff   : > { %v3162_v40 = vmul.f32 %v4112_v45, %v5995_v7  ;;  %v4115_v39 = vadd.f32 %v4114_v41, %v4113_v20  ;;  %v3264_v13 = vmax.f32 %v3232_v18, 0.0  ;;  %v3466_v42 = vand.u32 127, %v6003_v0 }
 0x701   : > { %v3194_v46 = vadd.f32 %v3162_v40, %v5996_v11  ;;  %v3163_v31 = vmul.f32 %v4115_v39, %v5997_v24  ;;  %v3284_v9 = vpack.c.bf16 %v3264_v13, %v3263_v32  ;;  %vm3467_vm1 = vcmp.lt.s32.totalorder %v3466_v42, 4 }
 0x703   : > { %v3195_v59 = vadd.f32 %v3163_v31, %v5998_v50  ;;  %v4116_v47 = vpop.f32.mrb[188].mxu1  ;;  %4132 = vmatprep.subr.bf16.mxu0 %v3284_v9  ;;  %v3233_v12 = vadd.f32 %v5632_v53, %v3194_v46 }
 0x704   : > { %v4117_v52 = vpop.f32.mrb[189].mxu1  ;;  %4133 = vmatpush3.bf16.msra.mxu0 %v5689_v25 }
 0x705   : > { %v4118_v21 = vadd.f32 %v4117_v52, %v4116_v47  ;;  %v4119_v28 = vpop.f32.mrb[190].mxu1  ;;  %v3234_v4 = vadd.f32 %v5632_v53, %v3195_v59  ;;  %v3265_v5 = vmax.f32 %v3233_v12, 0.0 }
 0x706   : > { %v4120_v57 = vpop.f32.mrb[191].mxu1 }
 0x707   : > { %v3164_v30 = vmul.f32 %v4118_v21, %v5999_v56  ;;  %v4121_v58 = vadd.f32 %v4120_v57, %v4119_v28  ;;  %v3266_v33 = vmax.f32 %v3234_v4, 0.0 }
 0x709   : > { %v3196_v15 = vadd.f32 %v3164_v30, %v6000_v6  ;;  %v3165_v49 = vmul.f32 %v4121_v58, %v6001_v10  ;;  %v3285_v54 = vpack.c.bf16 %v3266_v33, %v3265_v5 }
 0x70b   : > { %v3197_v27 = vadd.f32 %v3165_v49, %v6002_v23  ;;  %4134 = vmatprep.subr.bf16.mxu0 %v3285_v54  ;;  %v3235_v25 = vadd.f32 %v5632_v53, %v3196_v15 }
 0x70c   : > { %4135 = vmatpush3.bf16.msra.mxu0 %v5697_v19  ;;  %v4391_v19 = vld [vmem:[%s5814_s9 + $0x10] sm:$0xff]  }
 0x70d   : > { %v3236_v1 = vadd.f32 %v5632_v53, %v3197_v27  ;;  %v3267_v60 = vmax.f32 %v3235_v25, 0.0  ;;  %v4390_v53 = vld [vmem:[%s5814_s9 + $0x8] sm:$0xff]  }
 0x70f   : > { %v3268_v44 = vmax.f32 %v3236_v1, 0.0 }
 0x711   : > { %v3286_v29 = vpack.c.bf16 %v3268_v44, %v3267_v60 }
 0x713   : > { %4136 = vmatprep.subr.bf16.mxu0 %v3286_v29 }
 0x714   : > { %4137 = vmatpush3.bf16.msra.mxu0 %v5705_v37  ;;  %v4392_v37 = vld [vmem:[%s5814_s9 + $0x18] sm:$0xff]  }
 0x715   : > { %4153 = vmatprep.subr.bf16.mxu0 %v4470_v8 }
 0x717   : > { %3330 = vmatmul.mubr.bf16.vlgmr.msra.gmra.mrb[192].mxu0 %v4386_v51 }
 0x718   : > { %4154 = vmatpush3.bf16.msra.mxu0 %v4389_v2  ;;  %4169 = vmatprep.mubr.msk.bf16.mxu0 %vm4471_vm0, %v4470_v8 }
 0x719   : > { %4155 = vmatprep.subr.bf16.mxu0 %v4470_v8 }
 0x71c   : > { %4156 = vmatpush3.bf16.msra.mxu0 %v4390_v53 }
 0x71d   : > { %4157 = vmatprep.subr.bf16.mxu0 %v4470_v8 }
 0x720   : > { %4158 = vmatpush3.bf16.msra.mxu0 %v4391_v19 }
 0x721   : > { %4159 = vmatprep.subr.bf16.mxu0 %v4470_v8 }
 0x724   : > { %4160 = vmatpush3.bf16.msra.mxu0 %v4392_v37 }
 0x725   : > { %4161 = vmatprep.subr.bf16.mxu0 %v4470_v8 }
 0x728   : > { %4162 = vmatpush3.bf16.msra.mxu0 %v4393_v48 }
 0x729   : > { %4163 = vmatprep.subr.bf16.mxu0 %v4470_v8 }
 0x72c   : > { %4164 = vmatpush3.bf16.msra.mxu0 %v4394_v62 }
 0x72d   : > { %4165 = vmatprep.subr.bf16.mxu0 %v4470_v8 }
 0x730   : > { %4166 = vmatpush3.bf16.msra.mxu0 %v4395_v34 }
 0x731   : > { %4167 = vmatprep.subr.bf16.mxu0 %v4470_v8 }
 0x734   : > { %4168 = vmatpush3.bf16.msra.mxu0 %v4396_v35 }
 0x7ea   : > { %v4138_v38 = vpop.f32.mrb[192].mxu0 }
 0x7eb   : > { %v4139_v3 = vpop.f32.mrb[193].mxu0 }
 0x7ec   : > { %v4140_v26 = vadd.f32 %v4139_v3, %v4138_v38  ;;  %v4141_v22 = vpop.f32.mrb[194].mxu0 }
 0x7ed   : > { %v4142_v61 = vpop.f32.mrb[195].mxu0 }
 0x7ee   : > { %v4143_v63 = vadd.f32 %v4142_v61, %v4141_v22  ;;  %v3350_v17 = vmul.f32 %v4140_v26, %v3343_v43 }
 0x7f0   : > { %v3351_v36 = vmul.f32 %v4143_v63, %v3348_v55 }
 0x7f2   : > { %v3352_v14 = vpack.c.bf16 %v3351_v36, %v3350_v17 }
 0x7f4   : > { %4170 = vmatmul.mubr.bf16.vlgmr.msra.gmra.mrb[196].mxu0 %v3352_v14 }
 0x8c7   : > { %v3458_v45 = vpop.f32.mrb[196].mxu0 }
 0x8c8   : > { %v3459_v20 = vadd.f32 %v3773_v16, %v3458_v45  ;;  %v4171_v18 = vpop.f32.mrb[197].mxu0 }
 0x8c9   : > { %v3461_v41 = vpop.f32.mrb[198].mxu0 }
 0x8ca   : > { %v3462_v7 = vadd.f32 %v3773_v16, %v3461_v41  ;;  %v4172_v40 = vpop.f32.mrb[199].mxu0  ;;  %v3468_v39 = vsel %vm3467_vm1, %v3459_v20, -1e+30 }
 0x8cb   : > { %3470 = vmax.xlane.f32.xlu0 %v3468_v39 }
 0x8cc   : > { %v3469_v32 = vsel %vm3467_vm1, %v3462_v7, -1e+30 }
 0x8cd   : > { %3472 = vmax.xlane.f32.xlu1 %v3469_v32 }
 0x958   : > { %v3471_v13 = vpop.xlane.xlu0 %3470 }
 0x959   : > { %v3474_v11 = vsub.f32 %v3468_v39, %v3471_v13 }
 0x95a   : > { %v3473_v46 = vpop.xlane.xlu1 %3472 }
 0x95b   : > { %v3476_v24 = vmul.f32 1.442695, %v3474_v11  ;;  %v3475_v31 = vsub.f32 %v3469_v32, %v3473_v46 }
 0x95d   : > { %4397 = vpow2.f32 %v3476_v24  ;;  %v3478_v9 = vmul.f32 1.442695, %v3475_v31 }
 0x95f   : > { %4399 = vpow2.f32 %v3478_v9 }
 0x967   : > { %v4398_v50 = vpop.eup %4397 }
 0x968   : > { %3480 = vadd.xlane.f32.xlu0 %v4398_v50 }
 0x969   : > { %v4400_v59 = vpop.eup %4399 }
 0x96c   : > { %3482 = vadd.xlane.f32.xlu0 %v4400_v59 }
 0x9f5   : > { %v3481_v47 = vpop.xlane.xlu0 %3480 }
 0x9f6   : > { %4401 = vlog2.f32 %v3481_v47 }
 0x9f9   : > { %v3483_v12 = vpop.xlane.xlu0 %3482 }
 0x9fa   : > { %4403 = vlog2.f32 %v3483_v12 }
 0xa00   : > { %v4402_v52 = vpop.eup %4401 }
 0xa01   : > { %v3485_v21 = vmul.f32 0.6931472, %v4402_v52 }
 0xa03   : > { %v3488_v28 = vadd.f32 %v3485_v21, %v3471_v13 }
 0xa04   : > { %v4404_v4 = vpop.eup %4403 }
 0xa05   : > { %v3490_v57 = vsub.f32 %v3468_v39, %v3488_v28  ;;  %v3487_v56 = vmul.f32 0.6931472, %v4404_v4 }
 0xa07   : > { %3492 = vst [vmem:[%s738_s15] sm:$0xff] %v3490_v57  ;;  %v3489_v30 = vadd.f32 %v3487_v56, %v3473_v46 }
 0xa09   : > { %v3491_v58 = vsub.f32 %v3469_v32, %v3489_v30 }
 0xa0b   : > { %3493 = vst [vmem:[%s738_s15 + $0x8] sm:$0xff] %v3491_v58 }
 0xa0c PF: > { %p20_p10 = scmp.ge.s32.totalorder %s4559_s29, 6   ;;  %s6005_s25 = smov %s4463_s26 }
 0xa0d   : > { %s6006_s26 = smov %s4568_s16  ;;  %s6007_s27 = smov %s4559_s29 }
 0xa0e   :  { %22 = sbr.rel (!%p20_p10) target bundleno = 2 (0x2), region = 200 }

</bundles_post_ra>
